<compile_context>
chip_gen: v5e
topology: v5e:2x2
jax: 0.10.0
libtpu: 0.0.40
codegen_flags: <defaults>
</compile_context>

<pallas_src>
import functools
import numpy as np
import jax
import jax.numpy as jnp
from jax.experimental import pallas as pl
from jax.experimental.pallas import tpu as pltpu

CONFIG = dict(
    embed_dim=32,
    num_heads=4,
    key_dim=8,
    head_size=None,            # None -> key_dim (as in the PyTorch module)
    ff_dim=64,
    num_blocks=2,
    max_relative_position=16,
    dense_units=[32, 16],
    activation="relu",
    dropout_rate=0.1,          # eval mode -> dropout is a no-op
    use_relative_attention=True,
)

_LANES = 128


# ----------------------------- packed-slab layouts -----------------------------

def _align(n, m=8):
    return ((n + m - 1) // m) * m


def _consts_layout(H, S, Bb, KD, HS):
    """Sublane-stacked constants slab; every piece starts at lane offset 0."""
    Sx = Bb * S
    HSx = H * Sx
    o = dict(qsel=0, qmask=HSx, vmask=2 * HSx, sbias=3 * HSx, pool=4 * HSx)
    o['rows'] = _align(4 * HSx + Bb)
    o['width'] = max(Sx, H * KD, H * HS)
    return o


def _wblk_layout(E, H, KD, HS, FF):
    """Per-block matmul-weight slab (bf16 -> 16-row aligned sections)."""
    o = {}
    r = 0
    o['qkvg'] = r; r = _align(r + E, 16)           # [Wq|Wk|Wv|Wgate]  (E, 4E)
    o['ff'] = r;   r = _align(r + E, 16)           # [Wf1|Wfg]         (E, 2FF)
    o['o'] = r;    r = _align(r + H * HS, 16)      # Wo                (H*HS, E)
    o['f2'] = r;   r = _align(r + FF, 16)          # Wf2               (FF, E)
    o['rows'] = _align(r, 16)
    o['width'] = _align(max(2 * H * KD + H * HS + E, 2 * FF, E), 128)
    return o


_BBLK_NAMES = ('b_qkvg', 'b_ff', 'b_o', 'b_f2', 'g1', 'bt1', 'g2', 'bt2')


def _bblk_layout():
    o = {n: 8 * i for i, n in enumerate(_BBLK_NAMES)}
    o['rows'] = 8 * len(_BBLK_NAMES)
    return o


def _whead_layout(E, Fc, Fo, U1, U2):
    o = {}
    r = 0
    o['cgm_w'] = r; r = _align(r + Fc)
    o['oth_w'] = r; r = _align(r + Fo)
    o['w1'] = r;    r = _align(r + 2 * E)
    o['w2'] = r;    r = _align(r + U1)
    o['w3'] = r;    r = _align(r + U2)
    for n in ('cgm_b', 'oth_b', 'hb1', 'hg1', 'hbt1', 'hb2', 'hg2', 'hbt2', 'hb3'):
        o[n] = r; r = _align(r + 1)
    o['rows'] = _align(r)
    o['width'] = max(E, U1, U2)
    return o


# ----------------------------- fused Pallas kernel -----------------------------

def _layernorm(x, gamma, beta, eps=1e-6):
    mu = jnp.mean(x, axis=-1, keepdims=True)
    var = jnp.mean((x - mu) ** 2, axis=-1, keepdims=True)
    return (x - mu) * jax.lax.rsqrt(var + eps) * gamma + beta


def fused_forward_kernel(consts_ref, xc_ref, xo_ref,
                         wblk_ref, bblk_ref, whead_ref, o_ref, *,
                         num_blocks, num_heads, key_dim, head_size, ff_dim,
                         embed_dim, seq_len, batch_block, dense_units):
    E, H, KD, HS, FF = embed_dim, num_heads, key_dim, head_size, ff_dim
    S, Bb = seq_len, batch_block
    U1, U2 = dense_units
    Sx, HKD, HHS = Bb * S, H * KD, H * HS
    HSx = H * Sx
    f32, bf16 = jnp.float32, jnp.bfloat16
    scale = 1.0 / float(np.sqrt(KD))

    Fc = xc_ref.shape[-1]
    Fo = xo_ref.shape[-1]
    CL = _consts_layout(H, S, Bb, KD, HS)
    WL = _wblk_layout(E, H, KD, HS, FF)
    BL = _bblk_layout()
    HL = _whead_layout(E, Fc, Fo, U1, U2)

    # ---- hoisted constants (built on the host at pack time) ----
    qsel = consts_ref[CL['qsel']:CL['qsel'] + HSx, 0:Sx]     # (HSx, Sx) one-hot replicator
    qmask = consts_ref[CL['qmask']:CL['qmask'] + HSx, 0:HKD]  # head mask on q columns
    vmask = consts_ref[CL['vmask']:CL['vmask'] + HSx, 0:HHS]  # head mask on v columns
    sbias = consts_ref[CL['sbias']:CL['sbias'] + HSx, 0:Sx]   # pos bias + cross-batch -1e30
    pool = consts_ref[CL['pool']:CL['pool'] + Bb, 0:Sx]       # sequence mean-pool matrix

    # ---- input projection for Bb batch rows: (Bb*S, Fc) @ (Fc, E) ----
    cgm_w = whead_ref[HL['cgm_w']:HL['cgm_w'] + Fc, 0:E]
    cgm_b = whead_ref[HL['cgm_b']:HL['cgm_b'] + 1, 0:E]
    x = jnp.dot(xc_ref[...], cgm_w, preferred_element_type=f32) + cgm_b     # (Sx, E)

    for blk in range(num_blocks):                                # static unroll
        # packed [Q | K | V | gate] projection; bf16 weights -> single MXU pass
        w_qkvg = wblk_ref[blk, WL['qkvg']:WL['qkvg'] + E, :]
        proj = jnp.dot(x.astype(bf16), w_qkvg, preferred_element_type=f32)
        proj = proj + bblk_ref[blk, BL['b_qkvg']:BL['b_qkvg'] + 1, :]
        q = proj[:, 0:HKD]
        k = proj[:, HKD:2 * HKD]
        v = proj[:, 2 * HKD:2 * HKD + HHS]
        gpre = proj[:, 2 * HKD + HHS:2 * HKD + HHS + E]

        # all-(batch,head) scores in one MXU pass: replicate q via the one-hot
        # selector (MXU) + zero cross-head columns (4 vreg muls)
        q_rep = jnp.dot(qsel, q, preferred_element_type=f32) * qmask        # (HSx, HKD)
        s = jax.lax.dot_general(q_rep, k, (((1,), (1,)), ((), ())),
                                preferred_element_type=f32)                 # (HSx, Sx)
        s = s * scale + sbias          # relative-pos bias + cross-batch mask

        # softmax across keys (masked columns underflow to exactly 0)
        m = jnp.max(s, axis=-1, keepdims=True)
        p = jnp.exp(s - m)
        p = p * pl.reciprocal(jnp.sum(p, axis=-1, keepdims=True), approx=False)

        ctx_all = jnp.dot(p, v, preferred_element_type=f32) * vmask         # (HSx, HHS)
        # fold per-head row groups back to (Sx, HHS): H-1 cheap sublane adds
        ctx = ctx_all[0:Sx]
        for h in range(1, H):
            ctx = ctx + ctx_all[h * Sx:(h + 1) * Sx]

        w_o = wblk_ref[blk, WL['o']:WL['o'] + HHS, 0:E]
        b_o = bblk_ref[blk, BL['b_o']:BL['b_o'] + 1, 0:E]
        attn = jnp.dot(ctx.astype(bf16), w_o, preferred_element_type=f32) + b_o
        attn = jax.nn.sigmoid(gpre) * attn
        # TODO(synk): dropout omitted — the module is evaluated with training=False.

        x1 = _layernorm(x + attn,
                        bblk_ref[blk, BL['g1']:BL['g1'] + 1, 0:E],
                        bblk_ref[blk, BL['bt1']:BL['bt1'] + 1, 0:E])

        # packed [FF1 | FF-gate] projection
        w_ff = wblk_ref[blk, WL['ff']:WL['ff'] + E, :]
        fproj = jnp.dot(x1.astype(bf16), w_ff, preferred_element_type=f32)
        fproj = fproj + bblk_ref[blk, BL['b_ff']:BL['b_ff'] + 1, :]
        ff = fproj[:, 0:FF] * jax.nn.sigmoid(fproj[:, FF:2 * FF])
        w_f2 = wblk_ref[blk, WL['f2']:WL['f2'] + FF, 0:E]
        b_f2 = bblk_ref[blk, BL['b_f2']:BL['b_f2'] + 1, 0:E]
        ff = jnp.dot(ff.astype(bf16), w_f2, preferred_element_type=f32) + b_f2

        x = _layernorm(x1 + ff,
                       bblk_ref[blk, BL['g2']:BL['g2'] + 1, 0:E],
                       bblk_ref[blk, BL['bt2']:BL['bt2'] + 1, 0:E])

    # ---- sequence mean-pool (MXU) + other-feature projection + dense head ----
    pooled = jnp.dot(pool, x, preferred_element_type=f32)                   # (Bb, E)
    oth_w = whead_ref[HL['oth_w']:HL['oth_w'] + Fo, 0:E]
    oth_b = whead_ref[HL['oth_b']:HL['oth_b'] + 1, 0:E]
    xo = jnp.dot(xo_ref[:, 0, :], oth_w, preferred_element_type=f32) + oth_b

    # concat([pooled, xo]) @ W1 == pooled @ W1[:E] + xo @ W1[E:]
    w1a = whead_ref[HL['w1']:HL['w1'] + E, 0:U1]
    w1b = whead_ref[HL['w1'] + E:HL['w1'] + 2 * E, 0:U1]
    h1 = (jnp.dot(pooled, w1a, preferred_element_type=f32)
          + jnp.dot(xo, w1b, preferred_element_type=f32)
          + whead_ref[HL['hb1']:HL['hb1'] + 1, 0:U1])
    h1 = jnp.maximum(_layernorm(h1, whead_ref[HL['hg1']:HL['hg1'] + 1, 0:U1],
                                whead_ref[HL['hbt1']:HL['hbt1'] + 1, 0:U1]), 0.0)
    h2 = (jnp.dot(h1, whead_ref[HL['w2']:HL['w2'] + U1, 0:U2],
                  preferred_element_type=f32)
          + whead_ref[HL['hb2']:HL['hb2'] + 1, 0:U2])
    h2 = jnp.maximum(_layernorm(h2, whead_ref[HL['hg2']:HL['hg2'] + 1, 0:U2],
                                whead_ref[HL['hbt2']:HL['hbt2'] + 1, 0:U2]), 0.0)
    out = (jnp.dot(h2, whead_ref[HL['w3']:HL['w3'] + U2, 0:1],
                   preferred_element_type=f32)
           + whead_ref[HL['hb3']:HL['hb3'] + 1, 0:1])                       # (Bb, 1)

    # lane-dense store: one unmasked (Bb, 128) slab per grid step
    o_ref[0] = jnp.broadcast_to(out, (Bb, o_ref.shape[-1]))


# ----------------------------- packing / wrapper -----------------------------

def _pad_last(x, mult=8):
    pad = (-x.shape[-1]) % mult
    if pad:
        x = jnp.pad(x, [(0, 0)] * (x.ndim - 1) + [(0, pad)])
    return x


def compute_pos_bias(rel_embeddings, seq_len, max_position):
    pos = jnp.arange(seq_len)
    idx = pos[:, None] - pos[None, :] + max_position - 1
    pe = rel_embeddings[idx]            # (S, S, key_dim)
    return jnp.mean(pe, axis=-1)        # (S, S) — matches torch.mean(..., dim=-1)


def pack_params(params, cfg, seq_len, batch_block):
    E, H, KD = cfg['embed_dim'], cfg['num_heads'], cfg['key_dim']
    HS = cfg['head_size'] if cfg['head_size'] is not None else KD
    FF, NB = cfg['ff_dim'], cfg['num_blocks']
    U1, U2 = cfg['dense_units']
    S, Bb = seq_len, batch_block
    Sx, HSx = Bb * S, H * Bb * S

    # ---- hoisted attention constants (masks / pos bias / selectors) ----
    pos = np.asarray(compute_pos_bias(params['rel_embeddings'], S,
                                      cfg['max_relative_position']), np.float32)
    CL = _consts_layout(H, S, Bb, KD, HS)
    consts = np.zeros((CL['rows'], CL['width']), np.float32)
    consts[CL['qsel']:CL['qsel'] + HSx, :Sx] = np.tile(np.eye(Sx, dtype=np.float32), (H, 1))
    row_head = np.repeat(np.arange(H), Sx)[:, None]
    consts[CL['qmask']:CL['qmask'] + HSx, :H * KD] = \
        (row_head == (np.arange(H * KD)[None, :] // KD)).astype(np.float32)
    consts[CL['vmask']:CL['vmask'] + HSx, :H * HS] = \
        (row_head == (np.arange(H * HS)[None, :] // HS)).astype(np.float32)
    same_batch = (np.arange(Sx)[:, None] // S) == (np.arange(Sx)[None, :] // S)
    sb = np.where(same_batch, np.tile(pos, (Bb, Bb)), np.float32(-1e30)).astype(np.float32)
    consts[CL['sbias']:CL['sbias'] + HSx, :Sx] = np.tile(sb, (H, 1))
    consts[CL['pool']:CL['pool'] + Bb, :Sx] = \
        np.kron(np.eye(Bb, dtype=np.float32), np.full((1, S), 1.0 / S, np.float32))

    # ---- per-block weights -> one bf16 slab, biases/LN -> one f32 slab ----
    WL = _wblk_layout(E, H, KD, HS, FF)
    BL = _bblk_layout()
    wblk = np.zeros((NB, WL['rows'], WL['width']), np.float32)
    bblk = np.zeros((NB, BL['rows'], WL['width']), np.float32)
    for bi, p in enumerate(params['blocks']):
        np_ = lambda a: np.asarray(a, np.float32)
        wqkvg = np.concatenate([np_(p['wq']), np_(p['wk']), np_(p['wv']), np_(p['wg'])], 1)
        wff = np.concatenate([np_(p['wf1']), np_(p['wfg'])], 1)
        wblk[bi, WL['qkvg']:WL['qkvg'] + E, :wqkvg.shape[1]] = wqkvg
        wblk[bi, WL['ff']:WL['ff'] + E, :wff.shape[1]] = wff
        wblk[bi, WL['o']:WL['o'] + H * HS, :E] = np_(p['wo'])
        wblk[bi, WL['f2']:WL['f2'] + FF, :E] = np_(p['wf2'])
        bqkvg = np.concatenate([np_(p['bq']), np_(p['bk']), np_(p['bv']), np_(p['bg'])], 1)[0]
        bff = np.concatenate([np_(p['bf1']), np_(p['bfg'])], 1)[0]
        bblk[bi, BL['b_qkvg'], :bqkvg.shape[0]] = bqkvg
        bblk[bi, BL['b_ff'], :bff.shape[0]] = bff
        bblk[bi, BL['b_o'], :E] = np_(p['bo'])[0]
        bblk[bi, BL['b_f2'], :E] = np_(p['bf2'])[0]
        bblk[bi, BL['g1'], :E] = np_(p['g1'])[0]
        bblk[bi, BL['bt1'], :E] = np_(p['bt1'])[0]
        bblk[bi, BL['g2'], :E] = np_(p['g2'])[0]
        bblk[bi, BL['bt2'], :E] = np_(p['bt2'])[0]

    # ---- input projections + dense head: one small f32 slab ----
    Fc = _align(params['cgm_w'].shape[0])
    Fo = _align(params['other_w'].shape[0])
    HL = _whead_layout(E, Fc, Fo, U1, U2)
    whead = np.zeros((HL['rows'], HL['width']), np.float32)
    fp = params['final']
    whead[HL['cgm_w']:HL['cgm_w'] + params['cgm_w'].shape[0], :E] = np.asarray(params['cgm_w'])
    whead[HL['oth_w']:HL['oth_w'] + params['other_w'].shape[0], :E] = np.asarray(params['other_w'])
    whead[HL['w1']:HL['w1'] + 2 * E, :U1] = np.asarray(fp['w1'])
    whead[HL['w2']:HL['w2'] + U1, :U2] = np.asarray(fp['w2'])
    whead[HL['w3']:HL['w3'] + U2, :1] = np.asarray(fp['w3'])
    whead[HL['cgm_b'], :E] = np.asarray(params['cgm_b'])[0]
    whead[HL['oth_b'], :E] = np.asarray(params['other_b'])[0]
    whead[HL['hb1'], :U1] = np.asarray(fp['b1'])[0]
    whead[HL['hg1'], :U1] = np.asarray(fp['g1'])[0]
    whead[HL['hbt1'], :U1] = np.asarray(fp['bt1'])[0]
    whead[HL['hb2'], :U2] = np.asarray(fp['b2'])[0]
    whead[HL['hg2'], :U2] = np.asarray(fp['g2'])[0]
    whead[HL['hbt2'], :U2] = np.asarray(fp['bt2'])[0]
    whead[HL['hb3'], :1] = np.asarray(fp['b3'])[0]

    return dict(
        consts=jnp.asarray(consts),
        wblk=jnp.asarray(wblk, jnp.bfloat16),   # bf16 storage: half DMA, 1-pass MXU
        bblk=jnp.asarray(bblk),
        whead=jnp.asarray(whead),
        batch_block=Bb, seq_len=S)


def attention_model_forward(x_cgm, x_other, fused, cfg):
    B, S, _ = x_cgm.shape
    Bb = fused['batch_block']
    assert B % Bb == 0 and S == fused['seq_len']
    HS = cfg['head_size'] if cfg['head_size'] is not None else cfg['key_dim']

    xc = _pad_last(x_cgm).reshape(B * S, -1)          # batch-major flattened rows
    xo = _pad_last(x_other)[:, None, :]               # (B, 1, Fo)
    Fc, Fo = xc.shape[-1], xo.shape[-1]

    kern = functools.partial(
        fused_forward_kernel,
        num_blocks=cfg['num_blocks'], num_heads=cfg['num_heads'],
        key_dim=cfg['key_dim'], head_size=HS, ff_dim=cfg['ff_dim'],
        embed_dim=cfg['embed_dim'], seq_len=S, batch_block=Bb,
        dense_units=tuple(cfg['dense_units']))

    consts, wblk = fused['consts'], fused['wblk']
    bblk, whead = fused['bblk'], fused['whead']

    out = pl.pallas_call(
        kern,
        out_shape=jax.ShapeDtypeStruct((B // Bb, Bb, _LANES), jnp.float32),
        grid=(B // Bb,),
        in_specs=[
            pl.BlockSpec(consts.shape, lambda b: (0, 0)),        # hoisted constants
            pl.BlockSpec((Bb * S, Fc), lambda b: (b, 0)),        # Bb rows of CGM input
            pl.BlockSpec((Bb, 1, Fo), lambda b: (b, 0, 0)),      # Bb rows of other feats
            pl.BlockSpec(wblk.shape, lambda b: (0, 0, 0)),       # per-block weights (bf16)
            pl.BlockSpec(bblk.shape, lambda b: (0, 0, 0)),       # per-block biases / LN
            pl.BlockSpec(whead.shape, lambda b: (0, 0)),         # input-proj + head
        ],
        out_specs=pl.BlockSpec((1, Bb, _LANES), lambda b: (b, 0, 0)),
        compiler_params=pltpu.CompilerParams(
            dimension_semantics=("parallel",)),    # >=2 grid steps -> both v7x TCs busy
        cost_estimate=pl.CostEstimate(flops=7_500_000, transcendentals=40_000,
                                      bytes_accessed=250_000),
    )(consts, xc, xo, wblk, bblk, whead)
    return out.reshape(B, _LANES)[:, :1]            # (B, 1)


# ----------------------------- parameters -----------------------------

def init_params(key, cfg, cgm_feat, other_feat):
    E, H, KD = cfg['embed_dim'], cfg['num_heads'], cfg['key_dim']
    HS = cfg['head_size'] if cfg['head_size'] is not None else KD
    FF = cfg['ff_dim']
    keys = iter(jax.random.split(key, 256))

    def linear(in_d, out_d):
        k1, k2 = next(keys), next(keys)
        bound = 1.0 / np.sqrt(in_d)
        w = jax.random.uniform(k1, (in_d, out_d), jnp.float32, -bound, bound)
        b = jax.random.uniform(k2, (1, out_d), jnp.float32, -bound, bound)
        return w, b

    params = {}
    params['rel_embeddings'] = 0.02 * jax.random.normal(
        next(keys), (2 * cfg['max_relative_position'] - 1, KD), jnp.float32)
    params['cgm_w'], params['cgm_b'] = linear(cgm_feat, E)
    params['other_w'], params['other_b'] = linear(other_feat, E)

    blocks = []
    for _ in range(cfg['num_blocks']):
        bp = {}
        bp['wq'], bp['bq'] = linear(E, H * KD)
        bp['wk'], bp['bk'] = linear(E, H * KD)
        bp['wv'], bp['bv'] = linear(E, H * HS)
        bp['wo'], bp['bo'] = linear(H * HS, E)
        bp['wg'], bp['bg'] = linear(E, E)
        bp['wf1'], bp['bf1'] = linear(E, FF)
        bp['wfg'], bp['bfg'] = linear(E, FF)
        bp['wf2'], bp['bf2'] = linear(FF, E)
        bp['g1'] = jnp.ones((1, E), jnp.float32)
        bp['bt1'] = jnp.zeros((1, E), jnp.float32)
        bp['g2'] = jnp.ones((1, E), jnp.float32)
        bp['bt2'] = jnp.zeros((1, E), jnp.float32)
        blocks.append(bp)
    params['blocks'] = blocks

    d_in = 2 * E if other_feat > 0 else E
    u1, u2 = cfg['dense_units']
    fp = {}
    fp['w1'], fp['b1'] = linear(d_in, u1)
    fp['g1'] = jnp.ones((1, u1), jnp.float32)
    fp['bt1'] = jnp.zeros((1, u1), jnp.float32)
    fp['w2'], fp['b2'] = linear(u1, u2)
    fp['g2'] = jnp.ones((1, u2), jnp.float32)
    fp['bt2'] = jnp.zeros((1, u2), jnp.float32)
    fp['w3'], fp['b3'] = linear(u2, 1)
    params['final'] = fp
    return params


# ----------------------------- pure JAX reference -----------------------------

def _ref_layernorm(x, gamma, beta, eps=1e-6):
    mu = jnp.mean(x, axis=-1, keepdims=True)
    var = jnp.mean((x - mu) ** 2, axis=-1, keepdims=True)
    return (x - mu) / jnp.sqrt(var + eps) * gamma + beta


def reference_forward(x_cgm, x_other, params, cfg):
    E, H, KD = cfg['embed_dim'], cfg['num_heads'], cfg['key_dim']
    HS = cfg['head_size'] if cfg['head_size'] is not None else KD
    B, S, _ = x_cgm.shape
    x = x_cgm @ params['cgm_w'] + params['cgm_b']
    pos_bias = compute_pos_bias(params['rel_embeddings'], S,
                                cfg['max_relative_position'])
    for p in params['blocks']:
        q = (x @ p['wq'] + p['bq']).reshape(B, S, H, KD).transpose(0, 2, 1, 3)
        k = (x @ p['wk'] + p['bk']).reshape(B, S, H, KD).transpose(0, 2, 1, 3)
        v = (x @ p['wv'] + p['bv']).reshape(B, S, H, HS).transpose(0, 2, 1, 3)
        scores = jnp.einsum('bhqd,bhkd->bhqk', q, k) / jnp.sqrt(jnp.float32(KD))
        scores = scores + pos_bias[None, None]
        probs = jax.nn.softmax(scores, axis=-1)
        ctx = jnp.einsum('bhqk,bhkd->bhqd', probs, v)
        ctx = ctx.transpose(0, 2, 1, 3).reshape(B, S, H * HS)
        attn = ctx @ p['wo'] + p['bo']
        gate = jax.nn.sigmoid(x @ p['wg'] + p['bg'])
        attn = gate * attn
        x1 = _ref_layernorm(x + attn, p['g1'], p['bt1'])
        ff = (x1 @ p['wf1'] + p['bf1']) * jax.nn.sigmoid(x1 @ p['wfg'] + p['bfg'])
        ff = ff @ p['wf2'] + p['bf2']
        x = _ref_layernorm(x1 + ff, p['g2'], p['bt2'])
    x = jnp.mean(x, axis=1)
    xo = x_other @ params['other_w'] + params['other_b']
    z = jnp.concatenate([x, xo], axis=-1)
    fp = params['final']
    h = z @ fp['w1'] + fp['b1']
    h = jnp.maximum(_ref_layernorm(h, fp['g1'], fp['bt1']), 0.0)
    h = h @ fp['w2'] + fp['b2']
    h = jnp.maximum(_ref_layernorm(h, fp['g2'], fp['bt2']), 0.0)
    return h @ fp['w3'] + fp['b3']


# ----------------------------- main -----------------------------

if __name__ == "__main__":
    key = jax.random.PRNGKey(0)
    kp, kc, ko = jax.random.split(key, 3)

    B, S, F_CGM, F_OTHER = 4, 16, 4, 6
    BATCH_BLOCK = 2   # 2 rows/step -> score matmul M = Bb*H*S = 128; grid = 2 steps

    params = init_params(kp, CONFIG, F_CGM, F_OTHER)
    fused = pack_params(params, CONFIG, S, BATCH_BLOCK)
    x_cgm = jax.random.normal(kc, (B, S, F_CGM), jnp.float32)
    x_other = jax.random.normal(ko, (B, F_OTHER), jnp.float32)

    fwd = jax.jit(lambda xc, xo: attention_model_forward(xc, xo, fused, CONFIG))
    out = jax.block_until_ready(fwd(x_cgm, x_other))
    assert out.shape == (B, 1)

    # Reference at full f32 matmul precision; the kernel stores the per-block
    # weights in bf16 and runs bf16-input MXU passes, so allow bf16-level
    # rounding differences.
    with jax.default_matmul_precision("highest"):
        ref = jax.block_until_ready(reference_forward(x_cgm, x_other, params, CONFIG))

    np.testing.assert_allclose(np.asarray(out), np.asarray(ref),
                               rtol=2e-2, atol=2e-2)
    print("KERNEL_OK")
</pallas_src>

<mosaic_0001>
module attributes {stable_mosaic.version = 11 : i64} {
  func.func @fused_forward_kernel(%arg0: i32, %arg1: memref<520x32xf32, #tpu.memory_space<vmem>>, %arg2: memref<32x8xf32, #tpu.memory_space<vmem>>, %arg3: memref<2x1x8xf32, #tpu.memory_space<vmem>>, %arg4: memref<2x160x128xbf16, #tpu.memory_space<vmem>>, %arg5: memref<2x64x128xf32, #tpu.memory_space<vmem>>, %arg6: memref<200x32xf32, #tpu.memory_space<vmem>>, %arg7: memref<1x2x128xf32, #tpu.memory_space<vmem>>) attributes {dimension_semantics = [#tpu.dimension_semantics<parallel>], iteration_bounds = array<i64: 2>, scalar_prefetch = 0 : i64, scratch_operands = 0 : i64, tpu.core_type = #tpu.core_type<tc>, window_params = [{pipeline_mode = #tpu.pipeline_mode<synchronous>, transform_indices = @transform_0, window_bounds = array<i64: 520, 32>}, {transform_indices = @transform_1, window_bounds = array<i64: 32, 8>}, {transform_indices = @transform_2, window_bounds = array<i64: 2, 1, 8>}, {pipeline_mode = #tpu.pipeline_mode<synchronous>, transform_indices = @transform_3, window_bounds = array<i64: 2, 160, 128>}, {pipeline_mode = #tpu.pipeline_mode<synchronous>, transform_indices = @transform_4, window_bounds = array<i64: 2, 64, 128>}, {pipeline_mode = #tpu.pipeline_mode<synchronous>, transform_indices = @transform_5, window_bounds = array<i64: 200, 32>}, {transform_indices = @transform_6, window_bounds = array<i64: 1, 2, 128>}]} {
    %c0 = arith.constant 0 : index
    %c0_0 = arith.constant 0 : index
    %0 = vector.load %arg1[%c0, %c0_0] : memref<520x32xf32, #tpu.memory_space<vmem>>, vector<128x32xf32>
    %c128 = arith.constant 128 : index
    %c0_1 = arith.constant 0 : index
    %1 = vector.load %arg1[%c128, %c0_1] : memref<520x32xf32, #tpu.memory_space<vmem>>, vector<128x32xf32>
    %c256 = arith.constant 256 : index
    %c0_2 = arith.constant 0 : index
    %2 = vector.load %arg1[%c256, %c0_2] : memref<520x32xf32, #tpu.memory_space<vmem>>, vector<128x32xf32>
    %c384 = arith.constant 384 : index
    %c0_3 = arith.constant 0 : index
    %3 = vector.load %arg1[%c384, %c0_3] : memref<520x32xf32, #tpu.memory_space<vmem>>, vector<128x32xf32>
    %c512 = arith.constant 512 : index
    %c0_4 = arith.constant 0 : index
    %4 = vector.load %arg1[%c512, %c0_4] : memref<520x32xf32, #tpu.memory_space<vmem>>, vector<2x32xf32>
    %c0_5 = arith.constant 0 : index
    %c0_6 = arith.constant 0 : index
    %5 = vector.load %arg6[%c0_5, %c0_6] : memref<200x32xf32, #tpu.memory_space<vmem>>, vector<8x32xf32>
    %c128_7 = arith.constant 128 : index
    %c0_8 = arith.constant 0 : index
    %6 = vector.load %arg6[%c128_7, %c0_8] : memref<200x32xf32, #tpu.memory_space<vmem>>, vector<1x32xf32>
    %c0_9 = arith.constant 0 : index
    %c0_10 = arith.constant 0 : index
    %7 = vector.load %arg2[%c0_9, %c0_10] : memref<32x8xf32, #tpu.memory_space<vmem>>, vector<32x8xf32>
    %cst = arith.constant dense<0.000000e+00> : vector<32x32xf32>
    %8 = tpu.matmul %7, %5, %cst {dimension_numbers = #tpu.dot_dimension_numbers<[1], [0], [0], [1], [0, 0, 1, 1], [], []>} : vector<32x8xf32>, vector<8x32xf32>, vector<32x32xf32> -> vector<32x32xf32>
    %9 = vector.broadcast %6 : vector<1x32xf32> to vector<32x32xf32>
    %10 = arith.addf %8, %9 : vector<32x32xf32>
    %c0_11 = arith.constant 0 : index
    %c0_12 = arith.constant 0 : index
    %c0_13 = arith.constant 0 : index
    %11 = vector.load %arg4[%c0_11, %c0_12, %c0_13] : memref<2x160x128xbf16, #tpu.memory_space<vmem>>, vector<1x32x128xbf16>
    %12 = vector.shape_cast %11 : vector<1x32x128xbf16> to vector<32x128xbf16>
    %13 = arith.truncf %10 : vector<32x32xf32> to vector<32x32xbf16>
    %cst_14 = arith.constant dense<0.000000e+00> : vector<32x128xf32>
    %14 = tpu.matmul %13, %12, %cst_14 {dimension_numbers = #tpu.dot_dimension_numbers<[1], [0], [0], [1], [0, 0, 1, 1], [], []>} : vector<32x32xbf16>, vector<32x128xbf16>, vector<32x128xf32> -> vector<32x128xf32>
    %c0_15 = arith.constant 0 : index
    %c0_16 = arith.constant 0 : index
    %c0_17 = arith.constant 0 : index
    %15 = vector.load %arg5[%c0_15, %c0_16, %c0_17] : memref<2x64x128xf32, #tpu.memory_space<vmem>>, vector<1x1x128xf32>
    %16 = vector.shape_cast %15 : vector<1x1x128xf32> to vector<1x128xf32>
    %17 = vector.broadcast %16 : vector<1x128xf32> to vector<32x128xf32>
    %18 = arith.addf %14, %17 : vector<32x128xf32>
    %19 = vector.extract_strided_slice %18 {offsets = [0, 0], sizes = [32, 32], strides = [1, 1]} : vector<32x128xf32> to vector<32x32xf32>
    %20 = vector.extract_strided_slice %18 {offsets = [0, 32], sizes = [32, 32], strides = [1, 1]} : vector<32x128xf32> to vector<32x32xf32>
    %21 = vector.extract_strided_slice %18 {offsets = [0, 64], sizes = [32, 32], strides = [1, 1]} : vector<32x128xf32> to vector<32x32xf32>
    %22 = vector.extract_strided_slice %18 {offsets = [0, 96], sizes = [32, 32], strides = [1, 1]} : vector<32x128xf32> to vector<32x32xf32>
    %cst_18 = arith.constant dense<0.000000e+00> : vector<128x32xf32>
    %23 = tpu.matmul %0, %19, %cst_18 {dimension_numbers = #tpu.dot_dimension_numbers<[1], [0], [0], [1], [0, 0, 1, 1], [], []>} : vector<128x32xf32>, vector<32x32xf32>, vector<128x32xf32> -> vector<128x32xf32>
    %24 = arith.mulf %23, %1 : vector<128x32xf32>
    %cst_19 = arith.constant dense<0.000000e+00> : vector<128x32xf32>
    %25 = tpu.matmul %24, %20, %cst_19 {dimension_numbers = #tpu.dot_dimension_numbers<[1], [1], [0], [0], [0, 0, 1, 0], [], []>} : vector<128x32xf32>, vector<32x32xf32>, vector<128x32xf32> -> vector<128x32xf32>
    %cst_20 = arith.constant 0.353553385 : f32
    %26 = vector.broadcast %cst_20 : f32 to vector<128x32xf32>
    %27 = arith.mulf %25, %26 : vector<128x32xf32>
    %28 = arith.addf %27, %3 : vector<128x32xf32>
    %cst_21 = arith.constant dense<0xFF800000> : vector<128xf32>
    %29 = vector.multi_reduction <maximumf>, %28, %cst_21 [1] : vector<128x32xf32> to vector<128xf32>
    %30 = vector.shape_cast %29 : vector<128xf32> to vector<128x1xf32>
    %31 = vector.broadcast %30 : vector<128x1xf32> to vector<128x32xf32>
    %32 = arith.subf %28, %31 : vector<128x32xf32>
    %33 = math.exp %32 : vector<128x32xf32>
    %cst_22 = arith.constant dense<0.000000e+00> : vector<128xf32>
    %34 = vector.multi_reduction <add>, %33, %cst_22 [1] : vector<128x32xf32> to vector<128xf32>
    %35 = vector.shape_cast %34 : vector<128xf32> to vector<128x1xf32>
    %36 = tpu.reciprocal %35 : vector<128x1xf32> -> vector<128x1xf32>
    %37 = vector.broadcast %36 : vector<128x1xf32> to vector<128x32xf32>
    %38 = arith.mulf %33, %37 : vector<128x32xf32>
    %cst_23 = arith.constant dense<0.000000e+00> : vector<128x32xf32>
    %39 = tpu.matmul %38, %21, %cst_23 {dimension_numbers = #tpu.dot_dimension_numbers<[1], [0], [0], [1], [0, 0, 1, 1], [], []>} : vector<128x32xf32>, vector<32x32xf32>, vector<128x32xf32> -> vector<128x32xf32>
    %40 = arith.mulf %39, %2 : vector<128x32xf32>
    %41 = vector.extract_strided_slice %40 {offsets = [0, 0], sizes = [32, 32], strides = [1, 1]} : vector<128x32xf32> to vector<32x32xf32>
    %42 = vector.extract_strided_slice %40 {offsets = [32, 0], sizes = [32, 32], strides = [1, 1]} : vector<128x32xf32> to vector<32x32xf32>
    %43 = arith.addf %41, %42 : vector<32x32xf32>
    %44 = vector.extract_strided_slice %40 {offsets = [64, 0], sizes = [32, 32], strides = [1, 1]} : vector<128x32xf32> to vector<32x32xf32>
    %45 = arith.addf %43, %44 : vector<32x32xf32>
    %46 = vector.extract_strided_slice %40 {offsets = [96, 0], sizes = [32, 32], strides = [1, 1]} : vector<128x32xf32> to vector<32x32xf32>
    %47 = arith.addf %45, %46 : vector<32x32xf32>
    %c0_24 = arith.constant 0 : index
    %c64 = arith.constant 64 : index
    %c0_25 = arith.constant 0 : index
    %48 = vector.load %arg4[%c0_24, %c64, %c0_25] : memref<2x160x128xbf16, #tpu.memory_space<vmem>>, vector<1x32x32xbf16>
    %49 = vector.shape_cast %48 : vector<1x32x32xbf16> to vector<32x32xbf16>
    %c0_26 = arith.constant 0 : index
    %c16 = arith.constant 16 : index
    %c0_27 = arith.constant 0 : index
    %50 = vector.load %arg5[%c0_26, %c16, %c0_27] : memref<2x64x128xf32, #tpu.memory_space<vmem>>, vector<1x1x32xf32>
    %51 = vector.shape_cast %50 : vector<1x1x32xf32> to vector<1x32xf32>
    %52 = arith.truncf %47 : vector<32x32xf32> to vector<32x32xbf16>
    %cst_28 = arith.constant dense<0.000000e+00> : vector<32x32xf32>
    %53 = tpu.matmul %52, %49, %cst_28 {dimension_numbers = #tpu.dot_dimension_numbers<[1], [0], [0], [1], [0, 0, 1, 1], [], []>} : vector<32x32xbf16>, vector<32x32xbf16>, vector<32x32xf32> -> vector<32x32xf32>
    %54 = vector.broadcast %51 : vector<1x32xf32> to vector<32x32xf32>
    %55 = arith.addf %53, %54 : vector<32x32xf32>
    %56 = arith.negf %22 : vector<32x32xf32>
    %57 = math.exp %56 : vector<32x32xf32>
    %cst_29 = arith.constant 1.000000e+00 : f32
    %58 = vector.broadcast %cst_29 : f32 to vector<32x32xf32>
    %59 = arith.addf %58, %57 : vector<32x32xf32>
    %60 = arith.divf %58, %59 : vector<32x32xf32>
    %61 = arith.mulf %60, %55 : vector<32x32xf32>
    %62 = arith.addf %10, %61 : vector<32x32xf32>
    %c0_30 = arith.constant 0 : index
    %c32 = arith.constant 32 : index
    %c0_31 = arith.constant 0 : index
    %63 = vector.load %arg5[%c0_30, %c32, %c0_31] : memref<2x64x128xf32, #tpu.memory_space<vmem>>, vector<1x1x32xf32>
    %64 = vector.shape_cast %63 : vector<1x1x32xf32> to vector<1x32xf32>
    %c0_32 = arith.constant 0 : index
    %c40 = arith.constant 40 : index
    %c0_33 = arith.constant 0 : index
    %65 = vector.load %arg5[%c0_32, %c40, %c0_33] : memref<2x64x128xf32, #tpu.memory_space<vmem>>, vector<1x1x32xf32>
    %66 = vector.shape_cast %65 : vector<1x1x32xf32> to vector<1x32xf32>
    %cst_34 = arith.constant dense<0.000000e+00> : vector<32xf32>
    %67 = vector.multi_reduction <add>, %62, %cst_34 [1] : vector<32x32xf32> to vector<32xf32>
    %68 = vector.shape_cast %67 : vector<32xf32> to vector<32x1xf32>
    %cst_35 = arith.constant 3.200000e+01 : f32
    %69 = vector.broadcast %cst_35 : f32 to vector<32x1xf32>
    %70 = arith.divf %68, %69 : vector<32x1xf32>
    %71 = vector.broadcast %70 : vector<32x1xf32> to vector<32x32xf32>
    %72 = arith.subf %62, %71 : vector<32x32xf32>
    %73 = arith.mulf %72, %72 : vector<32x32xf32>
    %cst_36 = arith.constant dense<0.000000e+00> : vector<32xf32>
    %74 = vector.multi_reduction <add>, %73, %cst_36 [1] : vector<32x32xf32> to vector<32xf32>
    %75 = vector.shape_cast %74 : vector<32xf32> to vector<32x1xf32>
    %cst_37 = arith.constant 3.200000e+01 : f32
    %76 = vector.broadcast %cst_37 : f32 to vector<32x1xf32>
    %77 = arith.divf %75, %76 : vector<32x1xf32>
    %78 = vector.broadcast %70 : vector<32x1xf32> to vector<32x32xf32>
    %79 = arith.subf %62, %78 : vector<32x32xf32>
    %cst_38 = arith.constant 9.99999997E-7 : f32
    %80 = vector.broadcast %cst_38 : f32 to vector<32x1xf32>
    %81 = arith.addf %77, %80 : vector<32x1xf32>
    %82 = math.rsqrt %81 : vector<32x1xf32>
    %83 = vector.broadcast %82 : vector<32x1xf32> to vector<32x32xf32>
    %84 = arith.mulf %79, %83 : vector<32x32xf32>
    %85 = vector.broadcast %64 : vector<1x32xf32> to vector<32x32xf32>
    %86 = arith.mulf %84, %85 : vector<32x32xf32>
    %87 = vector.broadcast %66 : vector<1x32xf32> to vector<32x32xf32>
    %88 = arith.addf %86, %87 : vector<32x32xf32>
    %c0_39 = arith.constant 0 : index
    %c32_40 = arith.constant 32 : index
    %c0_41 = arith.constant 0 : index
    %89 = vector.load %arg4[%c0_39, %c32_40, %c0_41] : memref<2x160x128xbf16, #tpu.memory_space<vmem>>, vector<1x32x128xbf16>
    %90 = vector.shape_cast %89 : vector<1x32x128xbf16> to vector<32x128xbf16>
    %91 = arith.truncf %88 : vector<32x32xf32> to vector<32x32xbf16>
    %cst_42 = arith.constant dense<0.000000e+00> : vector<32x128xf32>
    %92 = tpu.matmul %91, %90, %cst_42 {dimension_numbers = #tpu.dot_dimension_numbers<[1], [0], [0], [1], [0, 0, 1, 1], [], []>} : vector<32x32xbf16>, vector<32x128xbf16>, vector<32x128xf32> -> vector<32x128xf32>
    %c0_43 = arith.constant 0 : index
    %c8 = arith.constant 8 : index
    %c0_44 = arith.constant 0 : index
    %93 = vector.load %arg5[%c0_43, %c8, %c0_44] : memref<2x64x128xf32, #tpu.memory_space<vmem>>, vector<1x1x128xf32>
    %94 = vector.shape_cast %93 : vector<1x1x128xf32> to vector<1x128xf32>
    %95 = vector.broadcast %94 : vector<1x128xf32> to vector<32x128xf32>
    %96 = arith.addf %92, %95 : vector<32x128xf32>
    %97 = vector.extract_strided_slice %96 {offsets = [0, 0], sizes = [32, 64], strides = [1, 1]} : vector<32x128xf32> to vector<32x64xf32>
    %98 = vector.extract_strided_slice %96 {offsets = [0, 64], sizes = [32, 64], strides = [1, 1]} : vector<32x128xf32> to vector<32x64xf32>
    %99 = arith.negf %98 : vector<32x64xf32>
    %100 = math.exp %99 : vector<32x64xf32>
    %cst_45 = arith.constant 1.000000e+00 : f32
    %101 = vector.broadcast %cst_45 : f32 to vector<32x64xf32>
    %102 = arith.addf %101, %100 : vector<32x64xf32>
    %103 = arith.divf %101, %102 : vector<32x64xf32>
    %104 = arith.mulf %97, %103 : vector<32x64xf32>
    %c0_46 = arith.constant 0 : index
    %c96 = arith.constant 96 : index
    %c0_47 = arith.constant 0 : index
    %105 = vector.load %arg4[%c0_46, %c96, %c0_47] : memref<2x160x128xbf16, #tpu.memory_space<vmem>>, vector<1x64x32xbf16>
    %106 = vector.shape_cast %105 : vector<1x64x32xbf16> to vector<64x32xbf16>
    %c0_48 = arith.constant 0 : index
    %c24 = arith.constant 24 : index
    %c0_49 = arith.constant 0 : index
    %107 = vector.load %arg5[%c0_48, %c24, %c0_49] : memref<2x64x128xf32, #tpu.memory_space<vmem>>, vector<1x1x32xf32>
    %108 = vector.shape_cast %107 : vector<1x1x32xf32> to vector<1x32xf32>
    %109 = arith.truncf %104 : vector<32x64xf32> to vector<32x64xbf16>
    %cst_50 = arith.constant dense<0.000000e+00> : vector<32x32xf32>
    %110 = tpu.matmul %109, %106, %cst_50 {dimension_numbers = #tpu.dot_dimension_numbers<[1], [0], [0], [1], [0, 0, 1, 1], [], []>} : vector<32x64xbf16>, vector<64x32xbf16>, vector<32x32xf32> -> vector<32x32xf32>
    %111 = vector.broadcast %108 : vector<1x32xf32> to vector<32x32xf32>
    %112 = arith.addf %110, %111 : vector<32x32xf32>
    %113 = arith.addf %88, %112 : vector<32x32xf32>
    %c0_51 = arith.constant 0 : index
    %c48 = arith.constant 48 : index
    %c0_52 = arith.constant 0 : index
    %114 = vector.load %arg5[%c0_51, %c48, %c0_52] : memref<2x64x128xf32, #tpu.memory_space<vmem>>, vector<1x1x32xf32>
    %115 = vector.shape_cast %114 : vector<1x1x32xf32> to vector<1x32xf32>
    %c0_53 = arith.constant 0 : index
    %c56 = arith.constant 56 : index
    %c0_54 = arith.constant 0 : index
    %116 = vector.load %arg5[%c0_53, %c56, %c0_54] : memref<2x64x128xf32, #tpu.memory_space<vmem>>, vector<1x1x32xf32>
    %117 = vector.shape_cast %116 : vector<1x1x32xf32> to vector<1x32xf32>
    %cst_55 = arith.constant dense<0.000000e+00> : vector<32xf32>
    %118 = vector.multi_reduction <add>, %113, %cst_55 [1] : vector<32x32xf32> to vector<32xf32>
    %119 = vector.shape_cast %118 : vector<32xf32> to vector<32x1xf32>
    %cst_56 = arith.constant 3.200000e+01 : f32
    %120 = vector.broadcast %cst_56 : f32 to vector<32x1xf32>
    %121 = arith.divf %119, %120 : vector<32x1xf32>
    %122 = vector.broadcast %121 : vector<32x1xf32> to vector<32x32xf32>
    %123 = arith.subf %113, %122 : vector<32x32xf32>
    %124 = arith.mulf %123, %123 : vector<32x32xf32>
    %cst_57 = arith.constant dense<0.000000e+00> : vector<32xf32>
    %125 = vector.multi_reduction <add>, %124, %cst_57 [1] : vector<32x32xf32> to vector<32xf32>
    %126 = vector.shape_cast %125 : vector<32xf32> to vector<32x1xf32>
    %cst_58 = arith.constant 3.200000e+01 : f32
    %127 = vector.broadcast %cst_58 : f32 to vector<32x1xf32>
    %128 = arith.divf %126, %127 : vector<32x1xf32>
    %129 = vector.broadcast %121 : vector<32x1xf32> to vector<32x32xf32>
    %130 = arith.subf %113, %129 : vector<32x32xf32>
    %cst_59 = arith.constant 9.99999997E-7 : f32
    %131 = vector.broadcast %cst_59 : f32 to vector<32x1xf32>
    %132 = arith.addf %128, %131 : vector<32x1xf32>
    %133 = math.rsqrt %132 : vector<32x1xf32>
    %134 = vector.broadcast %133 : vector<32x1xf32> to vector<32x32xf32>
    %135 = arith.mulf %130, %134 : vector<32x32xf32>
    %136 = vector.broadcast %115 : vector<1x32xf32> to vector<32x32xf32>
    %137 = arith.mulf %135, %136 : vector<32x32xf32>
    %138 = vector.broadcast %117 : vector<1x32xf32> to vector<32x32xf32>
    %139 = arith.addf %137, %138 : vector<32x32xf32>
    %c1 = arith.constant 1 : index
    %c0_60 = arith.constant 0 : index
    %c0_61 = arith.constant 0 : index
    %140 = vector.load %arg4[%c1, %c0_60, %c0_61] : memref<2x160x128xbf16, #tpu.memory_space<vmem>>, vector<1x32x128xbf16>
    %141 = vector.shape_cast %140 : vector<1x32x128xbf16> to vector<32x128xbf16>
    %142 = arith.truncf %139 : vector<32x32xf32> to vector<32x32xbf16>
    %cst_62 = arith.constant dense<0.000000e+00> : vector<32x128xf32>
    %143 = tpu.matmul %142, %141, %cst_62 {dimension_numbers = #tpu.dot_dimension_numbers<[1], [0], [0], [1], [0, 0, 1, 1], [], []>} : vector<32x32xbf16>, vector<32x128xbf16>, vector<32x128xf32> -> vector<32x128xf32>
    %c1_63 = arith.constant 1 : index
    %c0_64 = arith.constant 0 : index
    %c0_65 = arith.constant 0 : index
    %144 = vector.load %arg5[%c1_63, %c0_64, %c0_65] : memref<2x64x128xf32, #tpu.memory_space<vmem>>, vector<1x1x128xf32>
    %145 = vector.shape_cast %144 : vector<1x1x128xf32> to vector<1x128xf32>
    %146 = vector.broadcast %145 : vector<1x128xf32> to vector<32x128xf32>
    %147 = arith.addf %143, %146 : vector<32x128xf32>
    %148 = vector.extract_strided_slice %147 {offsets = [0, 0], sizes = [32, 32], strides = [1, 1]} : vector<32x128xf32> to vector<32x32xf32>
    %149 = vector.extract_strided_slice %147 {offsets = [0, 32], sizes = [32, 32], strides = [1, 1]} : vector<32x128xf32> to vector<32x32xf32>
    %150 = vector.extract_strided_slice %147 {offsets = [0, 64], sizes = [32, 32], strides = [1, 1]} : vector<32x128xf32> to vector<32x32xf32>
    %151 = vector.extract_strided_slice %147 {offsets = [0, 96], sizes = [32, 32], strides = [1, 1]} : vector<32x128xf32> to vector<32x32xf32>
    %cst_66 = arith.constant dense<0.000000e+00> : vector<128x32xf32>
    %152 = tpu.matmul %0, %148, %cst_66 {dimension_numbers = #tpu.dot_dimension_numbers<[1], [0], [0], [1], [0, 0, 1, 1], [], []>} : vector<128x32xf32>, vector<32x32xf32>, vector<128x32xf32> -> vector<128x32xf32>
    %153 = arith.mulf %152, %1 : vector<128x32xf32>
    %cst_67 = arith.constant dense<0.000000e+00> : vector<128x32xf32>
    %154 = tpu.matmul %153, %149, %cst_67 {dimension_numbers = #tpu.dot_dimension_numbers<[1], [1], [0], [0], [0, 0, 1, 0], [], []>} : vector<128x32xf32>, vector<32x32xf32>, vector<128x32xf32> -> vector<128x32xf32>
    %cst_68 = arith.constant 0.353553385 : f32
    %155 = vector.broadcast %cst_68 : f32 to vector<128x32xf32>
    %156 = arith.mulf %154, %155 : vector<128x32xf32>
    %157 = arith.addf %156, %3 : vector<128x32xf32>
    %cst_69 = arith.constant dense<0xFF800000> : vector<128xf32>
    %158 = vector.multi_reduction <maximumf>, %157, %cst_69 [1] : vector<128x32xf32> to vector<128xf32>
    %159 = vector.shape_cast %158 : vector<128xf32> to vector<128x1xf32>
    %160 = vector.broadcast %159 : vector<128x1xf32> to vector<128x32xf32>
    %161 = arith.subf %157, %160 : vector<128x32xf32>
    %162 = math.exp %161 : vector<128x32xf32>
    %cst_70 = arith.constant dense<0.000000e+00> : vector<128xf32>
    %163 = vector.multi_reduction <add>, %162, %cst_70 [1] : vector<128x32xf32> to vector<128xf32>
    %164 = vector.shape_cast %163 : vector<128xf32> to vector<128x1xf32>
    %165 = tpu.reciprocal %164 : vector<128x1xf32> -> vector<128x1xf32>
    %166 = vector.broadcast %165 : vector<128x1xf32> to vector<128x32xf32>
    %167 = arith.mulf %162, %166 : vector<128x32xf32>
    %cst_71 = arith.constant dense<0.000000e+00> : vector<128x32xf32>
    %168 = tpu.matmul %167, %150, %cst_71 {dimension_numbers = #tpu.dot_dimension_numbers<[1], [0], [0], [1], [0, 0, 1, 1], [], []>} : vector<128x32xf32>, vector<32x32xf32>, vector<128x32xf32> -> vector<128x32xf32>
    %169 = arith.mulf %168, %2 : vector<128x32xf32>
    %170 = vector.extract_strided_slice %169 {offsets = [0, 0], sizes = [32, 32], strides = [1, 1]} : vector<128x32xf32> to vector<32x32xf32>
    %171 = vector.extract_strided_slice %169 {offsets = [32, 0], sizes = [32, 32], strides = [1, 1]} : vector<128x32xf32> to vector<32x32xf32>
    %172 = arith.addf %170, %171 : vector<32x32xf32>
    %173 = vector.extract_strided_slice %169 {offsets = [64, 0], sizes = [32, 32], strides = [1, 1]} : vector<128x32xf32> to vector<32x32xf32>
    %174 = arith.addf %172, %173 : vector<32x32xf32>
    %175 = vector.extract_strided_slice %169 {offsets = [96, 0], sizes = [32, 32], strides = [1, 1]} : vector<128x32xf32> to vector<32x32xf32>
    %176 = arith.addf %174, %175 : vector<32x32xf32>
    %c1_72 = arith.constant 1 : index
    %c64_73 = arith.constant 64 : index
    %c0_74 = arith.constant 0 : index
    %177 = vector.load %arg4[%c1_72, %c64_73, %c0_74] : memref<2x160x128xbf16, #tpu.memory_space<vmem>>, vector<1x32x32xbf16>
    %178 = vector.shape_cast %177 : vector<1x32x32xbf16> to vector<32x32xbf16>
    %c1_75 = arith.constant 1 : index
    %c16_76 = arith.constant 16 : index
    %c0_77 = arith.constant 0 : index
    %179 = vector.load %arg5[%c1_75, %c16_76, %c0_77] : memref<2x64x128xf32, #tpu.memory_space<vmem>>, vector<1x1x32xf32>
    %180 = vector.shape_cast %179 : vector<1x1x32xf32> to vector<1x32xf32>
    %181 = arith.truncf %176 : vector<32x32xf32> to vector<32x32xbf16>
    %cst_78 = arith.constant dense<0.000000e+00> : vector<32x32xf32>
    %182 = tpu.matmul %181, %178, %cst_78 {dimension_numbers = #tpu.dot_dimension_numbers<[1], [0], [0], [1], [0, 0, 1, 1], [], []>} : vector<32x32xbf16>, vector<32x32xbf16>, vector<32x32xf32> -> vector<32x32xf32>
    %183 = vector.broadcast %180 : vector<1x32xf32> to vector<32x32xf32>
    %184 = arith.addf %182, %183 : vector<32x32xf32>
    %185 = arith.negf %151 : vector<32x32xf32>
    %186 = math.exp %185 : vector<32x32xf32>
    %cst_79 = arith.constant 1.000000e+00 : f32
    %187 = vector.broadcast %cst_79 : f32 to vector<32x32xf32>
    %188 = arith.addf %187, %186 : vector<32x32xf32>
    %189 = arith.divf %187, %188 : vector<32x32xf32>
    %190 = arith.mulf %189, %184 : vector<32x32xf32>
    %191 = arith.addf %139, %190 : vector<32x32xf32>
    %c1_80 = arith.constant 1 : index
    %c32_81 = arith.constant 32 : index
    %c0_82 = arith.constant 0 : index
    %192 = vector.load %arg5[%c1_80, %c32_81, %c0_82] : memref<2x64x128xf32, #tpu.memory_space<vmem>>, vector<1x1x32xf32>
    %193 = vector.shape_cast %192 : vector<1x1x32xf32> to vector<1x32xf32>
    %c1_83 = arith.constant 1 : index
    %c40_84 = arith.constant 40 : index
    %c0_85 = arith.constant 0 : index
    %194 = vector.load %arg5[%c1_83, %c40_84, %c0_85] : memref<2x64x128xf32, #tpu.memory_space<vmem>>, vector<1x1x32xf32>
    %195 = vector.shape_cast %194 : vector<1x1x32xf32> to vector<1x32xf32>
    %cst_86 = arith.constant dense<0.000000e+00> : vector<32xf32>
    %196 = vector.multi_reduction <add>, %191, %cst_86 [1] : vector<32x32xf32> to vector<32xf32>
    %197 = vector.shape_cast %196 : vector<32xf32> to vector<32x1xf32>
    %cst_87 = arith.constant 3.200000e+01 : f32
    %198 = vector.broadcast %cst_87 : f32 to vector<32x1xf32>
    %199 = arith.divf %197, %198 : vector<32x1xf32>
    %200 = vector.broadcast %199 : vector<32x1xf32> to vector<32x32xf32>
    %201 = arith.subf %191, %200 : vector<32x32xf32>
    %202 = arith.mulf %201, %201 : vector<32x32xf32>
    %cst_88 = arith.constant dense<0.000000e+00> : vector<32xf32>
    %203 = vector.multi_reduction <add>, %202, %cst_88 [1] : vector<32x32xf32> to vector<32xf32>
    %204 = vector.shape_cast %203 : vector<32xf32> to vector<32x1xf32>
    %cst_89 = arith.constant 3.200000e+01 : f32
    %205 = vector.broadcast %cst_89 : f32 to vector<32x1xf32>
    %206 = arith.divf %204, %205 : vector<32x1xf32>
    %207 = vector.broadcast %199 : vector<32x1xf32> to vector<32x32xf32>
    %208 = arith.subf %191, %207 : vector<32x32xf32>
    %cst_90 = arith.constant 9.99999997E-7 : f32
    %209 = vector.broadcast %cst_90 : f32 to vector<32x1xf32>
    %210 = arith.addf %206, %209 : vector<32x1xf32>
    %211 = math.rsqrt %210 : vector<32x1xf32>
    %212 = vector.broadcast %211 : vector<32x1xf32> to vector<32x32xf32>
    %213 = arith.mulf %208, %212 : vector<32x32xf32>
    %214 = vector.broadcast %193 : vector<1x32xf32> to vector<32x32xf32>
    %215 = arith.mulf %213, %214 : vector<32x32xf32>
    %216 = vector.broadcast %195 : vector<1x32xf32> to vector<32x32xf32>
    %217 = arith.addf %215, %216 : vector<32x32xf32>
    %c1_91 = arith.constant 1 : index
    %c32_92 = arith.constant 32 : index
    %c0_93 = arith.constant 0 : index
    %218 = vector.load %arg4[%c1_91, %c32_92, %c0_93] : memref<2x160x128xbf16, #tpu.memory_space<vmem>>, vector<1x32x128xbf16>
    %219 = vector.shape_cast %218 : vector<1x32x128xbf16> to vector<32x128xbf16>
    %220 = arith.truncf %217 : vector<32x32xf32> to vector<32x32xbf16>
    %cst_94 = arith.constant dense<0.000000e+00> : vector<32x128xf32>
    %221 = tpu.matmul %220, %219, %cst_94 {dimension_numbers = #tpu.dot_dimension_numbers<[1], [0], [0], [1], [0, 0, 1, 1], [], []>} : vector<32x32xbf16>, vector<32x128xbf16>, vector<32x128xf32> -> vector<32x128xf32>
    %c1_95 = arith.constant 1 : index
    %c8_96 = arith.constant 8 : index
    %c0_97 = arith.constant 0 : index
    %222 = vector.load %arg5[%c1_95, %c8_96, %c0_97] : memref<2x64x128xf32, #tpu.memory_space<vmem>>, vector<1x1x128xf32>
    %223 = vector.shape_cast %222 : vector<1x1x128xf32> to vector<1x128xf32>
    %224 = vector.broadcast %223 : vector<1x128xf32> to vector<32x128xf32>
    %225 = arith.addf %221, %224 : vector<32x128xf32>
    %226 = vector.extract_strided_slice %225 {offsets = [0, 0], sizes = [32, 64], strides = [1, 1]} : vector<32x128xf32> to vector<32x64xf32>
    %227 = vector.extract_strided_slice %225 {offsets = [0, 64], sizes = [32, 64], strides = [1, 1]} : vector<32x128xf32> to vector<32x64xf32>
    %228 = arith.negf %227 : vector<32x64xf32>
    %229 = math.exp %228 : vector<32x64xf32>
    %cst_98 = arith.constant 1.000000e+00 : f32
    %230 = vector.broadcast %cst_98 : f32 to vector<32x64xf32>
    %231 = arith.addf %230, %229 : vector<32x64xf32>
    %232 = arith.divf %230, %231 : vector<32x64xf32>
    %233 = arith.mulf %226, %232 : vector<32x64xf32>
    %c1_99 = arith.constant 1 : index
    %c96_100 = arith.constant 96 : index
    %c0_101 = arith.constant 0 : index
    %234 = vector.load %arg4[%c1_99, %c96_100, %c0_101] : memref<2x160x128xbf16, #tpu.memory_space<vmem>>, vector<1x64x32xbf16>
    %235 = vector.shape_cast %234 : vector<1x64x32xbf16> to vector<64x32xbf16>
    %c1_102 = arith.constant 1 : index
    %c24_103 = arith.constant 24 : index
    %c0_104 = arith.constant 0 : index
    %236 = vector.load %arg5[%c1_102, %c24_103, %c0_104] : memref<2x64x128xf32, #tpu.memory_space<vmem>>, vector<1x1x32xf32>
    %237 = vector.shape_cast %236 : vector<1x1x32xf32> to vector<1x32xf32>
    %238 = arith.truncf %233 : vector<32x64xf32> to vector<32x64xbf16>
    %cst_105 = arith.constant dense<0.000000e+00> : vector<32x32xf32>
    %239 = tpu.matmul %238, %235, %cst_105 {dimension_numbers = #tpu.dot_dimension_numbers<[1], [0], [0], [1], [0, 0, 1, 1], [], []>} : vector<32x64xbf16>, vector<64x32xbf16>, vector<32x32xf32> -> vector<32x32xf32>
    %240 = vector.broadcast %237 : vector<1x32xf32> to vector<32x32xf32>
    %241 = arith.addf %239, %240 : vector<32x32xf32>
    %242 = arith.addf %217, %241 : vector<32x32xf32>
    %c1_106 = arith.constant 1 : index
    %c48_107 = arith.constant 48 : index
    %c0_108 = arith.constant 0 : index
    %243 = vector.load %arg5[%c1_106, %c48_107, %c0_108] : memref<2x64x128xf32, #tpu.memory_space<vmem>>, vector<1x1x32xf32>
    %244 = vector.shape_cast %243 : vector<1x1x32xf32> to vector<1x32xf32>
    %c1_109 = arith.constant 1 : index
    %c56_110 = arith.constant 56 : index
    %c0_111 = arith.constant 0 : index
    %245 = vector.load %arg5[%c1_109, %c56_110, %c0_111] : memref<2x64x128xf32, #tpu.memory_space<vmem>>, vector<1x1x32xf32>
    %246 = vector.shape_cast %245 : vector<1x1x32xf32> to vector<1x32xf32>
    %cst_112 = arith.constant dense<0.000000e+00> : vector<32xf32>
    %247 = vector.multi_reduction <add>, %242, %cst_112 [1] : vector<32x32xf32> to vector<32xf32>
    %248 = vector.shape_cast %247 : vector<32xf32> to vector<32x1xf32>
    %cst_113 = arith.constant 3.200000e+01 : f32
    %249 = vector.broadcast %cst_113 : f32 to vector<32x1xf32>
    %250 = arith.divf %248, %249 : vector<32x1xf32>
    %251 = vector.broadcast %250 : vector<32x1xf32> to vector<32x32xf32>
    %252 = arith.subf %242, %251 : vector<32x32xf32>
    %253 = arith.mulf %252, %252 : vector<32x32xf32>
    %cst_114 = arith.constant dense<0.000000e+00> : vector<32xf32>
    %254 = vector.multi_reduction <add>, %253, %cst_114 [1] : vector<32x32xf32> to vector<32xf32>
    %255 = vector.shape_cast %254 : vector<32xf32> to vector<32x1xf32>
    %cst_115 = arith.constant 3.200000e+01 : f32
    %256 = vector.broadcast %cst_115 : f32 to vector<32x1xf32>
    %257 = arith.divf %255, %256 : vector<32x1xf32>
    %258 = vector.broadcast %250 : vector<32x1xf32> to vector<32x32xf32>
    %259 = arith.subf %242, %258 : vector<32x32xf32>
    %cst_116 = arith.constant 9.99999997E-7 : f32
    %260 = vector.broadcast %cst_116 : f32 to vector<32x1xf32>
    %261 = arith.addf %257, %260 : vector<32x1xf32>
    %262 = math.rsqrt %261 : vector<32x1xf32>
    %263 = vector.broadcast %262 : vector<32x1xf32> to vector<32x32xf32>
    %264 = arith.mulf %259, %263 : vector<32x32xf32>
    %265 = vector.broadcast %244 : vector<1x32xf32> to vector<32x32xf32>
    %266 = arith.mulf %264, %265 : vector<32x32xf32>
    %267 = vector.broadcast %246 : vector<1x32xf32> to vector<32x32xf32>
    %268 = arith.addf %266, %267 : vector<32x32xf32>
    %cst_117 = arith.constant dense<0.000000e+00> : vector<2x32xf32>
    %269 = tpu.matmul %4, %268, %cst_117 {dimension_numbers = #tpu.dot_dimension_numbers<[1], [0], [0], [1], [0, 0, 1, 1], [], []>} : vector<2x32xf32>, vector<32x32xf32>, vector<2x32xf32> -> vector<2x32xf32>
    %c8_118 = arith.constant 8 : index
    %c0_119 = arith.constant 0 : index
    %270 = vector.load %arg6[%c8_118, %c0_119] : memref<200x32xf32, #tpu.memory_space<vmem>>, vector<8x32xf32>
    %c136 = arith.constant 136 : index
    %c0_120 = arith.constant 0 : index
    %271 = vector.load %arg6[%c136, %c0_120] : memref<200x32xf32, #tpu.memory_space<vmem>>, vector<1x32xf32>
    %c0_121 = arith.constant 0 : index
    %c0_122 = arith.constant 0 : index
    %c0_123 = arith.constant 0 : index
    %272 = vector.load %arg3[%c0_121, %c0_122, %c0_123] : memref<2x1x8xf32, #tpu.memory_space<vmem>>, vector<2x1x8xf32>
    %273 = vector.shape_cast %272 : vector<2x1x8xf32> to vector<2x8xf32>
    %cst_124 = arith.constant dense<0.000000e+00> : vector<2x32xf32>
    %274 = tpu.matmul %273, %270, %cst_124 {dimension_numbers = #tpu.dot_dimension_numbers<[1], [0], [0], [1], [0, 0, 1, 1], [], []>} : vector<2x8xf32>, vector<8x32xf32>, vector<2x32xf32> -> vector<2x32xf32>
    %275 = vector.broadcast %271 : vector<1x32xf32> to vector<2x32xf32>
    %276 = arith.addf %274, %275 : vector<2x32xf32>
    %c16_125 = arith.constant 16 : index
    %c0_126 = arith.constant 0 : index
    %277 = vector.load %arg6[%c16_125, %c0_126] : memref<200x32xf32, #tpu.memory_space<vmem>>, vector<32x32xf32>
    %c48_127 = arith.constant 48 : index
    %c0_128 = arith.constant 0 : index
    %278 = vector.load %arg6[%c48_127, %c0_128] : memref<200x32xf32, #tpu.memory_space<vmem>>, vector<32x32xf32>
    %cst_129 = arith.constant dense<0.000000e+00> : vector<2x32xf32>
    %279 = tpu.matmul %269, %277, %cst_129 {dimension_numbers = #tpu.dot_dimension_numbers<[1], [0], [0], [1], [0, 0, 1, 1], [], []>} : vector<2x32xf32>, vector<32x32xf32>, vector<2x32xf32> -> vector<2x32xf32>
    %cst_130 = arith.constant dense<0.000000e+00> : vector<2x32xf32>
    %280 = tpu.matmul %276, %278, %cst_130 {dimension_numbers = #tpu.dot_dimension_numbers<[1], [0], [0], [1], [0, 0, 1, 1], [], []>} : vector<2x32xf32>, vector<32x32xf32>, vector<2x32xf32> -> vector<2x32xf32>
    %281 = arith.addf %279, %280 : vector<2x32xf32>
    %c144 = arith.constant 144 : index
    %c0_131 = arith.constant 0 : index
    %282 = vector.load %arg6[%c144, %c0_131] : memref<200x32xf32, #tpu.memory_space<vmem>>, vector<1x32xf32>
    %283 = vector.broadcast %282 : vector<1x32xf32> to vector<2x32xf32>
    %284 = arith.addf %281, %283 : vector<2x32xf32>
    %c152 = arith.constant 152 : index
    %c0_132 = arith.constant 0 : index
    %285 = vector.load %arg6[%c152, %c0_132] : memref<200x32xf32, #tpu.memory_space<vmem>>, vector<1x32xf32>
    %c160 = arith.constant 160 : index
    %c0_133 = arith.constant 0 : index
    %286 = vector.load %arg6[%c160, %c0_133] : memref<200x32xf32, #tpu.memory_space<vmem>>, vector<1x32xf32>
    %cst_134 = arith.constant dense<0.000000e+00> : vector<2xf32>
    %287 = vector.multi_reduction <add>, %284, %cst_134 [1] : vector<2x32xf32> to vector<2xf32>
    %288 = vector.shape_cast %287 : vector<2xf32> to vector<2x1xf32>
    %cst_135 = arith.constant 3.200000e+01 : f32
    %289 = vector.broadcast %cst_135 : f32 to vector<2x1xf32>
    %290 = arith.divf %288, %289 : vector<2x1xf32>
    %291 = vector.broadcast %290 : vector<2x1xf32> to vector<2x32xf32>
    %292 = arith.subf %284, %291 : vector<2x32xf32>
    %293 = arith.mulf %292, %292 : vector<2x32xf32>
    %cst_136 = arith.constant dense<0.000000e+00> : vector<2xf32>
    %294 = vector.multi_reduction <add>, %293, %cst_136 [1] : vector<2x32xf32> to vector<2xf32>
    %295 = vector.shape_cast %294 : vector<2xf32> to vector<2x1xf32>
    %cst_137 = arith.constant 3.200000e+01 : f32
    %296 = vector.broadcast %cst_137 : f32 to vector<2x1xf32>
    %297 = arith.divf %295, %296 : vector<2x1xf32>
    %298 = vector.broadcast %290 : vector<2x1xf32> to vector<2x32xf32>
    %299 = arith.subf %284, %298 : vector<2x32xf32>
    %cst_138 = arith.constant 9.99999997E-7 : f32
    %300 = vector.broadcast %cst_138 : f32 to vector<2x1xf32>
    %301 = arith.addf %297, %300 : vector<2x1xf32>
    %302 = math.rsqrt %301 : vector<2x1xf32>
    %303 = vector.broadcast %302 : vector<2x1xf32> to vector<2x32xf32>
    %304 = arith.mulf %299, %303 : vector<2x32xf32>
    %305 = vector.broadcast %285 : vector<1x32xf32> to vector<2x32xf32>
    %306 = arith.mulf %304, %305 : vector<2x32xf32>
    %307 = vector.broadcast %286 : vector<1x32xf32> to vector<2x32xf32>
    %308 = arith.addf %306, %307 : vector<2x32xf32>
    %cst_139 = arith.constant 0.000000e+00 : f32
    %309 = vector.broadcast %cst_139 : f32 to vector<2x32xf32>
    %310 = arith.maximumf %308, %309 : vector<2x32xf32>
    %c80 = arith.constant 80 : index
    %c0_140 = arith.constant 0 : index
    %311 = vector.load %arg6[%c80, %c0_140] : memref<200x32xf32, #tpu.memory_space<vmem>>, vector<32x16xf32>
    %cst_141 = arith.constant dense<0.000000e+00> : vector<2x16xf32>
    %312 = tpu.matmul %310, %311, %cst_141 {dimension_numbers = #tpu.dot_dimension_numbers<[1], [0], [0], [1], [0, 0, 1, 1], [], []>} : vector<2x32xf32>, vector<32x16xf32>, vector<2x16xf32> -> vector<2x16xf32>
    %c168 = arith.constant 168 : index
    %c0_142 = arith.constant 0 : index
    %313 = vector.load %arg6[%c168, %c0_142] : memref<200x32xf32, #tpu.memory_space<vmem>>, vector<1x16xf32>
    %314 = vector.broadcast %313 : vector<1x16xf32> to vector<2x16xf32>
    %315 = arith.addf %312, %314 : vector<2x16xf32>
    %c176 = arith.constant 176 : index
    %c0_143 = arith.constant 0 : index
    %316 = vector.load %arg6[%c176, %c0_143] : memref<200x32xf32, #tpu.memory_space<vmem>>, vector<1x16xf32>
    %c184 = arith.constant 184 : index
    %c0_144 = arith.constant 0 : index
    %317 = vector.load %arg6[%c184, %c0_144] : memref<200x32xf32, #tpu.memory_space<vmem>>, vector<1x16xf32>
    %cst_145 = arith.constant dense<0.000000e+00> : vector<2xf32>
    %318 = vector.multi_reduction <add>, %315, %cst_145 [1] : vector<2x16xf32> to vector<2xf32>
    %319 = vector.shape_cast %318 : vector<2xf32> to vector<2x1xf32>
    %cst_146 = arith.constant 1.600000e+01 : f32
    %320 = vector.broadcast %cst_146 : f32 to vector<2x1xf32>
    %321 = arith.divf %319, %320 : vector<2x1xf32>
    %322 = vector.broadcast %321 : vector<2x1xf32> to vector<2x16xf32>
    %323 = arith.subf %315, %322 : vector<2x16xf32>
    %324 = arith.mulf %323, %323 : vector<2x16xf32>
    %cst_147 = arith.constant dense<0.000000e+00> : vector<2xf32>
    %325 = vector.multi_reduction <add>, %324, %cst_147 [1] : vector<2x16xf32> to vector<2xf32>
    %326 = vector.shape_cast %325 : vector<2xf32> to vector<2x1xf32>
    %cst_148 = arith.constant 1.600000e+01 : f32
    %327 = vector.broadcast %cst_148 : f32 to vector<2x1xf32>
    %328 = arith.divf %326, %327 : vector<2x1xf32>
    %329 = vector.broadcast %321 : vector<2x1xf32> to vector<2x16xf32>
    %330 = arith.subf %315, %329 : vector<2x16xf32>
    %cst_149 = arith.constant 9.99999997E-7 : f32
    %331 = vector.broadcast %cst_149 : f32 to vector<2x1xf32>
    %332 = arith.addf %328, %331 : vector<2x1xf32>
    %333 = math.rsqrt %332 : vector<2x1xf32>
    %334 = vector.broadcast %333 : vector<2x1xf32> to vector<2x16xf32>
    %335 = arith.mulf %330, %334 : vector<2x16xf32>
    %336 = vector.broadcast %316 : vector<1x16xf32> to vector<2x16xf32>
    %337 = arith.mulf %335, %336 : vector<2x16xf32>
    %338 = vector.broadcast %317 : vector<1x16xf32> to vector<2x16xf32>
    %339 = arith.addf %337, %338 : vector<2x16xf32>
    %cst_150 = arith.constant 0.000000e+00 : f32
    %340 = vector.broadcast %cst_150 : f32 to vector<2x16xf32>
    %341 = arith.maximumf %339, %340 : vector<2x16xf32>
    %c112 = arith.constant 112 : index
    %c0_151 = arith.constant 0 : index
    %342 = vector.load %arg6[%c112, %c0_151] : memref<200x32xf32, #tpu.memory_space<vmem>>, vector<16x1xf32>
    %cst_152 = arith.constant dense<0.000000e+00> : vector<2x1xf32>
    %343 = tpu.matmul %341, %342, %cst_152 {dimension_numbers = #tpu.dot_dimension_numbers<[1], [0], [0], [1], [0, 0, 1, 1], [], []>} : vector<2x16xf32>, vector<16x1xf32>, vector<2x1xf32> -> vector<2x1xf32>
    %c192 = arith.constant 192 : index
    %c0_153 = arith.constant 0 : index
    %344 = vector.load %arg6[%c192, %c0_153] : memref<200x32xf32, #tpu.memory_space<vmem>>, vector<1x1xf32>
    %345 = vector.broadcast %344 : vector<1x1xf32> to vector<2x1xf32>
    %346 = arith.addf %343, %345 : vector<2x1xf32>
    %347 = vector.shape_cast %346 : vector<2x1xf32> to vector<2x1xf32>
    %348 = vector.broadcast %347 : vector<2x1xf32> to vector<2x128xf32>
    %c0_154 = arith.constant 0 : index
    %c0_155 = arith.constant 0 : index
    %c0_156 = arith.constant 0 : index
    %349 = vector.load %arg7[%c0_154, %c0_155, %c0_156] : memref<1x2x128xf32, #tpu.memory_space<vmem>>, vector<1x2x128xf32>
    %350 = vector.shape_cast %349 : vector<1x2x128xf32> to vector<2x128xf32>
    %351 = vector.shape_cast %348 : vector<2x128xf32> to vector<1x2x128xf32>
    tpu.vector_store %arg7[%c0_154, %c0_155, %c0_156], %351 {strides = array<i32>} : memref<1x2x128xf32, #tpu.memory_space<vmem>>, vector<1x2x128xf32>,
    return
  }
  func.func @transform_0(%arg0: i32) -> (i32, i32) {
    %c0_i32 = arith.constant 0 : i32
    %c0_i32_0 = arith.constant 0 : i32
    %c0_i32_1 = arith.constant 0 : i32
    return %c0_i32, %c0_i32_0 : i32, i32
  }
  func.func @transform_1(%arg0: i32) -> (i32, i32) {
    %c0_i32 = arith.constant 0 : i32
    %c0_i32_0 = arith.constant 0 : i32
    return %arg0, %c0_i32 : i32, i32
  }
  func.func @transform_2(%arg0: i32) -> (i32, i32, i32) {
    %c0_i32 = arith.constant 0 : i32
    %c0_i32_0 = arith.constant 0 : i32
    %c0_i32_1 = arith.constant 0 : i32
    return %arg0, %c0_i32, %c0_i32_0 : i32, i32, i32
  }
  func.func @transform_3(%arg0: i32) -> (i32, i32, i32) {
    %c0_i32 = arith.constant 0 : i32
    %c0_i32_0 = arith.constant 0 : i32
    %c0_i32_1 = arith.constant 0 : i32
    %c0_i32_2 = arith.constant 0 : i32
    return %c0_i32, %c0_i32_0, %c0_i32_1 : i32, i32, i32
  }
  func.func @transform_4(%arg0: i32) -> (i32, i32, i32) {
    %c0_i32 = arith.constant 0 : i32
    %c0_i32_0 = arith.constant 0 : i32
    %c0_i32_1 = arith.constant 0 : i32
    %c0_i32_2 = arith.constant 0 : i32
    return %c0_i32, %c0_i32_0, %c0_i32_1 : i32, i32, i32
  }
  func.func @transform_5(%arg0: i32) -> (i32, i32) {
    %c0_i32 = arith.constant 0 : i32
    %c0_i32_0 = arith.constant 0 : i32
    %c0_i32_1 = arith.constant 0 : i32
    return %c0_i32, %c0_i32_0 : i32, i32
  }
  func.func @transform_6(%arg0: i32) -> (i32, i32, i32) {
    %c0_i32 = arith.constant 0 : i32
    %c0_i32_0 = arith.constant 0 : i32
    %c0_i32_1 = arith.constant 0 : i32
    return %arg0, %c0_i32, %c0_i32_0 : i32, i32, i32
  }
}

</mosaic_0001>

<bundles_post_ra>
// kernel: _lambda_.1
= control target key start
LH: loop header
LB: loop body
LE: loop exit
PB: predicated region body
PF: predicated region fallthrough
CT: control target
= control target key end

     0   :  { %11 = vsyncpa [#allocation3], 0  ;;  %s5383_s0 = inlined_call_operand.hbm [shape: f32[520,32], index: 0, kind: input, shape index: {}]   ;;  %s5384_s1 = inlined_call_operand.vmem [shape: f32[64,8], index: 1, kind: input, shape index: {}]   ;;  %s5385_s2 = inlined_call_operand.vmem [shape: f32[4,1,8], index: 2, kind: input, shape index: {}]   ;;  %s5386_s3 = inlined_call_operand.hbm [shape: bf16[2,160,128], index: 3, kind: input, shape index: {}]   ;;  %s5387_s4 = inlined_call_operand.hbm [shape: f32[2,64,128], index: 4, kind: input, shape index: {}]   ;;  %s5388_s5 = inlined_call_operand.vmem [shape: f32[200,32], index: 5, kind: input, shape index: {}]   ;;  %s5389_s6 = inlined_call_operand.vmem [shape: f32[2,2,128], index: 6, kind: output, shape index: {}]  }
   0x1   :  { %12 = vsyncpa [#allocation5], 0  ;;  %s4429_s21 = smov 0  }
   0x2 LB: > { %s210_s24 = sshll.u32 %s5386_s3, 4  ;;  %s4438_s25 = sadd.s32 4294967295, %s4379_s21   ;;  %s4379_s21 = sphi %s4429_s21, %s18_s21   ;;  %s211_s24 = int_to_ptr.hbm [resolvable:$true] %s210_s24 }
   0x3   : > { %p3623_p0 = scmp.ge.s32.totalorder %s4379_s21, 1  ;;  %p185_p1 = scmp.lt.s32.totalorder %s4379_s21, 3 }
   0x4   : > { %p3906_p2 = scmp.eq.s32.totalorder %s4438_s25, 0  ;;  %s4381_s27 = smov [#allocation4]  }
   0x5   : > { %p4443_p3 = pnand %p3623_p0, %p185_p1  ;;  %s212_s28 = sshll.u32 %s4381_s27, 4  ;;  %s213_s28 = int_to_ptr.vmem [resolvable:$true] %s212_s28 }
   0x6   : > { %s196_s7 = sshll.u32 %s5383_s0, 4  ;;  %s4382_s9 = smov [#allocation2]   ;;  %s197_s7 = int_to_ptr.hbm [resolvable:$true] %s196_s7 }
   0x7   : > { %p3896_p4 = pneg %p4443_p3  ;;  %s198_s10 = sshll.u32 %s4382_s9, 4  ;;  %s199_s10 = int_to_ptr.vmem [resolvable:$true] %s198_s10 }
   0x8   : > { %s4383_s11 = smov 64   ;;  %s4384_s12 = smov 4  }
   0x9   : > { %p4454_p5 = pnand %p3906_p2, %p3896_p4  ;;  %s224_s15 = sshll.u32 %s5387_s4, 4  ;;  %s225_s15 = int_to_ptr.hbm [resolvable:$true] %s224_s15 }
   0xa   : > { %s4385_s16 = smov 128   ;;  %s4386_s17 = smov 8  }
   0xb   : > { %3902 = dma.hbm_to_vmem [thread:$0]  (!%p4454_p5), %s211_s24, 2560, %s213_s28, [#allocation5], %s4383_s11, %s4383_s11, %s4384_s12  }
   0xc   : > { %3899 = dma.hbm_to_vmem [thread:$0]  (!%p4454_p5), %s197_s7, 8320, %s199_s10, [#allocation3], %s4385_s16, %s4385_s16, %s4386_s17  }
   0xd   : > { %s4387_s18 = smov [#allocation6]   ;;  %262 = sbr.rel (%p4443_p3) target bundleno = 6082 (0x17c2), region = 44 }
   0xe   : > { %s226_s19 = sshll.u32 %s4387_s18, 4  ;;  %s227_s19 = int_to_ptr.vmem [resolvable:$true] %s226_s19 }
   0xf   : > { %3905 = dma.hbm_to_vmem [thread:$0]  (!%p4454_p5), %s225_s15, 2048, %s227_s19, [#allocation5], %s4385_s16, %s4385_s16, %s4386_s17  }
  0x12   : > { %4370 = dma.done.wait (%p3906_p2), [#allocation3], 8320  }
  0x13   : > { %4372 = vsyncadd (%p3906_p2), [#allocation3], 4294958976 }
  0x14   : > { %4374 = dma.done.wait (%p3906_p2), [#allocation5], 4608  }
  0x15   : > { %4376 = vsyncadd (%p3906_p2), [#allocation5], 4294962688  ;;  %s3632_s20 = sshll.u32 %s4438_s25, 2  ;;  %vm394_vm0 = vcmask 64512   ;;  %v387_v0 = vld [vmem:[%s5388_s5] sm:$0xff]  ;;  %v3865_v5 = vld [vmem:[#allocation4 + $0x8] sm:$0xff] }
  0x16   : > { %p307_p6 = scmp.lt.s32.totalorder %s3632_s20, 7  ;;  %422 = vmatpush.msra.mxu0 %v387_v0  ;;  %469 = vmatpush.bf16.msra.mxu1 %v3865_v5  ;;  %v3864_v6 = vld [vmem:[#allocation4] sm:$0xff]  ;;  %v3954_v8 = vld [vmem:[%s5388_s5 + $0x80] ss:$0 sm:$0xff]  ;;  %vm456_vm1 = vcmask 261120   ;;  %s4388_s7 = smov 96  }
  0x17   : > { %v3955_v19 = vld [vmem:[#allocation6] ss:$0 sm:$0xff]  ;;  %v322_v29 = vld [vmem:[#allocation2] sm:$0xff]  ;;  %v324_v31 = vld [vmem:[#allocation2 + $0x10] sm:$0xff]  ;;  %s4389_s8 = smov 64   ;;  %s4390_s9 = smov 32  }
  0x18   : > { %s5393_s20 = smov (!%p307_p6, %s3632_s20), 7  ;;  %v323_v30 = vld [vmem:[#allocation2 + $0x8] sm:$0xff]  ;;  %v325_v32 = vld [vmem:[#allocation2 + $0x18] sm:$0xff]  ;;  %v326_v33 = vld [vmem:[#allocation2 + $0x20] sm:$0xff]  ;;  %s3634_s10 = sshll.u32 %s4438_s25, 1 }
  0x19   : > { %s3633_s22 = sshll.u32 %s5393_s20, 3  ;;  %v327_v34 = vld [vmem:[#allocation2 + $0x28] sm:$0xff]  ;;  %v328_v35 = vld [vmem:[#allocation2 + $0x30] sm:$0xff]  ;;  %v329_v36 = vld [vmem:[#allocation2 + $0x38] sm:$0xff]  ;;  %p313_p7 = scmp.lt.s32.totalorder %s3634_s10, 3 }
  0x1a   : > { %s310_s26 = scalar_lea.vmem %s5384_s1, %s3633_s22  ;;  %470 = vmatpush.bf16.msra.mxu1 %v3864_v6  ;;  %v330_v37 = vld [vmem:[#allocation2 + $0x40] sm:$0xff]  ;;  %v331_v38 = vld [vmem:[#allocation2 + $0x48] sm:$0xff]  ;;  %v332_v39 = vld [vmem:[#allocation2 + $0x50] sm:$0xff]  ;;  %p317_p8 = scmp.lt.s32.totalorder %s4438_s25, 1 }
  0x1b   : > { %v389_v1 = vld [vmem:[%s310_s26] sm:$0xff]  ;;  %v390_v2 = vld [vmem:[%s310_s26 + $0x8] sm:$0xff]  ;;  %v391_v3 = vld [vmem:[%s310_s26 + $0x10] sm:$0xff]  ;;  %s5395_s10 = smov (!%p313_p7, %s3634_s10), 3 }
  0x1c   : > { %3636 = vmatmul.msk.f32.vlgmr.msra.gmra.mxu0 %vm394_vm0, %v389_v1  ;;  %v392_v4 = vld [vmem:[%s310_s26 + $0x18] sm:$0xff]  ;;  %v333_v41 = vld [vmem:[#allocation2 + $0x58] sm:$0xff]  ;;  %v334_v44 = vld [vmem:[#allocation2 + $0x60] sm:$0xff]  ;;  %s315_s13 = scalar_lea.vmem %s5385_s2, %s5395_s10  ;;  %s5397_s25 = smov (!%p317_p8, %s4438_s25), 1 }
  0x1d   : > { %v335_v46 = vld [vmem:[#allocation2 + $0x68] sm:$0xff]  ;;  %v338_v47 = vld [vmem:[#allocation2 + $0x80] sm:$0xff]  ;;  %v336_v50 = vld [vmem:[#allocation2 + $0x70] sm:$0xff]  ;;  %s3635_s16 = sshll.u32 %s5397_s25, 1 }
  0x1e   : > { %v339_v51 = vld [vmem:[#allocation2 + $0x88] sm:$0xff]  ;;  %v340_v54 = vld [vmem:[#allocation2 + $0x90] sm:$0xff]  ;;  %v341_v57 = vld [vmem:[#allocation2 + $0x98] sm:$0xff]  ;;  %s320_s19 = scalar_lea.vmem %s5389_s6, %s3635_s16 }
  0x1f   : > { %v337_v60 = vld [vmem:[#allocation2 + $0x78] sm:$0xff]  ;;  %v342_v61 = vld [vmem:[#allocation2 + $0xa0] sm:$0xff]  ;;  %v343_v0 = vld [vmem:[#allocation2 + $0xa8] sm:$0xff] }
  0x20   : > { %v345_v6 = vld [vmem:[#allocation2 + $0xb8] sm:$0xff] }
  0x24   : > { %3637 = vmatmul.msk.f32.gmra.mxu0 %vm394_vm0, %v390_v2 }
  0x2c   : > { %3638 = vmatmul.msk.f32.gmra.mxu0 %vm394_vm0, %v391_v3  ;;  %v344_v3 = vld [vmem:[#allocation2 + $0xb0] sm:$0xff] }
  0x34   : > { %3639 = vmatmul.msk.f32.gmra.mxu0 %vm394_vm0, %v392_v4 }
  0x99   : > { %v424_v7 = vpop.f32.mrf.mxu0 }
  0x9a   : > { %v4491_v10 = vadd.f32 %v3954_v8, %v424_v7 }
  0xa1   : > { %v427_v9 = vpop.f32.mrf.mxu0 }
  0xa2   : > { %v4493_v11 = vadd.f32 %v3954_v8, %v427_v9  ;;  %v346_v9 = vld [vmem:[#allocation2 + $0xc0] sm:$0xff] }
  0xa4   : > { %v440_v12 = vpack.c.bf16 %v4493_v11, %v4491_v10 }
  0xa6   : > { %3648 = vmatmul.msk.bf16.vlgmr.msra.gmra.mxu1 %vm456_vm1, %v440_v12 }
  0xa9   : > { %v430_v13 = vpop.f32.mrf.mxu0 }
  0xaa   : > { %v4498_v15 = vadd.f32 %v3954_v8, %v430_v13 }
  0xb1   : > { %v433_v14 = vpop.f32.mrf.mxu0 }
  0xb2   : > { %v4500_v16 = vadd.f32 %v3954_v8, %v433_v14  ;;  %v347_v14 = vld [vmem:[#allocation2 + $0xc8] sm:$0xff] }
  0xb4   : > { %v441_v17 = vpack.c.bf16 %v4500_v16, %v4498_v15 }
  0xb6   : > { %3649 = vmatmul.msk.bf16.gmra.mxu1 %vm456_vm1, %v441_v17 }
 0x123   : > { %v472_v18 = vpop.f32.mrf.mxu1 }
 0x124   : > { %v4505_v21 = vadd.f32 %v3955_v19, %v472_v18 }
 0x12b   : > { %v474_v20 = vpop.f32.mrf.mxu1 }
 0x12c   : > { %v4507_v22 = vadd.f32 %v3955_v19, %v474_v20 }
 0x12e   : > { %617 = vrot.lane.b32.xlu1 %v4507_v22, %s4388_s7  ;;  %v3938_v23 = vpack.i.bf16 %v4505_v21, %v4507_v22 }
 0x133   : > { %v477_v24 = vpop.f32.mrf.mxu1 }
 0x134   : > { %v4515_v26 = vadd.f32 %v3955_v19, %v477_v24 }
 0x136   : > { %615 = vrot.lane.b32.xlu1 %v4505_v21, %s4388_s7 }
 0x13b   : > { %v479_v25 = vpop.f32.mrf.mxu1 }
 0x13c   : > { %v4517_v27 = vadd.f32 %v3955_v19, %v479_v25  ;;  %v348_v19 = vld [vmem:[#allocation2 + $0xd0] sm:$0xff]  ;;  %v349_v25 = vld [vmem:[#allocation2 + $0xd8] sm:$0xff] }
 0x13e   : > { %621 = vrot.lane.b32.xlu0 %v4517_v27, %s4388_s7  ;;  %542 = vmatpush.msra.mxu2 %v4517_v27  ;;  %v3933_v28 = vpack.i.bf16 %v4515_v26, %v4517_v27 }
 0x140   : > { %543 = vmatpush.msra.mxu2 %v4515_v26 }
 0x142   : > { %544 = vmatpush.msra.mxu2 %v4507_v22 }
 0x144   : > { %545 = vmatpush.msra.mxu2 %v4505_v21 }
 0x145   : > { %3650 = vmatmul.msk.f32.vlgmr.msra.gmra.mxu2 %vm456_vm1, %v322_v29 }
 0x146   : > { %619 = vrot.lane.b32.xlu0 %v4515_v26, %s4388_s7 }
 0x14d   : > { %3651 = vmatmul.msk.f32.gmra.mxu2 %vm456_vm1, %v323_v30 }
 0x155   : > { %3652 = vmatmul.msk.f32.gmra.mxu2 %vm456_vm1, %v324_v31  ;;  %v350_v31 = vld [vmem:[#allocation2 + $0xe0] sm:$0xff] }
 0x15d   : > { %3653 = vmatmul.msk.f32.gmra.mxu2 %vm456_vm1, %v325_v32 }
 0x165   : > { %3654 = vmatmul.msk.f32.gmra.mxu2 %vm456_vm1, %v326_v33 }
 0x16d   : > { %3655 = vmatmul.msk.f32.gmra.mxu2 %vm456_vm1, %v327_v34  ;;  %v351_v34 = vld [vmem:[#allocation2 + $0xe8] sm:$0xff] }
 0x175   : > { %3656 = vmatmul.msk.f32.gmra.mxu2 %vm456_vm1, %v328_v35 }
 0x17d   : > { %3657 = vmatmul.msk.f32.gmra.mxu2 %vm456_vm1, %v329_v36 }
 0x185   : > { %3658 = vmatmul.msk.f32.gmra.mxu2 %vm456_vm1, %v330_v37 }
 0x18d   : > { %3659 = vmatmul.msk.f32.gmra.mxu2 %vm456_vm1, %v331_v38  ;;  %v370_v38 = vld [vmem:[#allocation2 + $0x180] sm:$0xff] }
 0x195   : > { %3660 = vmatmul.msk.f32.gmra.mxu2 %vm456_vm1, %v332_v39 }
 0x19d   : > { %3661 = vmatmul.msk.f32.gmra.mxu2 %vm456_vm1, %v333_v41 }
 0x1a0   : > { %v618_v42 = vpop.permute.xlu1 %617 }
 0x1a5   : > { %3662 = vmatmul.msk.f32.gmra.mxu2 %vm456_vm1, %v334_v44 }
 0x1a8   : > { %v616_v45 = vpop.permute.xlu1 %615 }
 0x1ad   : > { %3663 = vmatmul.msk.f32.gmra.mxu2 %vm456_vm1, %v335_v46  ;;  %v371_v46 = vld [vmem:[#allocation2 + $0x188] sm:$0xff] }
 0x1b0   : > { %v622_v40 = vpop.permute.xlu0 %621 }
 0x1b1   : > { %3666 = vmatpush.xpose.msk.msra.mxu3 %vm456_vm1, %v622_v40  ;;  %v352_v40 = vld [vmem:[#allocation2 + $0xf0] sm:$0xff] }
 0x1b5   : > { %3664 = vmatmul.msk.f32.gmra.mxu2 %vm456_vm1, %v336_v50 }
 0x1b8   : > { %v620_v43 = vpop.permute.xlu0 %619 }
 0x1b9   : > { %3667 = vmatpush.xpose.msk.msra.mxu3 %vm456_vm1, %v620_v43 }
 0x1bd   : > { %3668 = vmatpush.xpose.msk.msra.mxu3 %vm456_vm1, %v618_v42  ;;  %3665 = vmatmul.msk.f32.gmra.mxu2 %vm456_vm1, %v337_v60 }
 0x1c1   : > { %3669 = vmatpush.xpose.msk.msra.mxu3 %vm456_vm1, %v616_v45 }
 0x1c8   : > { %v547_v48 = vpop.f32.mrf.mxu2 }
 0x1c9   : > { %v595_v49 = vmul.f32 %v547_v48, %v338_v47 }
 0x1cb   : > { %3670 = vmatmul.msk.f32.vlgmr.msra.gmra.mxu3 %vm456_vm1, %v595_v49 }
 0x1d0   : > { %v550_v52 = vpop.f32.mrf.mxu2 }
 0x1d1   : > { %v596_v53 = vmul.f32 %v550_v52, %v339_v51  ;;  %v372_v51 = vld [vmem:[#allocation2 + $0x190] sm:$0xff] }
 0x1d3   : > { %3671 = vmatmul.msk.f32.gmra.mxu3 %vm456_vm1, %v596_v53 }
 0x1d8   : > { %v553_v55 = vpop.f32.mrf.mxu2 }
 0x1d9   : > { %v597_v56 = vmul.f32 %v553_v55, %v340_v54 }
 0x1db   : > { %3672 = vmatmul.msk.f32.gmra.mxu3 %vm456_vm1, %v597_v56  ;;  %v373_v56 = vld [vmem:[#allocation2 + $0x198] sm:$0xff] }
 0x1e0   : > { %v556_v58 = vpop.f32.mrf.mxu2 }
 0x1e1   : > { %v598_v59 = vmul.f32 %v556_v58, %v341_v57  ;;  %v353_v58 = vld [vmem:[#allocation2 + $0xf8] sm:$0xff] }
 0x1e3   : > { %3673 = vmatmul.msk.f32.gmra.mxu3 %vm456_vm1, %v598_v59 }
 0x1e8   : > { %v559_v62 = vpop.f32.mrf.mxu2 }
 0x1e9   : > { %v599_v63 = vmul.f32 %v559_v62, %v342_v61 }
 0x1eb   : > { %3674 = vmatmul.msk.f32.gmra.mxu3 %vm456_vm1, %v599_v63 }
 0x1f0   : > { %v562_v1 = vpop.f32.mrf.mxu2 }
 0x1f1   : > { %v600_v2 = vmul.f32 %v562_v1, %v343_v0  ;;  %v374_v0 = vld [vmem:[#allocation2 + $0x1a0] sm:$0xff] }
 0x1f3   : > { %3675 = vmatmul.msk.f32.gmra.mxu3 %vm456_vm1, %v600_v2 }
 0x1f8   : > { %v565_v4 = vpop.f32.mrf.mxu2 }
 0x1f9   : > { %v601_v5 = vmul.f32 %v565_v4, %v344_v3 }
 0x1fb   : > { %3676 = vmatmul.msk.f32.gmra.mxu3 %vm456_vm1, %v601_v5  ;;  %v375_v5 = vld [vmem:[#allocation2 + $0x1a8] sm:$0xff] }
 0x200   : > { %v568_v7 = vpop.f32.mrf.mxu2 }
 0x201   : > { %v602_v8 = vmul.f32 %v568_v7, %v345_v6 }
 0x203   : > { %3677 = vmatmul.msk.f32.gmra.mxu3 %vm456_vm1, %v602_v8 }
 0x208   : > { %v571_v12 = vpop.f32.mrf.mxu2 }
 0x209   : > { %v603_v13 = vmul.f32 %v571_v12, %v346_v9  ;;  %v376_v12 = vld [vmem:[#allocation2 + $0x1b0] sm:$0xff] }
 0x20b   : > { %3678 = vmatmul.msk.f32.gmra.mxu3 %vm456_vm1, %v603_v13 }
 0x210   : > { %v574_v17 = vpop.f32.mrf.mxu2 }
 0x211   : > { %v604_v18 = vmul.f32 %v574_v17, %v347_v14 }
 0x213   : > { %3679 = vmatmul.msk.f32.gmra.mxu3 %vm456_vm1, %v604_v18 }
 0x218   : > { %v577_v20 = vpop.f32.mrf.mxu2 }
 0x219   : > { %v605_v24 = vmul.f32 %v577_v20, %v348_v19  ;;  %v377_v19 = vld [vmem:[#allocation2 + $0x1b8] sm:$0xff] }
 0x21b   : > { %3680 = vmatmul.msk.f32.gmra.mxu3 %vm456_vm1, %v605_v24 }
 0x220   : > { %v580_v29 = vpop.f32.mrf.mxu2 }
 0x221   : > { %v606_v30 = vmul.f32 %v580_v29, %v349_v25 }
 0x223   : > { %3681 = vmatmul.msk.f32.gmra.mxu3 %vm456_vm1, %v606_v30  ;;  %v378_v30 = vld [vmem:[#allocation2 + $0x1c0] sm:$0xff] }
 0x228   : > { %v583_v32 = vpop.f32.mrf.mxu2 }
 0x229   : > { %v607_v33 = vmul.f32 %v583_v32, %v350_v31 }
 0x22b   : > { %3682 = vmatmul.msk.f32.gmra.mxu3 %vm456_vm1, %v607_v33 }
 0x230   : > { %v586_v35 = vpop.f32.mrf.mxu2 }
 0x231   : > { %v608_v36 = vmul.f32 %v586_v35, %v351_v34 }
 0x233   : > { %3683 = vmatmul.msk.f32.gmra.mxu3 %vm456_vm1, %v608_v36 }
 0x238   : > { %v589_v41 = vpop.f32.mrf.mxu2 }
 0x239   : > { %v609_v42 = vmul.f32 %v589_v41, %v352_v40  ;;  %v380_v40 = vld [vmem:[#allocation2 + $0x1d0] sm:$0xff] }
 0x23b   : > { %3684 = vmatmul.msk.f32.gmra.mxu3 %vm456_vm1, %v609_v42 }
 0x240   : > { %v592_v59 = vpop.f32.mrf.mxu2 }
 0x241   : > { %v610_v60 = vmul.f32 %v592_v59, %v353_v58 }
 0x243   : > { %3685 = vmatmul.msk.f32.gmra.mxu3 %vm456_vm1, %v610_v60 }
 0x24e   : > { %v696_v37 = vpop.f32.mrf.mxu3 }
 0x24f   : > { %v744_v39 = vmul.f32 0.35355338, %v696_v37 }
 0x251   : > { %v4563_v43 = vadd.f32 %v744_v39, %v370_v38 }
 0x253   : > { %v776_v44 = vsel %vm456_vm1, %v4563_v43, -inf }
 0x254   : > { %777 = vmax.xlane.f32.xlu2 %v776_v44 }
 0x256   : > { %v699_v45 = vpop.f32.mrf.mxu3 }
 0x257   : > { %v745_v47 = vmul.f32 0.35355338, %v699_v45 }
 0x259   : > { %v4568_v48 = vadd.f32 %v745_v47, %v371_v46 }
 0x25b   : > { %v779_v49 = vsel %vm456_vm1, %v4568_v48, -inf }
 0x25c   : > { %780 = vmax.xlane.f32.xlu2 %v779_v49 }
 0x25e   : > { %v702_v50 = vpop.f32.mrf.mxu3 }
 0x25f   : > { %v746_v52 = vmul.f32 0.35355338, %v702_v50 }
 0x261   : > { %v4572_v53 = vadd.f32 %v746_v52, %v372_v51 }
 0x263   : > { %v782_v54 = vsel %vm456_vm1, %v4572_v53, -inf }
 0x264   : > { %783 = vmax.xlane.f32.xlu0 %v782_v54 }
 0x266   : > { %v705_v55 = vpop.f32.mrf.mxu3 }
 0x267   : > { %v747_v57 = vmul.f32 0.35355338, %v705_v55 }
 0x269   : > { %v4576_v61 = vadd.f32 %v747_v57, %v373_v56 }
 0x26b   : > { %v785_v62 = vsel %vm456_vm1, %v4576_v61, -inf }
 0x26c   : > { %786 = vmax.xlane.f32.xlu1 %v785_v62 }
 0x26e   : > { %v708_v63 = vpop.f32.mrf.mxu3 }
 0x26f   : > { %v748_v1 = vmul.f32 0.35355338, %v708_v63 }
 0x271   : > { %v4581_v2 = vadd.f32 %v748_v1, %v374_v0 }
 0x273   : > { %v788_v3 = vsel %vm456_vm1, %v4581_v2, -inf }
 0x274   : > { %789 = vmax.xlane.f32.xlu2 %v788_v3 }
 0x276   : > { %v711_v4 = vpop.f32.mrf.mxu3 }
 0x277   : > { %v749_v6 = vmul.f32 0.35355338, %v711_v4 }
 0x279   : > { %v4585_v7 = vadd.f32 %v749_v6, %v375_v5  ;;  %v381_v6 = vld [vmem:[#allocation2 + $0x1d8] sm:$0xff] }
 0x27b   : > { %v791_v8 = vsel %vm456_vm1, %v4585_v7, -inf }
 0x27c   : > { %792 = vmax.xlane.f32.xlu2 %v791_v8 }
 0x27e   : > { %v714_v9 = vpop.f32.mrf.mxu3 }
 0x27f   : > { %v750_v13 = vmul.f32 0.35355338, %v714_v9 }
 0x281   : > { %v4589_v14 = vadd.f32 %v750_v13, %v376_v12 }
 0x283   : > { %v794_v17 = vsel %vm456_vm1, %v4589_v14, -inf }
 0x284   : > { %795 = vmax.xlane.f32.xlu2 %v794_v17 }
 0x285   : > { %3934 = vrot.lane.b32.xlu1 %v3933_v28, %s4389_s8  ;;  %v379_v28 = vld [vmem:[#allocation2 + $0x1c8] sm:$0xff] }
 0x286   : > { %v717_v18 = vpop.f32.mrf.mxu3 }
 0x287   : > { %v751_v20 = vmul.f32 0.35355338, %v717_v18 }
 0x289   : > { %v4597_v24 = vadd.f32 %v751_v20, %v377_v19  ;;  %v382_v20 = vld [vmem:[#allocation2 + $0x1e0] sm:$0xff] }
 0x28b   : > { %v797_v25 = vsel %vm456_vm1, %v4597_v24, -inf }
 0x28c   : > { %798 = vmax.xlane.f32.xlu2 %v797_v25 }
 0x28e   : > { %v720_v29 = vpop.f32.mrf.mxu3 }
 0x28f   : > { %v752_v31 = vmul.f32 0.35355338, %v720_v29  ;;  %v384_v29 = vld [vmem:[#allocation2 + $0x1f0] sm:$0xff] }
 0x291   : > { %v4601_v32 = vadd.f32 %v752_v31, %v378_v30 }
 0x293   : > { %v800_v33 = vsel %vm456_vm1, %v4601_v32, -inf }
 0x294   : > { %801 = vmax.xlane.f32.xlu0 %v800_v33 }
 0x296   : > { %v723_v34 = vpop.f32.mrf.mxu3 }
 0x297   : > { %v753_v35 = vmul.f32 0.35355338, %v723_v34 }
 0x299   : > { %v4605_v36 = vadd.f32 %v753_v35, %v379_v28 }
 0x29b   : > { %v803_v37 = vsel %vm456_vm1, %v4605_v36, -inf }
 0x29c   : > { %804 = vmax.xlane.f32.xlu2 %v803_v37 }
 0x29e   : > { %v726_v38 = vpop.f32.mrf.mxu3 }
 0x29f   : > { %v754_v39 = vmul.f32 0.35355338, %v726_v38 }
 0x2a1   : > { %v4613_v41 = vadd.f32 %v754_v39, %v380_v40 }
 0x2a3   : > { %v806_v42 = vsel %vm456_vm1, %v4613_v41, -inf }
 0x2a6   : > { %v729_v50 = vpop.f32.mrf.mxu3 }
 0x2a7   : > { %v755_v3 = vmul.f32 0.35355338, %v729_v50 }
 0x2a8   : > { %3939 = vrot.lane.b32.xlu0 %v3938_v23, %s4389_s8 }
 0x2a9   : > { %v4638_v8 = vadd.f32 %v755_v3, %v381_v6 }
 0x2ab   : > { %v809_v17 = vsel %vm456_vm1, %v4638_v8, -inf }
 0x2ae   : > { %v732_v58 = vpop.f32.mrf.mxu3 }
 0x2af   : > { %807 = vmax.xlane.f32.xlu1 %v806_v42  ;;  %v756_v13 = vmul.f32 0.35355338, %v732_v58 }
 0x2b1   : > { %v4647_v30 = vadd.f32 %v756_v13, %v382_v20 }
 0x2b3   : > { %v812_v37 = vsel %vm456_vm1, %v4647_v30, -inf }
 0x2c7   : > { %v778_v44 = vpop.xlane.xlu2 %777 }
 0x2c8   : > { %v824_v45 = vsub.f32 %v4563_v43, %v778_v44 }
 0x2ca   : > { %v840_v46 = vmul.f32 1.442695, %v824_v45 }
 0x2cc   : > { %3979 = vpow2.f32 %v840_v46 }
 0x2cf   : > { %v781_v47 = vpop.xlane.xlu2 %780 }
 0x2d0   : > { %v825_v49 = vsub.f32 %v4568_v48, %v781_v47 }
 0x2d2   : > { %v4619_v51 = vpop.eup %3979  ;;  %v842_v52 = vmul.f32 1.442695, %v825_v49 }
 0x2d3   : > { %v872_v23 = vsel %vm456_vm1, %v4619_v51, 0.0 }
 0x2d4   : > { %3981 = vpow2.f32 %v842_v52  ;;  %873 = vadd.xlane.f32.xlu2 %v872_v23 }
 0x2d7   : > { %v784_v54 = vpop.xlane.xlu0 %783 }
 0x2d8   : > { %v826_v55 = vsub.f32 %v4572_v53, %v784_v54  ;;  %v735_v53 = vpop.f32.mrf.mxu3 }
 0x2d9   : > { %v757_v52 = vmul.f32 0.35355338, %v735_v53 }
 0x2da   : > { %v4624_v56 = vpop.eup %3981  ;;  %v844_v43 = vmul.f32 1.442695, %v826_v55 }
 0x2db   : > { %v875_v57 = vsel %vm456_vm1, %v4624_v56, 0.0 }
 0x2dc   : > { %3983 = vpow2.f32 %v844_v43  ;;  %876 = vadd.xlane.f32.xlu2 %v875_v57  ;;  %v383_v43 = vld [vmem:[#allocation2 + $0x1e8] sm:$0xff]  ;;  %v385_v57 = vld [vmem:[#allocation2 + $0x1f8] sm:$0xff] }
 0x2df   : > { %v787_v48 = vpop.xlane.xlu1 %786 }
 0x2e0   : > { %v827_v59 = vsub.f32 %v4576_v61, %v787_v48  ;;  %v738_v12 = vpop.f32.mrf.mxu3  ;;  %v4670_v48 = vadd.f32 %v757_v52, %v383_v43 }
 0x2e1   : > { %v758_v19 = vmul.f32 0.35355338, %v738_v12 }
 0x2e2   : > { %v4629_v60 = vpop.eup %3983  ;;  %v846_v62 = vmul.f32 1.442695, %v827_v59 }
 0x2e3   : > { %v878_v63 = vsel %vm456_vm1, %v4629_v60, 0.0  ;;  %v4649_v33 = vadd.f32 %v758_v19, %v384_v29 }
 0x2e4   : > { %3985 = vpow2.f32 %v846_v62  ;;  %879 = vadd.xlane.f32.xlu2 %v878_v63 }
 0x2e5   : > { %v818_v39 = vsel %vm456_vm1, %v4649_v33, -inf }
 0x2e7   : > { %v790_v0 = vpop.xlane.xlu2 %789 }
 0x2e8   : > { %v828_v1 = vsub.f32 %v4581_v2, %v790_v0 }
 0x2ea   : > { %v4634_v4 = vpop.eup %3985  ;;  %v848_v5 = vmul.f32 1.442695, %v828_v1 }
 0x2eb   : > { %v881_v61 = vsel %vm456_vm1, %v4634_v4, 0.0 }
 0x2ec   : > { %3987 = vpow2.f32 %v848_v5  ;;  %882 = vadd.xlane.f32.xlu2 %v881_v61 }
 0x2ef   : > { %v793_v9 = vpop.xlane.xlu2 %792 }
 0x2f0   : > { %v829_v2 = vsub.f32 %v4585_v7, %v793_v9 }
 0x2f2   : > { %v4642_v18 = vpop.eup %3987  ;;  %v850_v31 = vmul.f32 1.442695, %v829_v2 }
 0x2f3   : > { %v884_v25 = vsel %vm456_vm1, %v4642_v18, 0.0 }
 0x2f4   : > { %885 = vadd.xlane.f32.xlu0 %v884_v25  ;;  %810 = vmax.xlane.f32.xlu2 %v809_v17  ;;  %3989 = vpow2.f32 %v850_v31 }
 0x2f7   : > { %v3935_v34 = vpop.permute.xlu1 %3934  ;;  %v796_v28 = vpop.xlane.xlu2 %795 }
 0x2f8   : > { %v3936_v35 = vunpack.i.l.bf16 %v3935_v34  ;;  %v830_v7 = vsub.f32 %v4589_v14, %v796_v28  ;;  %v3937_v38 = vunpack.i.h.bf16 %v3935_v34  ;;  %v741_v14 = vpop.f32.mrf.mxu3 }
 0x2f9   : > { %v759_v23 = vmul.f32 0.35355338, %v741_v14 }
 0x2fa   : > { %1232 = vmatpush.msrb.mxu0 %v3936_v35  ;;  %v852_v40 = vmul.f32 1.442695, %v830_v7  ;;  %v4656_v44 = vpop.eup %3989 }
 0x2fb   : > { %v887_v47 = vsel %vm456_vm1, %v4656_v44, 0.0  ;;  %v4672_v59 = vadd.f32 %v759_v23, %v385_v57 }
 0x2fc   : > { %1233 = vmatpush.msrb.mxu0 %v3937_v38  ;;  %813 = vmax.xlane.f32.xlu2 %v812_v37  ;;  %3991 = vpow2.f32 %v852_v40 }
 0x2fd   : > { %819 = vmax.xlane.f32.xlu0 %v818_v39  ;;  %v821_v0 = vsel %vm456_vm1, %v4672_v59, -inf }
 0x2ff   : > { %v799_v42 = vpop.xlane.xlu2 %798 }
 0x300   : > { %v831_v45 = vsub.f32 %v4597_v24, %v799_v42 }
 0x302   : > { %v854_v46 = vmul.f32 1.442695, %v831_v45  ;;  %v4661_v50 = vpop.eup %3991 }
 0x303   : > { %v890_v58 = vsel %vm456_vm1, %v4661_v50, 0.0 }
 0x304   : > { %3993 = vpow2.f32 %v854_v46  ;;  %888 = vadd.xlane.f32.xlu2 %v887_v47 }
 0x307   : > { %v802_v49 = vpop.xlane.xlu0 %801 }
 0x308   : > { %v832_v55 = vsub.f32 %v4601_v32, %v802_v49  ;;  %v815_v32 = vsel %vm456_vm1, %v4670_v48, -inf }
 0x30a   : > { %v4663_v54 = vpop.eup %3993  ;;  %v856_v62 = vmul.f32 1.442695, %v832_v55 }
 0x30b   : > { %v893_v24 = vsel %vm456_vm1, %v4663_v54, 0.0 }
 0x30c   : > { %894 = vadd.xlane.f32.xlu1 %v893_v24  ;;  %891 = vadd.xlane.f32.xlu2 %v890_v58  ;;  %3995 = vpow2.f32 %v856_v62 }
 0x30f   : > { %v805_v63 = vpop.xlane.xlu2 %804 }
 0x310   : > { %v833_v53 = vsub.f32 %v4605_v36, %v805_v63 }
 0x312   : > { %v858_v1 = vmul.f32 1.442695, %v833_v53  ;;  %v4679_v3 = vpop.eup %3995 }
 0x313   : > { %v896_v61 = vsel %vm456_vm1, %v4679_v3, 0.0 }
 0x314   : > { %3997 = vpow2.f32 %v858_v1  ;;  %816 = vmax.xlane.f32.xlu2 %v815_v32  ;;  %822 = vmax.xlane.f32.xlu1 %v821_v0 }
 0x31a   : > { %v4681_v5 = vpop.eup %3997  ;;  %v3940_v6 = vpop.permute.xlu0 %3939 }
 0x31b   : > { %v899_v36 = vsel %vm456_vm1, %v4681_v5, 0.0  ;;  %v3941_v9 = vunpack.i.l.bf16 %v3940_v6  ;;  %v3942_v12 = vunpack.i.h.bf16 %v3940_v6 }
 0x31c   : > { %897 = vadd.xlane.f32.xlu2 %v896_v61  ;;  %900 = vadd.xlane.f32.xlu0 %v899_v36 }
 0x31d   : > { %1234 = vmatpush.msrb.mxu0 %v3941_v9 }
 0x31f   : > { %1235 = vmatpush.msrb.mxu0 %v3942_v12 }
 0x322   : > { %v808_v13 = vpop.xlane.xlu1 %807 }
 0x323   : > { %v834_v17 = vsub.f32 %v4613_v41, %v808_v13 }
 0x325   : > { %v860_v2 = vmul.f32 1.442695, %v834_v17 }
 0x327   : > { %3999 = vpow2.f32 %v860_v2 }
 0x32d   : > { %v4688_v19 = vpop.eup %3999 }
 0x32e   : > { %v902_v20 = vsel %vm456_vm1, %v4688_v19, 0.0 }
 0x32f   : > { %903 = vadd.xlane.f32.xlu2 %v902_v20 }
 0x347   : > { %v874_v25 = vpop.xlane.xlu2 %873 }
 0x348   : > { %4001 = vrcp.f32 %v874_v25  ;;  %v931_v35 = vand.u32 2147483648, %v874_v25  ;;  %v929_v7 = vand.u32 2147483647, %v874_v25  ;;  %vm925_vm3 = vweird.f32 %v874_v25 }
 0x34a   : > { %v932_v39 = vor.u32 1.1754944e-38, %v931_v35  ;;  %vm930_vm5 = vcmp.eq.f32.partialorder %v929_v7, 8.507059e+37 }
 0x34e   : > { %v4002_v29 = vpop.eup %4001 }
 0x34f   : > { %v921_v31 = vmul.f32 %v4002_v29, %v874_v25  ;;  %v877_v34 = vpop.xlane.xlu2 %876  ;;  %vm926_vm2 = vweird.f32 %v4002_v29 }
 0x350   : > { %4003 = vrcp.f32 %v877_v34  ;;  %vm927_vm4 = vmor %vm925_vm3, %vm926_vm2  ;;  %v945_v49 = vand.u32 2147483648, %v877_v34  ;;  %v943_v23 = vand.u32 2147483647, %v877_v34  ;;  %vm939_vm7 = vweird.f32 %v877_v34 }
 0x351   : > { %v922_v28 = vsub.f32 1.0, %v921_v31 }
 0x352   : > { %v946_v57 = vor.u32 1.1754944e-38, %v945_v49  ;;  %vm944_vm9 = vcmp.eq.f32.partialorder %v943_v23, 8.507059e+37 }
 0x353   : > { %v923_v37 = vmul.f32 %v4002_v29, %v922_v28 }
 0x355   : > { %v924_v41 = vadd.f32 %v4002_v29, %v923_v37 }
 0x356   : > { %v4004_v38 = vpop.eup %4003 }
 0x357   : > { %v935_v40 = vmul.f32 %v4004_v38, %v877_v34  ;;  %v880_v42 = vpop.xlane.xlu2 %879  ;;  %v928_v45 = vsel %vm927_vm4, %v4002_v29, %v924_v41  ;;  %vm940_vm6 = vweird.f32 %v4004_v38 }
 0x358   : > { %4005 = vrcp.f32 %v880_v42  ;;  %v933_v46 = vsel %vm930_vm5, %v932_v39, %v928_v45  ;;  %vm941_vm8 = vmor %vm939_vm7, %vm940_vm6  ;;  %v959_v0 = vand.u32 2147483648, %v880_v42  ;;  %v957_v1 = vand.u32 2147483647, %v880_v42 }
 0x359   : > { %v936_v47 = vsub.f32 1.0, %v935_v40  ;;  %v1144_v14 = vmul.f32 %v4619_v51, %v933_v46  ;;  %vm953_vm11 = vweird.f32 %v880_v42 }
 0x35a   : > { %v960_v36 = vor.u32 1.1754944e-38, %v959_v0  ;;  %vm958_vm13 = vcmp.eq.f32.partialorder %v957_v1, 8.507059e+37 }
 0x35b   : > { %v937_v52 = vmul.f32 %v4004_v38, %v936_v47  ;;  %3686 = vmatmul.msk.f32.vlgmr.msrb.gmra.mxu0 %vm456_vm1, %v1144_v14 }
 0x35d   : > { %v938_v55 = vadd.f32 %v4004_v38, %v937_v52 }
 0x35e   : > { %v4006_v43 = vpop.eup %4005 }
 0x35f   : > { %v949_v24 = vmul.f32 %v4006_v43, %v880_v42  ;;  %v883_v58 = vpop.xlane.xlu2 %882  ;;  %v942_v62 = vsel %vm941_vm8, %v4004_v38, %v938_v55  ;;  %vm954_vm10 = vweird.f32 %v4006_v43 }
 0x360   : > { %4007 = vrcp.f32 %v883_v58  ;;  %v947_v63 = vsel %vm944_vm9, %v946_v57, %v942_v62  ;;  %vm955_vm12 = vmor %vm953_vm11, %vm954_vm10  ;;  %v973_v25 = vand.u32 2147483648, %v883_v58  ;;  %v971_v28 = vand.u32 2147483647, %v883_v58 }
 0x361   : > { %v950_v53 = vsub.f32 1.0, %v949_v24  ;;  %v1145_v51 = vmul.f32 %v4624_v56, %v947_v63  ;;  %vm967_vm15 = vweird.f32 %v883_v58 }
 0x362   : > { %v974_v7 = vor.u32 1.1754944e-38, %v973_v25  ;;  %vm972_vm3 = vcmp.eq.f32.partialorder %v971_v28, 8.507059e+37 }
 0x363   : > { %v951_v32 = vmul.f32 %v4006_v43, %v950_v53  ;;  %3687 = vmatmul.msk.f32.gmra.mxu0 %vm456_vm1, %v1145_v51 }
 0x365   : > { %v952_v6 = vadd.f32 %v4006_v43, %v951_v32 }
 0x366   : > { %v4008_v61 = vpop.eup %4007 }
 0x367   : > { %v963_v9 = vmul.f32 %v4008_v61, %v883_v58  ;;  %v886_v12 = vpop.xlane.xlu0 %885  ;;  %v811_v13 = vpop.xlane.xlu2 %810  ;;  %v956_v17 = vsel %vm955_vm12, %v4006_v43, %v952_v6  ;;  %vm968_vm14 = vweird.f32 %v4008_v61 }
 0x368   : > { %4009 = vrcp.f32 %v886_v12  ;;  %v835_v2 = vsub.f32 %v4638_v8, %v811_v13  ;;  %v961_v20 = vsel %vm958_vm13, %v960_v36, %v956_v17  ;;  %vm969_vm2 = vmor %vm967_vm15, %vm968_vm14  ;;  %v987_v14 = vand.u32 2147483648, %v886_v12 }
 0x369   : > { %v964_v56 = vsub.f32 1.0, %v963_v9  ;;  %v1146_v31 = vmul.f32 %v4629_v60, %v961_v20  ;;  %v985_v52 = vand.u32 2147483647, %v886_v12  ;;  %vm981_vm5 = vweird.f32 %v886_v12 }
 0x36a   : > { %v862_v29 = vmul.f32 1.442695, %v835_v2 }
 0x36b   : > { %v965_v34 = vmul.f32 %v4008_v61, %v964_v56  ;;  %3688 = vmatmul.msk.f32.gmra.mxu0 %vm456_vm1, %v1146_v31  ;;  %vm986_vm7 = vcmp.eq.f32.partialorder %v985_v52, 8.507059e+37 }
 0x36c   : > { %4011 = vpow2.f32 %v862_v29 }
 0x36d   : > { %v966_v35 = vadd.f32 %v4008_v61, %v965_v34 }
 0x36e   : > { %v4010_v37 = vpop.eup %4009 }
 0x36f   : > { %v977_v41 = vmul.f32 %v4010_v37, %v886_v12  ;;  %v814_v8 = vpop.xlane.xlu2 %813  ;;  %v970_v38 = vsel %vm969_vm2, %v4008_v61, %v966_v35  ;;  %vm982_vm4 = vweird.f32 %v4010_v37 }
 0x370   : > { %v836_v39 = vsub.f32 %v4647_v30, %v814_v8  ;;  %v820_v40 = vpop.xlane.xlu0 %819  ;;  %v975_v42 = vsel %vm972_vm3, %v974_v7, %v970_v38  ;;  %vm983_vm6 = vmor %vm981_vm5, %vm982_vm4 }
 0x371   : > { %v978_v60 = vsub.f32 1.0, %v977_v41  ;;  %v838_v45 = vsub.f32 %v4649_v33, %v820_v40  ;;  %v1147_v46 = vmul.f32 %v4634_v4, %v975_v42  ;;  %v988_v33 = vor.u32 1.1754944e-38, %v987_v14 }
 0x372   : > { %v4702_v47 = vpop.eup %4011  ;;  %v864_v49 = vmul.f32 1.442695, %v836_v39 }
 0x373   : > { %v979_v23 = vmul.f32 %v4010_v37, %v978_v60  ;;  %v868_v55 = vmul.f32 1.442695, %v838_v45  ;;  %v905_v43 = vsel %vm456_vm1, %v4702_v47, 0.0  ;;  %3689 = vmatmul.msk.f32.gmra.mxu0 %vm456_vm1, %v1147_v46 }
 0x374   : > { %4013 = vpow2.f32 %v864_v49  ;;  %906 = vadd.xlane.f32.xlu1 %v905_v43 }
 0x375   : > { %4015 = vpow2.f32 %v868_v55  ;;  %v980_v30 = vadd.f32 %v4010_v37, %v979_v23 }
 0x377   : > { %v889_v4 = vpop.xlane.xlu2 %888  ;;  %v984_v57 = vsel %vm983_vm6, %v4010_v37, %v980_v30 }
 0x378   : > { %4017 = vrcp.f32 %v889_v4  ;;  %v989_v24 = vsel %vm986_vm7, %v988_v33, %v984_v57  ;;  %v1001_v61 = vand.u32 2147483648, %v889_v4  ;;  %v999_v9 = vand.u32 2147483647, %v889_v4 }
 0x379   : > { %v1148_v58 = vmul.f32 %v4642_v18, %v989_v24  ;;  %vm995_vm9 = vweird.f32 %v889_v4 }
 0x37a   : > { %v4708_v62 = vpop.eup %4013  ;;  %v1002_v17 = vor.u32 1.1754944e-38, %v1001_v61  ;;  %vm1000_vm11 = vcmp.eq.f32.partialorder %v999_v9, 8.507059e+37 }
 0x37b   : > { %v4710_v63 = vpop.eup %4015  ;;  %v908_v53 = vsel %vm456_vm1, %v4708_v62, 0.0  ;;  %3690 = vmatmul.msk.f32.gmra.mxu0 %vm456_vm1, %v1148_v58 }
 0x37c   : > { %909 = vadd.xlane.f32.xlu0 %v908_v53  ;;  %v914_v51 = vsel %vm456_vm1, %v4710_v63, 0.0 }
 0x37d   : > { %915 = vadd.xlane.f32.xlu1 %v914_v51 }
 0x37e   : > { %v4018_v32 = vpop.eup %4017 }
 0x37f   : > { %v991_v0 = vmul.f32 %v4018_v32, %v889_v4  ;;  %v4717_v1 = vpop.xlane.xlu1 %894  ;;  %v892_v6 = vpop.xlane.xlu2 %891  ;;  %vm996_vm8 = vweird.f32 %v4018_v32 }
 0x380   : > { %4019 = vrcp.f32 %v4717_v1  ;;  %vm997_vm10 = vmor %vm995_vm9, %vm996_vm8  ;;  %v1015_v40 = vand.u32 2147483648, %v892_v6  ;;  %v1013_v42 = vand.u32 2147483647, %v892_v6  ;;  %vm1009_vm13 = vweird.f32 %v892_v6 }
 0x381   : > { %v992_v18 = vsub.f32 1.0, %v991_v0  ;;  %4021 = vrcp.f32 %v892_v6  ;;  %v1029_v52 = vand.u32 2147483648, %v4717_v1  ;;  %vm1023_vm3 = vweird.f32 %v4717_v1 }
 0x382   : > { %v1016_v46 = vor.u32 1.1754944e-38, %v1015_v40  ;;  %vm1014_vm15 = vcmp.eq.f32.partialorder %v1013_v42, 8.507059e+37  ;;  %v1027_v33 = vand.u32 2147483647, %v4717_v1 }
 0x383   : > { %v993_v36 = vmul.f32 %v4018_v32, %v992_v18  ;;  %v1030_v58 = vor.u32 1.1754944e-38, %v1029_v52 }
 0x384   : > { %vm1028_vm5 = vcmp.eq.f32.partialorder %v1027_v33, 8.507059e+37 }
 0x385   : > { %v994_v12 = vadd.f32 %v4018_v32, %v993_v36 }
 0x386   : > { %v4020_v13 = vpop.eup %4019 }
 0x387   : > { %v4022_v2 = vpop.eup %4021  ;;  %v1019_v56 = vmul.f32 %v4020_v13, %v4717_v1  ;;  %v817_v20 = vpop.xlane.xlu2 %816  ;;  %v998_v29 = vsel %vm997_vm10, %v4018_v32, %v994_v12  ;;  %vm1024_vm2 = vweird.f32 %v4020_v13 }
 0x388   : > { %v823_v25 = vpop.xlane.xlu1 %822  ;;  %v1005_v31 = vmul.f32 %v4022_v2, %v892_v6  ;;  %v837_v34 = vsub.f32 %v4670_v48, %v817_v20  ;;  %v1003_v35 = vsel %vm1000_vm11, %v1002_v17, %v998_v29  ;;  %vm1010_vm12 = vweird.f32 %v4022_v2  ;;  %vm1025_vm4 = vmor %vm1023_vm3, %vm1024_vm2 }
 0x389   : > { %v839_v28 = vsub.f32 %v4672_v59, %v823_v25  ;;  %v1020_v37 = vsub.f32 1.0, %v1019_v56  ;;  %v1149_v7 = vmul.f32 %v4656_v44, %v1003_v35  ;;  %vm1011_vm14 = vmor %vm1009_vm13, %vm1010_vm12 }
 0x38a   : > { %v1006_v41 = vsub.f32 1.0, %v1005_v31  ;;  %v866_v8 = vmul.f32 1.442695, %v837_v34 }
 0x38b   : > { %v870_v38 = vmul.f32 1.442695, %v839_v28  ;;  %3691 = vmatmul.msk.f32.gmra.mxu0 %vm456_vm1, %v1149_v7  ;;  %v1021_v60 = vmul.f32 %v4020_v13, %v1020_v37 }
 0x38c   : > { %v1007_v39 = vmul.f32 %v4022_v2, %v1006_v41  ;;  %4023 = vpow2.f32 %v866_v8 }
 0x38d   : > { %4025 = vpow2.f32 %v870_v38  ;;  %v1022_v14 = vadd.f32 %v4020_v13, %v1021_v60 }
 0x38e   : > { %v1008_v45 = vadd.f32 %v4022_v2, %v1007_v39 }
 0x38f   : > { %v898_v48 = vpop.xlane.xlu2 %897  ;;  %v901_v59 = vpop.xlane.xlu0 %900  ;;  %v1026_v57 = vsel %vm1025_vm4, %v4020_v13, %v1022_v14 }
 0x390   : > { %4027 = vrcp.f32 %v898_v48  ;;  %v1012_v44 = vsel %vm1011_vm14, %v4022_v2, %v1008_v45  ;;  %v1031_v32 = vsel %vm1028_vm5, %v1030_v58, %v1026_v57  ;;  %v1043_v6 = vand.u32 2147483648, %v898_v48 }
 0x391   : > { %4029 = vrcp.f32 %v901_v59  ;;  %v1017_v23 = vsel %vm1014_vm15, %v1016_v46, %v1012_v44  ;;  %v1151_v61 = vmul.f32 %v4663_v54, %v1031_v32  ;;  %v1041_v36 = vand.u32 2147483647, %v898_v48 }
 0x392   : > { %v4725_v49 = vpop.eup %4023  ;;  %v1150_v43 = vmul.f32 %v4661_v50, %v1017_v23  ;;  %vm1037_vm7 = vweird.f32 %v898_v48  ;;  %v1044_v13 = vor.u32 1.1754944e-38, %v1043_v6  ;;  %v1057_v25 = vand.u32 2147483648, %v901_v59 }
 0x393   : > { %v4728_v55 = vpop.eup %4025  ;;  %v911_v30 = vsel %vm456_vm1, %v4725_v49, 0.0  ;;  %vm1042_vm9 = vcmp.eq.f32.partialorder %v1041_v36, 8.507059e+37  ;;  %vm1051_vm11 = vweird.f32 %v901_v59  ;;  %v1055_v54 = vand.u32 2147483647, %v901_v59 }
 0x394   : > { %912 = vadd.xlane.f32.xlu2 %v911_v30  ;;  %v917_v4 = vsel %vm456_vm1, %v4728_v55, 0.0  ;;  %3692 = vmatmul.msk.f32.gmra.mxu0 %vm456_vm1, %v1150_v43  ;;  %v1058_v34 = vor.u32 1.1754944e-38, %v1057_v25 }
 0x395   : > { %918 = vadd.xlane.f32.xlu0 %v917_v4  ;;  %vm1056_vm13 = vcmp.eq.f32.partialorder %v1055_v54, 8.507059e+37 }
 0x396   : > { %v4028_v24 = vpop.eup %4027 }
 0x397   : > { %v4030_v53 = vpop.eup %4029  ;;  %v1033_v51 = vmul.f32 %v4028_v24, %v898_v48  ;;  %vm1038_vm6 = vweird.f32 %v4028_v24 }
 0x398   : > { %v1047_v50 = vmul.f32 %v4030_v53, %v901_v59  ;;  %vm1039_vm8 = vmor %vm1037_vm7, %vm1038_vm6  ;;  %vm1052_vm10 = vweird.f32 %v4030_v53 }
 0x399   : > { %v1034_v0 = vsub.f32 1.0, %v1033_v51  ;;  %vm1053_vm12 = vmor %vm1051_vm11, %vm1052_vm10 }
 0x39a   : > { %v1048_v18 = vsub.f32 1.0, %v1047_v50 }
 0x39b   : > { %v1035_v1 = vmul.f32 %v4028_v24, %v1034_v0 }
 0x39c   : > { %v1049_v9 = vmul.f32 %v4030_v53, %v1048_v18  ;;  %3693 = vmatmul.msk.f32.gmra.mxu0 %vm456_vm1, %v1151_v61 }
 0x39d   : > { %v1036_v12 = vadd.f32 %v4028_v24, %v1035_v1 }
 0x39e   : > { %v1050_v20 = vadd.f32 %v4030_v53, %v1049_v9 }
 0x39f   : > { %v1040_v17 = vsel %vm1039_vm8, %v4028_v24, %v1036_v12 }
 0x3a0   : > { %v1045_v2 = vsel %vm1042_vm9, %v1044_v13, %v1040_v17  ;;  %v1054_v31 = vsel %vm1053_vm12, %v4030_v53, %v1050_v20 }
 0x3a1   : > { %v1152_v56 = vmul.f32 %v4679_v3, %v1045_v2  ;;  %v1059_v28 = vsel %vm1056_vm13, %v1058_v34, %v1054_v31 }
 0x3a2   : > { %v904_v29 = vpop.xlane.xlu2 %903  ;;  %v1153_v7 = vmul.f32 %v4681_v5, %v1059_v28 }
 0x3a3   : > { %4031 = vrcp.f32 %v904_v29  ;;  %v1071_v3 = vand.u32 2147483648, %v904_v29  ;;  %v1069_v38 = vand.u32 2147483647, %v904_v29  ;;  %vm1065_vm15 = vweird.f32 %v904_v29 }
 0x3a4   : > { %3694 = vmatmul.msk.f32.gmra.mxu0 %vm456_vm1, %v1152_v56 }
 0x3a5   : > { %v1072_v40 = vor.u32 1.1754944e-38, %v1071_v3  ;;  %vm1070_vm3 = vcmp.eq.f32.partialorder %v1069_v38, 8.507059e+37 }
 0x3a9   : > { %v4032_v35 = vpop.eup %4031 }
 0x3aa   : > { %v1061_v37 = vmul.f32 %v4032_v35, %v904_v29  ;;  %vm1066_vm14 = vweird.f32 %v4032_v35 }
 0x3ab   : > { %vm1067_vm2 = vmor %vm1065_vm15, %vm1066_vm14 }
 0x3ac   : > { %v1062_v41 = vsub.f32 1.0, %v1061_v37  ;;  %3695 = vmatmul.msk.f32.gmra.mxu0 %vm456_vm1, %v1153_v7 }
 0x3ae   : > { %v1063_v8 = vmul.f32 %v4032_v35, %v1062_v41 }
 0x3b0   : > { %v1064_v39 = vadd.f32 %v4032_v35, %v1063_v8 }
 0x3b2   : > { %v1068_v42 = vsel %vm1067_vm2, %v4032_v35, %v1064_v39 }
 0x3b3   : > { %v1073_v60 = vsel %vm1070_vm3, %v1072_v40, %v1068_v42 }
 0x3b4   : > { %v1154_v45 = vmul.f32 %v4688_v19, %v1073_v60 }
 0x3b6   : > { %3696 = vmatmul.msk.f32.gmra.mxu0 %vm456_vm1, %v1154_v45 }
 0x3d8   : > { %v1237_v60 = vpop.f32.mrf.mxu0 }
 0x3e7   : > { %v907_v48 = vpop.xlane.xlu1 %906 }
 0x3e8   : > { %4033 = vrcp.f32 %v907_v48  ;;  %v1085_v14 = vand.u32 2147483648, %v907_v48  ;;  %v1083_v23 = vand.u32 2147483647, %v907_v48  ;;  %vm1079_vm5 = vweird.f32 %v907_v48 }
 0x3ea   : > { %v1086_v33 = vor.u32 1.1754944e-38, %v1085_v14  ;;  %vm1084_vm7 = vcmp.eq.f32.partialorder %v1083_v23, 8.507059e+37 }
 0x3ee   : > { %v4034_v5 = vpop.eup %4033 }
 0x3ef   : > { %v1075_v59 = vmul.f32 %v4034_v5, %v907_v48  ;;  %v910_v46 = vpop.xlane.xlu0 %909  ;;  %vm1080_vm4 = vweird.f32 %v4034_v5 }
 0x3f0   : > { %4035 = vrcp.f32 %v910_v46  ;;  %vm1081_vm6 = vmor %vm1079_vm5, %vm1080_vm4  ;;  %v1099_v53 = vand.u32 2147483648, %v910_v46  ;;  %v1097_v50 = vand.u32 2147483647, %v910_v46  ;;  %vm1093_vm9 = vweird.f32 %v910_v46  ;;  %v916_v6 = vpop.xlane.xlu1 %915 }
 0x3f1   : > { %v1076_v44 = vsub.f32 1.0, %v1075_v59  ;;  %4037 = vrcp.f32 %v916_v6  ;;  %v1127_v41 = vand.u32 2147483648, %v916_v6  ;;  %vm1121_vm3 = vweird.f32 %v916_v6 }
 0x3f2   : > { %v1100_v0 = vor.u32 1.1754944e-38, %v1099_v53  ;;  %vm1098_vm11 = vcmp.eq.f32.partialorder %v1097_v50, 8.507059e+37  ;;  %v1125_v38 = vand.u32 2147483647, %v916_v6  ;;  %v3866_v53 = vld [vmem:[#allocation4 + $0x20] sm:$0xff] }
 0x3f3   : > { %v1077_v52 = vmul.f32 %v4034_v5, %v1076_v44  ;;  %v1128_v42 = vor.u32 1.1754944e-38, %v1127_v41  ;;  %v361_v41 = vld [vmem:[#allocation2 + $0x138] sm:$0xff] }
 0x3f4   : > { %vm1126_vm5 = vcmp.eq.f32.partialorder %v1125_v38, 8.507059e+37  ;;  %v357_v38 = vld [vmem:[#allocation2 + $0x118] sm:$0xff] }
 0x3f5   : > { %v1078_v43 = vadd.f32 %v4034_v5, %v1077_v52  ;;  %v1240_v52 = vpop.f32.mrf.mxu0 }
 0x3f6   : > { %v4036_v30 = vpop.eup %4035 }
 0x3f7   : > { %v1089_v4 = vmul.f32 %v4036_v30, %v910_v46  ;;  %v1082_v19 = vsel %vm1081_vm6, %v4034_v5, %v1078_v43  ;;  %vm1094_vm8 = vweird.f32 %v4036_v30 }
 0x3f8   : > { %v1087_v57 = vsel %vm1084_vm7, %v1086_v33, %v1082_v19  ;;  %vm1095_vm10 = vmor %vm1093_vm9, %vm1094_vm8 }
 0x3f9   : > { %v1090_v24 = vsub.f32 1.0, %v1089_v4  ;;  %v1155_v58 = vmul.f32 %v4702_v47, %v1087_v57  ;;  %v4038_v47 = vpop.eup %4037 }
 0x3fa   : > { %v1117_v12 = vmul.f32 %v4038_v47, %v916_v6  ;;  %vm1122_vm15 = vweird.f32 %v4038_v47 }
 0x3fb   : > { %v1091_v51 = vmul.f32 %v4036_v30, %v1090_v24  ;;  %3697 = vmatmul.msk.f32.gmra.mxu0 %vm456_vm1, %v1155_v58  ;;  %vm1123_vm4 = vmor %vm1121_vm3, %vm1122_vm15  ;;  %v3867_v58 = vld [vmem:[#allocation4 + $0x28] sm:$0xff] }
 0x3fc   : > { %v1118_v17 = vsub.f32 1.0, %v1117_v12  ;;  %1345 = vmatpush.bf16.msrb.mxu1 %v3867_v58 }
 0x3fd   : > { %v1092_v32 = vadd.f32 %v4036_v30, %v1091_v51  ;;  %v1243_v43 = vpop.f32.mrf.mxu0 }
 0x3fe   : > { %v1119_v25 = vmul.f32 %v4038_v47, %v1118_v17 }
 0x3ff   : > { %v1096_v18 = vsel %vm1095_vm10, %v4036_v30, %v1092_v32  ;;  %v358_v32 = vld [vmem:[#allocation2 + $0x120] sm:$0xff] }
 0x400   : > { %v1101_v1 = vsel %vm1098_vm11, %v1100_v0, %v1096_v18  ;;  %v1120_v7 = vadd.f32 %v4038_v47, %v1119_v25  ;;  %1346 = vmatpush.bf16.msrb.mxu1 %v3866_v53  ;;  %v359_v0 = vld [vmem:[#allocation2 + $0x128] sm:$0xff] }
 0x401   : > { %v1156_v61 = vmul.f32 %v4708_v62, %v1101_v1  ;;  %v355_v18 = vld [vmem:[#allocation2 + $0x108] sm:$0xff]  ;;  %v362_v1 = vld [vmem:[#allocation2 + $0x140] sm:$0xff] }
 0x402   : > { %v1124_v40 = vsel %vm1123_vm4, %v4038_v47, %v1120_v7  ;;  %v360_v7 = vld [vmem:[#allocation2 + $0x130] sm:$0xff] }
 0x403   : > { %3698 = vmatmul.msk.f32.gmra.mxu0 %vm456_vm1, %v1156_v61  ;;  %v1129_v45 = vsel %vm1126_vm5, %v1128_v42, %v1124_v40  ;;  %v363_v61 = vld [vmem:[#allocation2 + $0x148] sm:$0xff]  ;;  %v365_v40 = vld [vmem:[#allocation2 + $0x158] sm:$0xff] }
 0x404   : > { %v1158_v59 = vmul.f32 %v4710_v63, %v1129_v45  ;;  %v368_v45 = vld [vmem:[#allocation2 + $0x170] sm:$0xff] }
 0x405   : > { %v1246_v30 = vpop.f32.mrf.mxu0 }
 0x407   : > { %v913_v36 = vpop.xlane.xlu2 %912 }
 0x408   : > { %4039 = vrcp.f32 %v913_v36  ;;  %v919_v9 = vpop.xlane.xlu0 %918  ;;  %v1113_v29 = vand.u32 2147483648, %v913_v36  ;;  %v1111_v34 = vand.u32 2147483647, %v913_v36  ;;  %vm1107_vm13 = vweird.f32 %v913_v36 }
 0x409   : > { %4041 = vrcp.f32 %v919_v9  ;;  %v1141_v5 = vand.u32 2147483648, %v919_v9  ;;  %vm1135_vm7 = vweird.f32 %v919_v9  ;;  %v1139_v46 = vand.u32 2147483647, %v919_v9 }
 0x40a   : > { %v1114_v28 = vor.u32 1.1754944e-38, %v1113_v29  ;;  %vm1112_vm2 = vcmp.eq.f32.partialorder %v1111_v34, 8.507059e+37 }
 0x40b   : > { %v1142_v44 = vor.u32 1.1754944e-38, %v1141_v5  ;;  %vm1140_vm9 = vcmp.eq.f32.partialorder %v1139_v46, 8.507059e+37  ;;  %v1288_v5 = vmul.f32 %v1246_v30, %v357_v38 }
 0x40d   : > { %v1249_v33 = vpop.f32.mrf.mxu0 }
 0x40e   : > { %v4040_v13 = vpop.eup %4039  ;;  %v1289_v47 = vmul.f32 %v1249_v33, %v358_v32 }
 0x40f   : > { %v1103_v2 = vmul.f32 %v4040_v13, %v913_v36  ;;  %v4042_v56 = vpop.eup %4041  ;;  %vm1108_vm12 = vweird.f32 %v4040_v13 }
 0x410   : > { %v1131_v31 = vmul.f32 %v4042_v56, %v919_v9  ;;  %vm1109_vm14 = vmor %vm1107_vm13, %vm1108_vm12  ;;  %vm1136_vm6 = vweird.f32 %v4042_v56  ;;  %v366_v9 = vld [vmem:[#allocation2 + $0x160] sm:$0xff] }
 0x411   : > { %v1104_v20 = vsub.f32 1.0, %v1103_v2  ;;  %vm1137_vm8 = vmor %vm1135_vm7, %vm1136_vm6 }
 0x412   : > { %v1132_v35 = vsub.f32 1.0, %v1131_v31 }
 0x413   : > { %v1105_v54 = vmul.f32 %v4040_v13, %v1104_v20 }
 0x414   : > { %v1133_v39 = vmul.f32 %v4042_v56, %v1132_v35 }
 0x415   : > { %v1106_v62 = vadd.f32 %v4040_v13, %v1105_v54  ;;  %v1252_v4 = vpop.f32.mrf.mxu0 }
 0x416   : > { %v1134_v48 = vadd.f32 %v4042_v56, %v1133_v39  ;;  %v1290_v36 = vmul.f32 %v1252_v4, %v359_v0  ;;  %v364_v39 = vld [vmem:[#allocation2 + $0x150] sm:$0xff] }
 0x417   : > { %v1110_v37 = vsel %vm1109_vm14, %v4040_v13, %v1106_v62  ;;  %v1286_v13 = vmul.f32 %v1240_v52, %v355_v18 }
 0x418   : > { %v1115_v3 = vsel %vm1112_vm2, %v1114_v28, %v1110_v37 }
 0x419   : > { %v1157_v8 = vmul.f32 %v4725_v49, %v1115_v3  ;;  %v1138_v49 = vsel %vm1137_vm8, %v4042_v56, %v1134_v48  ;;  %v367_v56 = vld [vmem:[#allocation2 + $0x168] sm:$0xff]  ;;  %v1302_v25 = vadd.f32 %v1290_v36, %v1286_v13 }
 0x41a   : > { %v1143_v14 = vsel %vm1140_vm9, %v1142_v44, %v1138_v49  ;;  %v369_v49 = vld [vmem:[#allocation2 + $0x178] sm:$0xff] }
 0x41b   : > { %3699 = vmatmul.msk.f32.gmra.mxu0 %vm456_vm1, %v1157_v8  ;;  %v1159_v23 = vmul.f32 %v4728_v55, %v1143_v14  ;;  %v354_v55 = vld [vmem:[#allocation2 + $0x100] sm:$0xff]  ;;  %v356_v8 = vld [vmem:[#allocation2 + $0x110] sm:$0xff] }
 0x41c   : > { %v1285_v12 = vmul.f32 %v1237_v60, %v354_v55  ;;  %v1287_v48 = vmul.f32 %v1243_v43, %v356_v8  ;;  %v3712_v55 = vmul.f32 -1.442695, %v4505_v21  ;;  %v3714_v21 = vmul.f32 -1.442695, %v4515_v26 }
 0x41d   : > { %v1255_v19 = vpop.f32.mrf.mxu0 }
 0x41e   : > { %v1301_v20 = vadd.f32 %v1289_v47, %v1285_v12  ;;  %v1291_v42 = vmul.f32 %v1255_v19, %v360_v7  ;;  %v3956_v19 = vld [vmem:[#allocation6 + $0x10] ss:$0 sm:$0xff]  ;;  %4043 = vpow2.f32 %v3712_v55  ;;  %v3715_v47 = vmul.f32 -1.442695, %v4517_v27 }
 0x41f   : > { %v3713_v12 = vmul.f32 -1.442695, %v4507_v22 }
 0x420   : > { %v1303_v44 = vadd.f32 %v1291_v42, %v1287_v48 }
 0x423   : > { %3700 = vmatmul.msk.f32.gmra.mxu0 %vm456_vm1, %v1158_v59 }
 0x424   : > { %v4044_v18 = vpop.eup %4043 }
 0x425   : > { %v1258_v57 = vpop.f32.mrf.mxu0 }
 0x426   : > { %v1292_v60 = vmul.f32 %v1258_v57, %v361_v41 }
 0x428   : > { %v1304_v14 = vadd.f32 %v1292_v60, %v1288_v5 }
 0x42b   : > { %3701 = vmatmul.msk.f32.gmra.mxu0 %vm456_vm1, %v1159_v23 }
 0x42d   : > { %v1261_v63 = vpop.f32.mrf.mxu0 }
 0x42e   : > { %v1293_v17 = vmul.f32 %v1261_v63, %v362_v1  ;;  %v1370_v1 = vadd.f32 1.0, %v4044_v18 }
 0x430   : > { %v1305_v31 = vadd.f32 %v1301_v20, %v1293_v17  ;;  %4045 = vrcp.f32 %v1370_v1  ;;  %v1385_v20 = vand.u32 2147483648, %v1370_v1  ;;  %vm1379_vm11 = vweird.f32 %v1370_v1 }
 0x431   : > { %4047 = vpow2.f32 %v3715_v47 }
 0x432   : > { %4049 = vpow2.f32 %v3713_v12 }
 0x435   : > { %v1264_v24 = vpop.f32.mrf.mxu0 }
 0x436   : > { %v1294_v2 = vmul.f32 %v1264_v24, %v363_v61  ;;  %v4046_v61 = vpop.eup %4045 }
 0x437   : > { %v1375_v36 = vmul.f32 %v4046_v61, %v1370_v1  ;;  %v4048_v13 = vpop.eup %4047  ;;  %vm1380_vm10 = vweird.f32 %v4046_v61 }
 0x438   : > { %v1306_v34 = vadd.f32 %v1302_v25, %v1294_v2  ;;  %v1373_v2 = vadd.f32 1.0, %v4048_v13  ;;  %v1383_v25 = vand.u32 2147483647, %v1370_v1  ;;  %vm1381_vm12 = vmor %vm1379_vm11, %vm1380_vm10 }
 0x43a   : > { %4051 = vrcp.f32 %v1373_v2  ;;  %vm1384_vm13 = vcmp.eq.f32.partialorder %v1383_v25, 8.507059e+37  ;;  %v1430_v42 = vand.u32 2147483648, %v1373_v2  ;;  %vm1424_vm15 = vweird.f32 %v1373_v2 }
 0x43b   : > { %4053 = vpow2.f32 %v3714_v21  ;;  %v1428_v60 = vand.u32 2147483647, %v1373_v2 }
 0x43d   : > { %v1267_v51 = vpop.f32.mrf.mxu0  ;;  %vm1429_vm3 = vcmp.eq.f32.partialorder %v1428_v60, 8.507059e+37 }
 0x43e   : > { %v1295_v59 = vmul.f32 %v1267_v51, %v364_v39 }
 0x440   : > { %v1307_v33 = vadd.f32 %v1303_v44, %v1295_v59  ;;  %v1431_v59 = vor.u32 1.1754944e-38, %v1430_v42 }
 0x478   : > { %v1270_v50 = vpop.f32.mrf.mxu0 }
 0x479   : > { %v1296_v46 = vmul.f32 %v1270_v50, %v365_v40 }
 0x47b   : > { %v1308_v4 = vadd.f32 %v1304_v14, %v1296_v46 }
 0x480   : > { %v1273_v6 = vpop.f32.mrf.mxu0 }
 0x481   : > { %v1297_v29 = vmul.f32 %v1273_v6, %v366_v9  ;;  %v1376_v9 = vsub.f32 1.0, %v1375_v36 }
 0x483   : > { %v1309_v28 = vadd.f32 %v1305_v31, %v1297_v29  ;;  %v1377_v17 = vmul.f32 %v4046_v61, %v1376_v9  ;;  %v4050_v29 = vpop.eup %4049 }
 0x484   : > { %v1371_v31 = vadd.f32 1.0, %v4050_v29 }
 0x486   : > { %4055 = vrcp.f32 %v1371_v31  ;;  %vm1394_vm5 = vweird.f32 %v1371_v31 }
 0x498   : > { %v1276_v54 = vpop.f32.mrf.mxu0 }
 0x499   : > { %v1298_v62 = vmul.f32 %v1276_v54, %v367_v56  ;;  %v1378_v56 = vadd.f32 %v4046_v61, %v1377_v17  ;;  %v1386_v54 = vor.u32 1.1754944e-38, %v1385_v20 }
 0x49b   : > { %v1310_v35 = vadd.f32 %v1306_v34, %v1298_v62  ;;  %v1382_v27 = vsel %vm1381_vm12, %v4046_v61, %v1378_v56  ;;  %v4391_v56 = vmov 32.0  }
 0x49c   : > { %v1387_v22 = vsel %vm1384_vm13, %v1386_v54, %v1382_v27 }
 0x49d   : > { %v1318_v37 = vpack.c.bf16 %v1310_v35, %v1309_v28  ;;  %v4052_v28 = vpop.eup %4051 }
 0x49e   : > { %v4054_v35 = vpop.eup %4053  ;;  %v1420_v26 = vmul.f32 %v4052_v28, %v1373_v2  ;;  %vm1425_vm14 = vweird.f32 %v4052_v28 }
 0x49f   : > { %3710 = vmatmul.msk.bf16.vlgmr.msrb.gmra.mxu1 %vm456_vm1, %v1318_v37  ;;  %v1372_v37 = vadd.f32 1.0, %v4054_v35  ;;  %v4056_v41 = vpop.eup %4055  ;;  %vm1426_vm2 = vmor %vm1424_vm15, %vm1425_vm14 }
 0x4a0   : > { %v1279_v3 = vpop.f32.mrf.mxu0  ;;  %v1421_v7 = vsub.f32 1.0, %v1420_v26  ;;  %v1390_v8 = vmul.f32 %v4056_v41, %v1371_v31  ;;  %vm1395_vm4 = vweird.f32 %v4056_v41 }
 0x4a1   : > { %v1299_v52 = vmul.f32 %v1279_v3, %v368_v45  ;;  %4057 = vrcp.f32 %v1372_v37  ;;  %vm1396_vm6 = vmor %vm1394_vm5, %vm1395_vm4  ;;  %vm1409_vm9 = vweird.f32 %v1372_v37 }
 0x4a2   : > { %v1422_v3 = vmul.f32 %v4052_v28, %v1421_v7  ;;  %v1391_v39 = vsub.f32 1.0, %v1390_v8  ;;  %4059 = vrcp.f32 %v4391_v56 }
 0x4a3   : > { %v1311_v24 = vadd.f32 %v1307_v33, %v1299_v52  ;;  %v1398_v33 = vand.u32 2147483647, %v1371_v31 }
 0x4a4   : > { %v1423_v38 = vadd.f32 %v4052_v28, %v1422_v3  ;;  %v1392_v48 = vmul.f32 %v4056_v41, %v1391_v39 }
 0x4a5   : > { %vm1399_vm7 = vcmp.eq.f32.partialorder %v1398_v33, 8.507059e+37 }
 0x4a6   : > { %v1427_v45 = vsel %vm1426_vm2, %v4052_v28, %v1423_v38  ;;  %v1393_v14 = vadd.f32 %v4056_v41, %v1392_v48 }
 0x4a7   : > { %v4058_v40 = vpop.eup %4057  ;;  %v1432_v46 = vsel %vm1429_vm3, %v1431_v59, %v1427_v45 }
 0x4a8   : > { %v1282_v23 = vpop.f32.mrf.mxu0  ;;  %v1405_v5 = vmul.f32 %v4058_v40, %v1372_v37  ;;  %vm1410_vm8 = vweird.f32 %v4058_v40  ;;  %v4060_v20 = vpop.eup %4059 }
 0x4a9   : > { %v1300_v63 = vmul.f32 %v1282_v23, %v369_v49  ;;  %v1400_v23 = vand.u32 2147483648, %v1371_v31  ;;  %vm1411_vm10 = vmor %vm1409_vm9, %vm1410_vm8  ;;  %v1489_v21 = vmul.f32 32.0, %v4060_v20  ;;  %vm1493_vm12 = vweird.f32 %v4060_v20 }
 0x4aa   : > { %v1406_v52 = vsub.f32 1.0, %v1405_v5 }
 0x4ab   : > { %v1312_v58 = vadd.f32 %v1308_v4, %v1300_v63  ;;  %v1397_v4 = vsel %vm1396_vm6, %v4056_v41, %v1393_v14  ;;  %v3869_v14 = vld [vmem:[#allocation4 + $0x18] sm:$0xff] }
 0x4ac   : > { %v1407_v63 = vmul.f32 %v4058_v40, %v1406_v52  ;;  %1613 = vmatpush.bf16.msra.mxu1 %v3869_v14 }
 0x4ad   : > { %v1319_v53 = vpack.c.bf16 %v1312_v58, %v1311_v24  ;;  %v1401_v24 = vor.u32 1.1754944e-38, %v1400_v23  ;;  %v3868_v23 = vld [vmem:[#allocation4 + $0x10] sm:$0xff] }
 0x4af   : > { %3711 = vmatmul.msk.bf16.gmra.mxu1 %vm456_vm1, %v1319_v53  ;;  %v1402_v58 = vsel %vm1399_vm7, %v1401_v24, %v1397_v4 }
 0x4b0   : > { %1614 = vmatpush.bf16.msra.mxu1 %v3868_v23 }
 0x51c   : > { %v1348_v57 = vpop.f32.mrf.mxu1 }
 0x51d   : > { %v1349_v32 = vadd.f32 %v3956_v19, %v1348_v57  ;;  %v1408_v57 = vadd.f32 %v4058_v40, %v1407_v63 }
 0x51f   : > { %1438 = vrot.lane.b32.xlu2 %v1349_v32, %s4388_s7  ;;  %v1415_v32 = vand.u32 2147483648, %v1372_v37 }
 0x524   : > { %v1350_v43 = vpop.f32.mrf.mxu1 }
 0x525   : > { %v1351_v30 = vadd.f32 %v3956_v19, %v1350_v43  ;;  %v1413_v43 = vand.u32 2147483647, %v1372_v37 }
 0x527   : > { %1440 = vrot.lane.b32.xlu1 %v1351_v30, %s4388_s7  ;;  %v1412_v30 = vsel %vm1411_vm10, %v4058_v40, %v1408_v57  ;;  %vm1414_vm11 = vcmp.eq.f32.partialorder %v1413_v43, 8.507059e+37 }
 0x52c   : > { %v1353_v51 = vpop.f32.mrf.mxu1 }
 0x52d   : > { %v1354_v50 = vadd.f32 %v3956_v19, %v1353_v51  ;;  %v1416_v51 = vor.u32 1.1754944e-38, %v1415_v32 }
 0x52f   : > { %1442 = vrot.lane.b32.xlu0 %v1354_v50, %s4388_s7  ;;  %v1417_v50 = vsel %vm1414_vm11, %v1416_v51, %v1412_v30 }
 0x534   : > { %v1355_v0 = vpop.f32.mrf.mxu1 }
 0x535   : > { %v1356_v6 = vadd.f32 %v3956_v19, %v1355_v0 }
 0x537   : > { %1444 = vrot.lane.b32.xlu2 %v1356_v6, %s4388_s7 }
 0x579   : > { %v1439_v34 = vpop.permute.xlu2 %1438 }
 0x57a   : > { %v1450_v62 = vmul.f32 %v1439_v34, %v1387_v22 }
 0x57c   : > { %1458 = vrot.lane.b32.xlu0 %v1450_v62, %s4390_s9 }
 0x591   : > { %v1445_v49 = vpop.permute.xlu2 %1444 }
 0x592   : > { %v1453_v44 = vmul.f32 %v1445_v49, %v1432_v46 }
 0x594   : > { %1464 = vrot.lane.b32.xlu0 %v1453_v44, %s4390_s9 }
 0x599   : > { %v1441_v53 = vpop.permute.xlu1 %1440 }
 0x59a   : > { %v1451_v19 = vmul.f32 %v1441_v53, %v1402_v58 }
 0x59c   : > { %1460 = vrot.lane.b32.xlu1 %v1451_v19, %s4390_s9 }
 0x5a1   : > { %v1443_v0 = vpop.permute.xlu0 %1442 }
 0x5a2   : > { %v1452_v6 = vmul.f32 %v1443_v0, %v1417_v50 }
 0x5a4   : > { %1462 = vrot.lane.b32.xlu2 %v1452_v6, %s4390_s9 }
 0x5ee   : > { %v1459_v55 = vpop.permute.xlu0 %1458 }
 0x5ef   : > { %v1470_v18 = vadd.f32 %v1459_v55, %v4491_v10 }
 0x5f1   : > { %v1476_v1 = vsel %vm456_vm1, %v1470_v18, 0.0 }
 0x5f2   : > { %1477 = vadd.xlane.f32.xlu1 %v1476_v1 }
 0x5fe   : > { %v1463_v61 = vpop.permute.xlu2 %1462 }
 0x5ff   : > { %v1472_v47 = vadd.f32 %v1463_v61, %v4498_v15  ;;  %v1490_v15 = vsub.f32 1.0, %v1489_v21  ;;  %v3958_v21 = vld [vmem:[#allocation6 + $0x28] ss:$0 sm:$0xff] }
 0x601   : > { %v1482_v36 = vsel %vm456_vm1, %v1472_v47, 0.0  ;;  %v1491_v25 = vmul.f32 %v4060_v20, %v1490_v15 }
 0x602   : > { %1483 = vadd.xlane.f32.xlu0 %v1482_v36 }
 0x603   : > { %v1492_v29 = vadd.f32 %v4060_v20, %v1491_v25 }
 0x605   : > { %v4778_v27 = vsel %vm1493_vm12, %v4060_v20, %v1492_v29 }
 0x606   : > { %v1465_v9 = vpop.permute.xlu0 %1464 }
 0x607   : > { %v1473_v12 = vadd.f32 %v1465_v9, %v4500_v16 }
 0x609   : > { %v1485_v13 = vsel %vm456_vm1, %v1473_v12, 0.0 }
 0x60a   : > { %1486 = vadd.xlane.f32.xlu1 %v1485_v13  ;;  %v3957_v13 = vld [vmem:[#allocation6 + $0x20] ss:$0 sm:$0xff] }
 0x60e   : > { %v1461_v17 = vpop.permute.xlu1 %1460 }
 0x60f   : > { %v1471_v2 = vadd.f32 %v1461_v17, %v4493_v11 }
 0x611   : > { %v1479_v10 = vsel %vm456_vm1, %v1471_v2, 0.0 }
 0x612   : > { %1480 = vadd.xlane.f32.xlu2 %v1479_v10 }
 0x665   : > { %v1478_v16 = vpop.xlane.xlu1 %1477 }
 0x666   : > { %v1495_v54 = vmul.f32 %v4778_v27, %v1478_v16 }
 0x668   : > { %v4781_v31 = vsub.f32 %v1470_v18, %v1495_v54 }
 0x66a   : > { %v1503_v11 = vmul.f32 %v4781_v31, %v4781_v31 }
 0x66c   : > { %v1507_v22 = vsel %vm456_vm1, %v1503_v11, 0.0 }
 0x66d   : > { %1508 = vadd.xlane.f32.xlu2 %v1507_v22 }
 0x675   : > { %v1484_v34 = vpop.xlane.xlu0 %1483 }
 0x676   : > { %v1497_v62 = vmul.f32 %v4778_v27, %v1484_v34 }
 0x678   : > { %v4787_v28 = vsub.f32 %v1472_v47, %v1497_v62 }
 0x67a   : > { %v1505_v35 = vmul.f32 %v4787_v28, %v4787_v28 }
 0x67c   : > { %v1513_v26 = vsel %vm456_vm1, %v1505_v35, 0.0 }
 0x67d   : > { %1514 = vadd.xlane.f32.xlu1 %v1513_v26  ;;  %v1487_v37 = vpop.xlane.xlu1 %1486 }
 0x67e   : > { %v1498_v7 = vmul.f32 %v4778_v27, %v1487_v37 }
 0x680   : > { %v4793_v41 = vsub.f32 %v1473_v12, %v1498_v7 }
 0x682   : > { %v1506_v3 = vmul.f32 %v4793_v41, %v4793_v41 }
 0x684   : > { %v1516_v8 = vsel %vm456_vm1, %v1506_v3, 0.0 }
 0x685   : > { %v1481_v38 = vpop.xlane.xlu2 %1480  ;;  %1517 = vadd.xlane.f32.xlu2 %v1516_v8 }
 0x686   : > { %v1496_v39 = vmul.f32 %v4778_v27, %v1481_v38 }
 0x688   : > { %v1500_v40 = vsub.f32 %v1471_v2, %v1496_v39 }
 0x68a   : > { %v1504_v42 = vmul.f32 %v1500_v40, %v1500_v40 }
 0x68c   : > { %v1510_v60 = vsel %vm456_vm1, %v1504_v42, 0.0 }
 0x68d   : > { %1511 = vadd.xlane.f32.xlu0 %v1510_v60 }
 0x6e0   : > { %v1509_v45 = vpop.xlane.xlu2 %1508 }
 0x6e1   : > { %v1519_v48 = vmul.f32 %v1509_v45, %v4778_v27 }
 0x6e3   : > { %v1523_v5 = vadd.f32 1e-06, %v1519_v48 }
 0x6e5   : > { %4061 = vrsqrt.f32 %v1523_v5  ;;  %vm1533_vm14 = vweird.f32 %v1523_v5 }
 0x6eb   : > { %v4062_v49 = vpop.eup %4061 }
 0x6ec   : > { %v1528_v33 = vmul.f32 %v4062_v49, %v1523_v5  ;;  %vm1534_vm13 = vweird.f32 %v4062_v49 }
 0x6ed   : > { %vm1535_vm15 = vmor %vm1533_vm14, %vm1534_vm13 }
 0x6ee   : > { %v1529_v24 = vmul.f32 %v4062_v49, %v1528_v33 }
 0x6f0   : > { %v1515_v59 = vpop.xlane.xlu1 %1514  ;;  %v1530_v57 = vmul.f32 0.5, %v1529_v24 }
 0x6f1   : > { %v1521_v52 = vmul.f32 %v1515_v59, %v4778_v27 }
 0x6f2   : > { %v1531_v43 = vsub.f32 1.5, %v1530_v57 }
 0x6f3   : > { %v1525_v63 = vadd.f32 1e-06, %v1521_v52 }
 0x6f4   : > { %v1532_v0 = vmul.f32 %v4062_v49, %v1531_v43 }
 0x6f5   : > { %vm1553_vm9 = vweird.f32 %v1525_v63 }
 0x6f6   : > { %v1536_v61 = vsel %vm1535_vm15, %v4062_v49, %v1532_v0 }
 0x6f7   : > { %v1567_v17 = vmul.f32 %v1536_v61, %v4781_v31 }
 0x6f8   : > { %v1518_v46 = vpop.xlane.xlu2 %1517 }
 0x6f9   : > { %v1522_v44 = vmul.f32 %v1518_v46, %v4778_v27  ;;  %v1572_v15 = vmul.f32 %v3957_v13, %v1567_v17 }
 0x6fb   : > { %v1526_v4 = vadd.f32 1e-06, %v1522_v44  ;;  %v4805_v11 = vadd.f32 %v3958_v21, %v1572_v15 }
 0x6fd   : > { %4063 = vrsqrt.f32 %v1526_v4  ;;  %vm1563_vm7 = vweird.f32 %v1526_v4 }
 0x6fe   : > { %4065 = vrsqrt.f32 %v1525_v63 }
 0x700   : > { %v1512_v58 = vpop.xlane.xlu0 %1511 }
 0x701   : > { %v1520_v53 = vmul.f32 %v1512_v58, %v4778_v27 }
 0x703   : > { %v1524_v19 = vadd.f32 1e-06, %v1520_v53  ;;  %v4064_v32 = vpop.eup %4063 }
 0x704   : > { %v4066_v30 = vpop.eup %4065  ;;  %v1558_v51 = vmul.f32 %v4064_v32, %v1526_v4  ;;  %vm1564_vm5 = vweird.f32 %v4064_v32 }
 0x705   : > { %4067 = vrsqrt.f32 %v1524_v19  ;;  %v1548_v6 = vmul.f32 %v4066_v30, %v1525_v63  ;;  %vm1543_vm3 = vweird.f32 %v1524_v19  ;;  %vm1554_vm6 = vweird.f32 %v4066_v30  ;;  %vm1565_vm8 = vmor %vm1563_vm7, %vm1564_vm5 }
 0x706   : > { %v1559_v18 = vmul.f32 %v4064_v32, %v1558_v51  ;;  %vm1555_vm10 = vmor %vm1553_vm9, %vm1554_vm6 }
 0x707   : > { %v1549_v47 = vmul.f32 %v4066_v30, %v1548_v6 }
 0x708   : > { %v1560_v9 = vmul.f32 0.5, %v1559_v18 }
 0x709   : > { %v1550_v2 = vmul.f32 0.5, %v1549_v47 }
 0x70a   : > { %v1561_v56 = vsub.f32 1.5, %v1560_v9 }
 0x70b   : > { %v4068_v50 = vpop.eup %4067  ;;  %v1551_v29 = vsub.f32 1.5, %v1550_v2 }
 0x70c   : > { %v1538_v55 = vmul.f32 %v4068_v50, %v1524_v19  ;;  %vm1544_vm2 = vweird.f32 %v4068_v50  ;;  %v1562_v54 = vmul.f32 %v4064_v32, %v1561_v56 }
 0x70d   : > { %vm1545_vm4 = vmor %vm1543_vm3, %vm1544_vm2  ;;  %v1552_v34 = vmul.f32 %v4066_v30, %v1551_v29 }
 0x70e   : > { %v1539_v1 = vmul.f32 %v4068_v50, %v1538_v55  ;;  %v1566_v62 = vsel %vm1565_vm8, %v4064_v32, %v1562_v54 }
 0x70f   : > { %v1556_v35 = vsel %vm1555_vm10, %v4066_v30, %v1552_v34  ;;  %v1570_v26 = vmul.f32 %v1566_v62, %v4793_v41 }
 0x710   : > { %v1540_v36 = vmul.f32 0.5, %v1539_v1  ;;  %v1569_v37 = vmul.f32 %v1556_v35, %v4787_v28 }
 0x711   : > { %v1575_v7 = vmul.f32 %v3957_v13, %v1570_v26 }
 0x712   : > { %v1541_v12 = vsub.f32 1.5, %v1540_v36  ;;  %v1574_v3 = vmul.f32 %v3957_v13, %v1569_v37 }
 0x713   : > { %v4814_v8 = vadd.f32 %v3958_v21, %v1575_v7 }
 0x714   : > { %v1542_v10 = vmul.f32 %v4068_v50, %v1541_v12  ;;  %v4816_v38 = vadd.f32 %v3958_v21, %v1574_v3 }
 0x716   : > { %v1546_v20 = vsel %vm1545_vm4, %v4068_v50, %v1542_v10  ;;  %v1586_v39 = vpack.c.bf16 %v4814_v8, %v4816_v38 }
 0x717   : > { %v1568_v25 = vmul.f32 %v1546_v20, %v1500_v40  ;;  %v3959_v40 = vld [vmem:[#allocation6 + $0x8] ss:$0 sm:$0xff] }
 0x719   : > { %v1573_v16 = vmul.f32 %v3957_v13, %v1568_v25 }
 0x71b   : > { %v4807_v22 = vadd.f32 %v3958_v21, %v1573_v16 }
 0x71d   : > { %v1585_v31 = vpack.c.bf16 %v4807_v22, %v4805_v11 }
 0x71f   : > { %3724 = vmatmul.msk.bf16.vlgmr.msra.gmra.mxu1 %vm456_vm1, %v1585_v31 }
 0x72f   : > { %3725 = vmatmul.msk.bf16.gmra.mxu1 %vm456_vm1, %v1586_v39 }
 0x79c   : > { %v1616_v42 = vpop.f32.mrf.mxu1 }
 0x79d   : > { %v4821_v60 = vadd.f32 %v3959_v40, %v1616_v42 }
 0x79f   : > { %v3726_v45 = vmul.f32 -1.442695, %v4821_v60 }
 0x7a1   : > { %4069 = vpow2.f32 %v3726_v45  ;;  %v3873_v45 = vld [vmem:[#allocation4 + $0x48] sm:$0xff] }
 0x7a2   : > { %1769 = vmatpush.bf16.msrb.mxu1 %v3873_v45 }
 0x7a4   : > { %v1618_v41 = vpop.f32.mrf.mxu1 }
 0x7a5   : > { %v4824_v28 = vadd.f32 %v3959_v40, %v1618_v41  ;;  %v3872_v41 = vld [vmem:[#allocation4 + $0x40] sm:$0xff] }
 0x7a6   : > { %1770 = vmatpush.bf16.msrb.mxu1 %v3872_v41 }
 0x7a7   : > { %v4070_v48 = vpop.eup %4069  ;;  %v3727_v5 = vmul.f32 -1.442695, %v4824_v28 }
 0x7a8   : > { %v1638_v59 = vadd.f32 1.0, %v4070_v48  ;;  %v3871_v48 = vld [vmem:[#allocation4 + $0x38] sm:$0xff] }
 0x7a9   : > { %4071 = vpow2.f32 %v3727_v5  ;;  %v3870_v5 = vld [vmem:[#allocation4 + $0x30] sm:$0xff] }
 0x7aa   : > { %4073 = vrcp.f32 %v1638_v59  ;;  %v1653_v24 = vand.u32 2147483648, %v1638_v59  ;;  %v1651_v19 = vand.u32 2147483647, %v1638_v59  ;;  %vm1647_vm12 = vweird.f32 %v1638_v59  ;;  %1771 = vmatpush.bf16.msrb.mxu1 %v3871_v48 }
 0x7ac   : > { %v1621_v46 = vpop.f32.mrf.mxu1  ;;  %v1654_v50 = vor.u32 1.1754944e-38, %v1653_v24  ;;  %vm1652_vm14 = vcmp.eq.f32.partialorder %v1651_v19, 8.507059e+37 }
 0x7ad   : > { %v4827_v49 = vadd.f32 %v3959_v40, %v1621_v46 }
 0x7ae   : > { %1772 = vmatpush.bf16.msrb.mxu1 %v3870_v5 }
 0x7af   : > { %v4072_v44 = vpop.eup %4071  ;;  %v3728_v14 = vmul.f32 -1.442695, %v4827_v49 }
 0x7b0   : > { %v4074_v52 = vpop.eup %4073  ;;  %v1639_v23 = vadd.f32 1.0, %v4072_v44 }
 0x7b1   : > { %4075 = vpow2.f32 %v3728_v14  ;;  %v1643_v33 = vmul.f32 %v4074_v52, %v1638_v59  ;;  %vm1648_vm11 = vweird.f32 %v4074_v52 }
 0x7b2   : > { %4077 = vrcp.f32 %v1639_v23  ;;  %vm1649_vm13 = vmor %vm1647_vm12, %vm1648_vm11  ;;  %v1668_v1 = vand.u32 2147483648, %v1639_v23  ;;  %v1666_v47 = vand.u32 2147483647, %v1639_v23  ;;  %vm1662_vm2 = vweird.f32 %v1639_v23 }
 0x7b3   : > { %v1644_v4 = vsub.f32 1.0, %v1643_v33 }
 0x7b4   : > { %v1623_v63 = vpop.f32.mrf.mxu1  ;;  %v1669_v17 = vor.u32 1.1754944e-38, %v1668_v1  ;;  %vm1667_vm4 = vcmp.eq.f32.partialorder %v1666_v47, 8.507059e+37 }
 0x7b5   : > { %v4830_v58 = vadd.f32 %v3959_v40, %v1623_v63  ;;  %v1645_v53 = vmul.f32 %v4074_v52, %v1644_v4 }
 0x7b7   : > { %v4076_v57 = vpop.eup %4075  ;;  %v3729_v32 = vmul.f32 -1.442695, %v4830_v58  ;;  %v1646_v43 = vadd.f32 %v4074_v52, %v1645_v53  ;;  %v3960_v53 = vld [vmem:[#allocation6 + $0x18] ss:$0 sm:$0xff] }
 0x7b8   : > { %v4078_v30 = vpop.eup %4077  ;;  %v1640_v51 = vadd.f32 1.0, %v4076_v57 }
 0x7b9   : > { %4079 = vpow2.f32 %v3729_v32  ;;  %v1650_v0 = vsel %vm1649_vm13, %v4074_v52, %v1646_v43  ;;  %v1658_v6 = vmul.f32 %v4078_v30, %v1639_v23  ;;  %vm1663_vm15 = vweird.f32 %v4078_v30 }
 0x7ba   : > { %4081 = vrcp.f32 %v1640_v51  ;;  %v1655_v55 = vsel %vm1652_vm14, %v1654_v50, %v1650_v0  ;;  %vm1664_vm3 = vmor %vm1662_vm2, %vm1663_vm15  ;;  %v1683_v21 = vand.u32 2147483648, %v1640_v51  ;;  %v1681_v25 = vand.u32 2147483647, %v1640_v51 }
 0x7bb   : > { %1706 = vrot.lane.b32.xlu0 %v1655_v55, %s4389_s8  ;;  %v1659_v18 = vsub.f32 1.0, %v1658_v6  ;;  %vm1677_vm6 = vweird.f32 %v1640_v51  ;;  %vm1758_vm13 = vcmask 523264  }
 0x7bc   : > { %v1684_v54 = vor.u32 1.1754944e-38, %v1683_v21  ;;  %vm1682_vm8 = vcmp.eq.f32.partialorder %v1681_v25, 8.507059e+37 }
 0x7bd   : > { %v1660_v61 = vmul.f32 %v4078_v30, %v1659_v18 }
 0x7bf   : > { %v4080_v36 = vpop.eup %4079  ;;  %v1661_v9 = vadd.f32 %v4078_v30, %v1660_v61 }
 0x7c0   : > { %v4082_v12 = vpop.eup %4081  ;;  %v1641_v13 = vadd.f32 1.0, %v4080_v36 }
 0x7c1   : > { %v1665_v2 = vsel %vm1664_vm3, %v4078_v30, %v1661_v9  ;;  %v1673_v10 = vmul.f32 %v4082_v12, %v1640_v51  ;;  %vm1678_vm5 = vweird.f32 %v4082_v12 }
 0x7c2   : > { %4083 = vrcp.f32 %v1641_v13  ;;  %v1670_v56 = vsel %vm1667_vm4, %v1669_v17, %v1665_v2  ;;  %vm1679_vm7 = vmor %vm1677_vm6, %vm1678_vm5  ;;  %v1698_v26 = vand.u32 2147483648, %v1641_v13  ;;  %v1696_v7 = vand.u32 2147483647, %v1641_v13 }
 0x7c3   : > { %1708 = vrot.lane.b32.xlu1 %v1670_v56, %s4389_s8  ;;  %v1674_v20 = vsub.f32 1.0, %v1673_v10  ;;  %vm1692_vm10 = vweird.f32 %v1641_v13 }
 0x7c4   : > { %v1699_v39 = vor.u32 1.1754944e-38, %v1698_v26  ;;  %vm1697_vm12 = vcmp.eq.f32.partialorder %v1696_v7, 8.507059e+37 }
 0x7c5   : > { %v1675_v15 = vmul.f32 %v4082_v12, %v1674_v20 }
 0x7c7   : > { %v1676_v29 = vadd.f32 %v4082_v12, %v1675_v15 }
 0x7c8   : > { %v4084_v16 = vpop.eup %4083 }
 0x7c9   : > { %v1680_v34 = vsel %vm1679_vm7, %v4082_v12, %v1676_v29  ;;  %v1688_v31 = vmul.f32 %v4084_v16, %v1641_v13  ;;  %vm1693_vm9 = vweird.f32 %v4084_v16 }
 0x7ca   : > { %v1685_v62 = vsel %vm1682_vm8, %v1684_v54, %v1680_v34  ;;  %vm1694_vm11 = vmor %vm1692_vm10, %vm1693_vm9 }
 0x7cb   : > { %1710 = vrot.lane.b32.xlu2 %v1685_v62, %s4389_s8  ;;  %v1689_v35 = vsub.f32 1.0, %v1688_v31  ;;  %v3875_v31 = vld [vmem:[#allocation4 + $0x58] sm:$0xff] }
 0x7cc   : > { %1922 = vmatpush.bf16.msra.mxu1 %v3875_v31 }
 0x7cd   : > { %v1690_v37 = vmul.f32 %v4084_v16, %v1689_v35  ;;  %v3874_v35 = vld [vmem:[#allocation4 + $0x50] sm:$0xff] }
 0x7cf   : > { %v1691_v3 = vadd.f32 %v4084_v16, %v1690_v37 }
 0x7d0   : > { %1923 = vmatpush.bf16.msra.mxu1 %v3874_v35 }
 0x7d1   : > { %v1695_v40 = vsel %vm1694_vm11, %v4084_v16, %v1691_v3 }
 0x7d2   : > { %v1700_v42 = vsel %vm1697_vm12, %v1699_v39, %v1695_v40 }
 0x7d3   : > { %1712 = vrot.lane.b32.xlu0 %v1700_v42, %s4389_s8 }
 0x825   : > { %v1711_v23 = vpop.permute.xlu2 %1710 }
 0x826   : > { %v1720_v4 = vmul.f32 %v1711_v23, %v4827_v49 }
 0x82d   : > { %v1707_v59 = vpop.permute.xlu0 %1706 }
 0x82e   : > { %v1718_v44 = vmul.f32 %v1707_v59, %v4821_v60 }
 0x835   : > { %v1709_v46 = vpop.permute.xlu1 %1708 }
 0x836   : > { %v1719_v14 = vmul.f32 %v1709_v46, %v4824_v28 }
 0x838   : > { %v1731_v52 = vpack.c.bf16 %v1719_v14, %v1718_v44 }
 0x83a   : > { %3746 = vmatmul.msk.bf16.vlgmr.msrb.gmra.mxu1 %vm1758_vm13, %v1731_v52 }
 0x845   : > { %v1713_v33 = vpop.permute.xlu0 %1712 }
 0x846   : > { %v1721_v63 = vmul.f32 %v1713_v33, %v4830_v58 }
 0x848   : > { %v1732_v24 = vpack.c.bf16 %v1721_v63, %v1720_v4 }
 0x84a   : > { %3747 = vmatmul.msk.bf16.gmra.mxu1 %vm1758_vm13, %v1732_v24 }
 0x8b7   : > { %v1774_v19 = vpop.f32.mrf.mxu1 }
 0x8b8   : > { %v1775_v57 = vadd.f32 %v3960_v53, %v1774_v19 }
 0x8ba   : > { %v1784_v60 = vadd.f32 %v1775_v57, %v4805_v11 }
 0x8bc   : > { %v1790_v28 = vsel %vm456_vm1, %v1784_v60, 0.0 }
 0x8bd   : > { %1791 = vadd.xlane.f32.xlu1 %v1790_v28 }
 0x8bf   : > { %v1776_v32 = vpop.f32.mrf.mxu1 }
 0x8c0   : > { %v1777_v43 = vadd.f32 %v3960_v53, %v1776_v32 }
 0x8c2   : > { %v1785_v30 = vadd.f32 %v1777_v43, %v4807_v22 }
 0x8c4   : > { %v1793_v51 = vsel %vm456_vm1, %v1785_v30, 0.0 }
 0x8c5   : > { %1794 = vadd.xlane.f32.xlu2 %v1793_v51 }
 0x8c7   : > { %v1779_v49 = vpop.f32.mrf.mxu1 }
 0x8c8   : > { %v1780_v58 = vadd.f32 %v3960_v53, %v1779_v49 }
 0x8ca   : > { %v1786_v50 = vadd.f32 %v1780_v58, %v4816_v38 }
 0x8cc   : > { %v1796_v0 = vsel %vm456_vm1, %v1786_v50, 0.0 }
 0x8cd   : > { %1797 = vadd.xlane.f32.xlu0 %v1796_v0 }
 0x8cf   : > { %v1781_v6 = vpop.f32.mrf.mxu1 }
 0x8d0   : > { %v1782_v55 = vadd.f32 %v3960_v53, %v1781_v6  ;;  %v3961_v53 = vld [vmem:[#allocation6 + $0x30] ss:$0 sm:$0xff] }
 0x8d2   : > { %v1787_v11 = vadd.f32 %v1782_v55, %v4814_v8 }
 0x8d4   : > { %v1799_v18 = vsel %vm456_vm1, %v1787_v11, 0.0 }
 0x8d5   : > { %1800 = vadd.xlane.f32.xlu2 %v1799_v18 }
 0x930   : > { %v1792_v1 = vpop.xlane.xlu1 %1791 }
 0x931   : > { %v1802_v22 = vmul.f32 %v1792_v1, %v4778_v27 }
 0x933   : > { %v1806_v61 = vsub.f32 %v1784_v60, %v1802_v22 }
 0x935   : > { %v1810_v47 = vmul.f32 %v1806_v61, %v1806_v61 }
 0x937   : > { %v1814_v36 = vsel %vm456_vm1, %v1810_v47, 0.0 }
 0x938   : > { %v1795_v9 = vpop.xlane.xlu2 %1794  ;;  %1815 = vadd.xlane.f32.xlu1 %v1814_v36 }
 0x939   : > { %v1803_v38 = vmul.f32 %v1795_v9, %v4778_v27 }
 0x93b   : > { %v4854_v12 = vsub.f32 %v1785_v30, %v1803_v38  ;;  %v3962_v30 = vld [vmem:[#allocation6 + $0x38] ss:$0 sm:$0xff] }
 0x93d   : > { %v1811_v13 = vmul.f32 %v4854_v12, %v4854_v12 }
 0x93f   : > { %v1817_v8 = vsel %vm456_vm1, %v1811_v13, 0.0 }
 0x940   : > { %v1798_v17 = vpop.xlane.xlu0 %1797  ;;  %1818 = vadd.xlane.f32.xlu0 %v1817_v8 }
 0x941   : > { %v1804_v2 = vmul.f32 %v1798_v17, %v4778_v27 }
 0x943   : > { %v4860_v10 = vsub.f32 %v1786_v50, %v1804_v2 }
 0x945   : > { %v1812_v56 = vmul.f32 %v4860_v10, %v4860_v10 }
 0x947   : > { %v1820_v20 = vsel %vm456_vm1, %v1812_v56, 0.0 }
 0x948   : > { %1821 = vadd.xlane.f32.xlu2 %v1820_v20  ;;  %v1801_v21 = vpop.xlane.xlu2 %1800 }
 0x949   : > { %v1805_v15 = vmul.f32 %v1801_v21, %v4778_v27 }
 0x94b   : > { %v4866_v25 = vsub.f32 %v1787_v11, %v1805_v15 }
 0x94d   : > { %v1813_v29 = vmul.f32 %v4866_v25, %v4866_v25 }
 0x94f   : > { %v1823_v16 = vsel %vm456_vm1, %v1813_v29, 0.0  ;;  %v3963_v29 = vld [vmem:[#allocation6 + $0x40] ss:$0 sm:$0xff] }
 0x950   : > { %1824 = vadd.xlane.f32.xlu1 %v1823_v16 }
 0x9ab   : > { %v1816_v54 = vpop.xlane.xlu1 %1815 }
 0x9ac   : > { %v1826_v34 = vmul.f32 %v1816_v54, %v4778_v27 }
 0x9ae   : > { %v1830_v62 = vadd.f32 1e-06, %v1826_v34 }
 0x9b0   : > { %4085 = vrsqrt.f32 %v1830_v62  ;;  %vm1840_vm15 = vweird.f32 %v1830_v62 }
 0x9b3   : > { %v1819_v26 = vpop.xlane.xlu0 %1818 }
 0x9b4   : > { %v1827_v37 = vmul.f32 %v1819_v26, %v4778_v27 }
 0x9b6   : > { %v4086_v7 = vpop.eup %4085  ;;  %v1831_v3 = vadd.f32 1e-06, %v1827_v37  ;;  %v4211_v37 = vld [vmem:[#allocation2] sm:$0xff] }
 0x9b7   : > { %v1835_v39 = vmul.f32 %v4086_v7, %v1830_v62  ;;  %vm1841_vm14 = vweird.f32 %v4086_v7 }
 0x9b8   : > { %4087 = vrsqrt.f32 %v1831_v3  ;;  %vm1842_vm2 = vmor %vm1840_vm15, %vm1841_vm14  ;;  %vm1850_vm4 = vweird.f32 %v1831_v3 }
 0x9b9   : > { %v1836_v40 = vmul.f32 %v4086_v7, %v1835_v39  ;;  %v4214_v39 = vld [vmem:[#allocation2 + $0x18] sm:$0xff] }
 0x9bb   : > { %v1837_v42 = vmul.f32 0.5, %v1836_v40  ;;  %v1822_v45 = vpop.xlane.xlu2 %1821  ;;  %v4215_v40 = vld [vmem:[#allocation2 + $0x20] sm:$0xff] }
 0x9bc   : > { %v1828_v41 = vmul.f32 %v1822_v45, %v4778_v27  ;;  %v4217_v45 = vld [vmem:[#allocation2 + $0x30] sm:$0xff] }
 0x9bd   : > { %v1838_v48 = vsub.f32 1.5, %v1837_v42  ;;  %v4216_v42 = vld [vmem:[#allocation2 + $0x28] sm:$0xff] }
 0x9be   : > { %v4088_v5 = vpop.eup %4087  ;;  %v1832_v59 = vadd.f32 1e-06, %v1828_v41  ;;  %v4218_v41 = vld [vmem:[#allocation2 + $0x38] sm:$0xff] }
 0x9bf   : > { %v1839_v46 = vmul.f32 %v4086_v7, %v1838_v48  ;;  %v1845_v44 = vmul.f32 %v4088_v5, %v1831_v3  ;;  %vm1851_vm3 = vweird.f32 %v4088_v5  ;;  %v4213_v3 = vld [vmem:[#allocation2 + $0x10] sm:$0xff]  ;;  %v4219_v48 = vld [vmem:[#allocation2 + $0x40] sm:$0xff] }
 0x9c0   : > { %4089 = vrsqrt.f32 %v1832_v59  ;;  %vm1852_vm5 = vmor %vm1850_vm4, %vm1851_vm3  ;;  %vm1860_vm7 = vweird.f32 %v1832_v59 }
 0x9c1   : > { %v1846_v14 = vmul.f32 %v4088_v5, %v1845_v44  ;;  %v1843_v52 = vsel %vm1842_vm2, %v4086_v7, %v1839_v46  ;;  %v4212_v7 = vld [vmem:[#allocation2 + $0x8] sm:$0xff]  ;;  %v4222_v46 = vld [vmem:[#allocation2 + $0x58] sm:$0xff]  ;;  %v4223_v44 = vld [vmem:[#allocation2 + $0x60] sm:$0xff] }
 0x9c2   : > { %v1874_v19 = vmul.f32 %v1843_v52, %v1806_v61 }
 0x9c3   : > { %v1847_v23 = vmul.f32 0.5, %v1846_v14  ;;  %v1825_v33 = vpop.xlane.xlu1 %1824  ;;  %v4224_v14 = vld [vmem:[#allocation2 + $0x68] sm:$0xff] }
 0x9c4   : > { %v1829_v4 = vmul.f32 %v1825_v33, %v4778_v27  ;;  %v1879_v51 = vmul.f32 %v3961_v53, %v1874_v19  ;;  %v4225_v33 = vld [vmem:[#allocation2 + $0x70] sm:$0xff]  ;;  %v4227_v19 = vld [vmem:[#allocation2 + $0x80] sm:$0xff] }
 0x9c5   : > { %v1848_v63 = vsub.f32 1.5, %v1847_v23 }
 0x9c6   : > { %v4090_v24 = vpop.eup %4089  ;;  %v1833_v57 = vadd.f32 1e-06, %v1829_v4  ;;  %v4876_v55 = vadd.f32 %v3962_v30, %v1879_v51 }
 0x9c7   : > { %v1849_v60 = vmul.f32 %v4088_v5, %v1848_v63  ;;  %v1855_v28 = vmul.f32 %v4090_v24, %v1832_v59  ;;  %vm1861_vm6 = vweird.f32 %v4090_v24  ;;  %v4221_v59 = vld [vmem:[#allocation2 + $0x50] sm:$0xff] }
 0x9c8   : > { %4091 = vrsqrt.f32 %v1833_v57  ;;  %vm1862_vm8 = vmor %vm1860_vm7, %vm1861_vm6  ;;  %vm1870_vm10 = vweird.f32 %v1833_v57 }
 0x9c9   : > { %v1853_v32 = vsel %vm1852_vm5, %v4088_v5, %v1849_v60  ;;  %v1856_v43 = vmul.f32 %v4090_v24, %v1855_v28  ;;  %v4220_v5 = vld [vmem:[#allocation2 + $0x48] sm:$0xff] }
 0x9ca   : > { %v1875_v49 = vmul.f32 %v1853_v32, %v4854_v12  ;;  %v4228_v28 = vld [vmem:[#allocation2 + $0x88] sm:$0xff] }
 0x9cb   : > { %v1857_v58 = vmul.f32 0.5, %v1856_v43 }
 0x9cc   : > { %v1880_v50 = vmul.f32 %v3961_v53, %v1875_v49 }
 0x9cd   : > { %v1858_v0 = vsub.f32 1.5, %v1857_v58  ;;  %v4230_v58 = vld [vmem:[#allocation2 + $0x98] sm:$0xff] }
 0x9ce   : > { %v4092_v6 = vpop.eup %4091  ;;  %v4878_v11 = vadd.f32 %v3962_v30, %v1880_v50 }
 0x9cf   : > { %v1859_v18 = vmul.f32 %v4090_v24, %v1858_v0  ;;  %v1865_v1 = vmul.f32 %v4092_v6, %v1833_v57  ;;  %vm1871_vm9 = vweird.f32 %v4092_v6 }
 0x9d0   : > { %v1893_v22 = vpack.c.bf16 %v4878_v11, %v4876_v55  ;;  %vm1872_vm11 = vmor %vm1870_vm10, %vm1871_vm9 }
 0x9d1   : > { %v1866_v61 = vmul.f32 %v4092_v6, %v1865_v1  ;;  %v1863_v47 = vsel %vm1862_vm8, %v4090_v24, %v1859_v18  ;;  %v4226_v24 = vld [vmem:[#allocation2 + $0x78] sm:$0xff] }
 0x9d2   : > { %3756 = vmatmul.msk.bf16.vlgmr.msra.gmra.mxu1 %vm456_vm1, %v1893_v22  ;;  %v1876_v38 = vmul.f32 %v1863_v47, %v4860_v10  ;;  %v4232_v22 = vld [vmem:[#allocation2 + $0xa8] sm:$0xff] }
 0x9d3   : > { %v1867_v36 = vmul.f32 0.5, %v1866_v61 }
 0x9d4   : > { %v1881_v17 = vmul.f32 %v3961_v53, %v1876_v38 }
 0x9d5   : > { %v1868_v9 = vsub.f32 1.5, %v1867_v36  ;;  %v4233_v36 = vld [vmem:[#allocation2 + $0xb0] sm:$0xff] }
 0x9d6   : > { %v4885_v56 = vadd.f32 %v3962_v30, %v1881_v17  ;;  %v4235_v17 = vld [vmem:[#allocation2 + $0xc0] sm:$0xff] }
 0x9d7   : > { %v1869_v12 = vmul.f32 %v4092_v6, %v1868_v9 }
 0x9d9   : > { %v1873_v13 = vsel %vm1872_vm11, %v4092_v6, %v1869_v12  ;;  %v4231_v6 = vld [vmem:[#allocation2 + $0xa0] sm:$0xff]  ;;  %v4234_v12 = vld [vmem:[#allocation2 + $0xb8] sm:$0xff] }
 0x9da   : > { %v1877_v8 = vmul.f32 %v1873_v13, %v4866_v25 }
 0x9dc   : > { %v1882_v2 = vmul.f32 %v3961_v53, %v1877_v8 }
 0x9de   : > { %v4887_v20 = vadd.f32 %v3962_v30, %v1882_v2  ;;  %v4229_v30 = vld [vmem:[#allocation2 + $0x90] sm:$0xff] }
 0x9e0   : > { %v1894_v21 = vpack.c.bf16 %v4887_v20, %v4885_v56 }
 0x9e2   : > { %3757 = vmatmul.msk.bf16.gmra.mxu1 %vm456_vm1, %v1894_v21 }
 0xa4f   : > { %v1925_v15 = vpop.f32.mrf.mxu1 }
 0xa50   : > { %v4892_v16 = vadd.f32 %v3963_v29, %v1925_v15  ;;  %v4236_v15 = vld [vmem:[#allocation2 + $0xc8] sm:$0xff] }
 0xa57   : > { %v1927_v10 = vpop.f32.mrf.mxu1 }
 0xa58   : > { %v4894_v54 = vadd.f32 %v3963_v29, %v1927_v10 }
 0xa5a   : > { %2022 = vrot.lane.b32.xlu1 %v4894_v54, %s4388_s7  ;;  %v3948_v25 = vpack.i.bf16 %v4892_v16, %v4894_v54 }
 0xa5f   : > { %v1930_v34 = vpop.f32.mrf.mxu1 }
 0xa60   : > { %v4900_v31 = vadd.f32 %v3963_v29, %v1930_v34  ;;  %v4237_v34 = vld [vmem:[#allocation2 + $0xd0] sm:$0xff] }
 0xa62   : > { %2024 = vrot.lane.b32.xlu2 %v4900_v31, %s4388_s7 }
 0xa67   : > { %v1932_v62 = vpop.f32.mrf.mxu1 }
 0xa68   : > { %v4904_v35 = vadd.f32 %v3963_v29, %v1932_v62 }
 0xa6a   : > { %2026 = vrot.lane.b32.xlu0 %v4904_v35, %s4388_s7  ;;  %1947 = vmatpush.msrb.mxu2 %v4904_v35  ;;  %v3943_v26 = vpack.i.bf16 %v4900_v31, %v4904_v35 }
 0xa6c   : > { %1948 = vmatpush.msrb.mxu2 %v4900_v31 }
 0xa6e   : > { %1949 = vmatpush.msrb.mxu2 %v4894_v54 }
 0xa70   : > { %1950 = vmatpush.msrb.mxu2 %v4892_v16 }
 0xa71   : > { %3758 = vmatmul.msk.f32.vlgmr.msrb.gmra.mxu2 %vm456_vm1, %v4211_v37 }
 0xa72   : > { %2020 = vrot.lane.b32.xlu0 %v4892_v16, %s4388_s7 }
 0xa79   : > { %3759 = vmatmul.msk.f32.gmra.mxu2 %vm456_vm1, %v4212_v7  ;;  %v4238_v7 = vld [vmem:[#allocation2 + $0xd8] sm:$0xff] }
 0xa81   : > { %3760 = vmatmul.msk.f32.gmra.mxu2 %vm456_vm1, %v4213_v3 }
 0xa89   : > { %3761 = vmatmul.msk.f32.gmra.mxu2 %vm456_vm1, %v4214_v39 }
 0xa91   : > { %3762 = vmatmul.msk.f32.gmra.mxu2 %vm456_vm1, %v4215_v40  ;;  %v4239_v40 = vld [vmem:[#allocation2 + $0xe0] sm:$0xff] }
 0xa99   : > { %3763 = vmatmul.msk.f32.gmra.mxu2 %vm456_vm1, %v4216_v42 }
 0xaa1   : > { %3764 = vmatmul.msk.f32.gmra.mxu2 %vm456_vm1, %v4217_v45 }
 0xaa9   : > { %3765 = vmatmul.msk.f32.gmra.mxu2 %vm456_vm1, %v4218_v41 }
 0xab1   : > { %3766 = vmatmul.msk.f32.gmra.mxu2 %vm456_vm1, %v4219_v48  ;;  %v4240_v48 = vld [vmem:[#allocation2 + $0x180] sm:$0xff] }
 0xab9   : > { %3767 = vmatmul.msk.f32.gmra.mxu2 %vm456_vm1, %v4220_v5 }
 0xabc   : > { %v2025_v23 = vpop.permute.xlu2 %2024 }
 0xac1   : > { %3768 = vmatmul.msk.f32.gmra.mxu2 %vm456_vm1, %v4221_v59 }
 0xac9   : > { %3769 = vmatmul.msk.f32.gmra.mxu2 %vm456_vm1, %v4222_v46 }
 0xacc   : > { %v2023_v4 = vpop.permute.xlu1 %2022 }
 0xad1   : > { %3770 = vmatmul.msk.f32.gmra.mxu2 %vm456_vm1, %v4223_v44 }
 0xad9   : > { %3771 = vmatmul.msk.f32.gmra.mxu2 %vm456_vm1, %v4224_v14 }
 0xadc   : > { %v2027_v52 = vpop.permute.xlu0 %2026 }
 0xadd   : > { %3774 = vmatpush.xpose.msk.msrb.mxu3 %vm456_vm1, %v2027_v52  ;;  %v4241_v52 = vld [vmem:[#allocation2 + $0xe8] sm:$0xff] }
 0xae1   : > { %3775 = vmatpush.xpose.msk.msrb.mxu3 %vm456_vm1, %v2025_v23  ;;  %3772 = vmatmul.msk.f32.gmra.mxu2 %vm456_vm1, %v4225_v33  ;;  %v4242_v33 = vld [vmem:[#allocation2 + $0x188] sm:$0xff] }
 0xae4   : > { %v2021_v63 = vpop.permute.xlu0 %2020 }
 0xae5   : > { %3776 = vmatpush.xpose.msk.msrb.mxu3 %vm456_vm1, %v2023_v4 }
 0xae9   : > { %3777 = vmatpush.xpose.msk.msrb.mxu3 %vm456_vm1, %v2021_v63  ;;  %3773 = vmatmul.msk.f32.gmra.mxu2 %vm456_vm1, %v4226_v24 }
 0xaf4   : > { %v1952_v53 = vpop.f32.mrf.mxu2 }
 0xaf5   : > { %v2000_v57 = vmul.f32 %v4227_v19, %v1952_v53 }
 0xaf7   : > { %3778 = vmatmul.msk.f32.vlgmr.msrb.gmra.mxu3 %vm456_vm1, %v2000_v57  ;;  %v4243_v57 = vld [vmem:[#allocation2 + $0xf0] sm:$0xff] }
 0xafc   : > { %v1955_v60 = vpop.f32.mrf.mxu2 }
 0xafd   : > { %v2001_v32 = vmul.f32 %v4228_v28, %v1955_v60  ;;  %v4244_v28 = vld [vmem:[#allocation2 + $0x190] sm:$0xff] }
 0xaff   : > { %3779 = vmatmul.msk.f32.gmra.mxu3 %vm456_vm1, %v2001_v32 }
 0xb04   : > { %v1958_v43 = vpop.f32.mrf.mxu2 }
 0xb05   : > { %v2002_v51 = vmul.f32 %v4229_v30, %v1958_v43 }
 0xb07   : > { %3780 = vmatmul.msk.f32.gmra.mxu3 %vm456_vm1, %v2002_v51 }
 0xb0c   : > { %v1961_v49 = vpop.f32.mrf.mxu2 }
 0xb0d   : > { %v2003_v50 = vmul.f32 %v4230_v58, %v1961_v49  ;;  %v4245_v58 = vld [vmem:[#allocation2 + $0xf8] sm:$0xff] }
 0xb0f   : > { %3781 = vmatmul.msk.f32.gmra.mxu3 %vm456_vm1, %v2003_v50 }
 0xb14   : > { %v1964_v0 = vpop.f32.mrf.mxu2 }
 0xb15   : > { %v2004_v18 = vmul.f32 %v4231_v6, %v1964_v0  ;;  %v4246_v0 = vld [vmem:[#allocation2 + $0x198] sm:$0xff] }
 0xb17   : > { %3782 = vmatmul.msk.f32.gmra.mxu3 %vm456_vm1, %v2004_v18 }
 0xb1c   : > { %v1967_v1 = vpop.f32.mrf.mxu2 }
 0xb1d   : > { %v2005_v61 = vmul.f32 %v4232_v22, %v1967_v1 }
 0xb1f   : > { %3783 = vmatmul.msk.f32.gmra.mxu3 %vm456_vm1, %v2005_v61  ;;  %v4247_v61 = vld [vmem:[#allocation2 + $0x1a0] sm:$0xff] }
 0xb24   : > { %v1970_v47 = vpop.f32.mrf.mxu2 }
 0xb25   : > { %v2006_v9 = vmul.f32 %v4233_v36, %v1970_v47 }
 0xb27   : > { %3784 = vmatmul.msk.f32.gmra.mxu3 %vm456_vm1, %v2006_v9 }
 0xb2c   : > { %v1973_v38 = vpop.f32.mrf.mxu2 }
 0xb2d   : > { %v2007_v13 = vmul.f32 %v4234_v12, %v1973_v38  ;;  %v4248_v12 = vld [vmem:[#allocation2 + $0x1a8] sm:$0xff] }
 0xb2f   : > { %3785 = vmatmul.msk.f32.gmra.mxu3 %vm456_vm1, %v2007_v13 }
 0xb34   : > { %v1976_v8 = vpop.f32.mrf.mxu2 }
 0xb35   : > { %v2008_v2 = vmul.f32 %v4235_v17, %v1976_v8 }
 0xb37   : > { %3786 = vmatmul.msk.f32.gmra.mxu3 %vm456_vm1, %v2008_v2 }
 0xb3c   : > { %v1979_v21 = vpop.f32.mrf.mxu2 }
 0xb3d   : > { %v2009_v29 = vmul.f32 %v4236_v15, %v1979_v21  ;;  %v4249_v21 = vld [vmem:[#allocation2 + $0x1b0] sm:$0xff] }
 0xb3f   : > { %3787 = vmatmul.msk.f32.gmra.mxu3 %vm456_vm1, %v2009_v29 }
 0xb44   : > { %v1982_v10 = vpop.f32.mrf.mxu2 }
 0xb45   : > { %v2010_v62 = vmul.f32 %v4237_v34, %v1982_v10 }
 0xb47   : > { %3788 = vmatmul.msk.f32.gmra.mxu3 %vm456_vm1, %v2010_v62  ;;  %v4250_v62 = vld [vmem:[#allocation2 + $0x1b8] sm:$0xff] }
 0xb4c   : > { %v1985_v37 = vpop.f32.mrf.mxu2 }
 0xb4d   : > { %v2011_v3 = vmul.f32 %v4238_v7, %v1985_v37 }
 0xb4f   : > { %3789 = vmatmul.msk.f32.gmra.mxu3 %vm456_vm1, %v2011_v3 }
 0xb54   : > { %v1988_v39 = vpop.f32.mrf.mxu2 }
 0xb55   : > { %v2012_v42 = vmul.f32 %v4239_v40, %v1988_v39  ;;  %v4251_v40 = vld [vmem:[#allocation2 + $0x1c0] sm:$0xff] }
 0xb57   : > { %3790 = vmatmul.msk.f32.gmra.mxu3 %vm456_vm1, %v2012_v42 }
 0xb5c   : > { %v1991_v14 = vpop.f32.mrf.mxu2 }
 0xb5d   : > { %v2013_v23 = vmul.f32 %v4241_v52, %v1991_v14 }
 0xb5f   : > { %3791 = vmatmul.msk.f32.gmra.mxu3 %vm456_vm1, %v2013_v23 }
 0xb64   : > { %v1994_v19 = vpop.f32.mrf.mxu2 }
 0xb65   : > { %v2014_v60 = vmul.f32 %v4243_v57, %v1994_v19 }
 0xb67   : > { %3792 = vmatmul.msk.f32.gmra.mxu3 %vm456_vm1, %v2014_v60 }
 0xb6c   : > { %v1997_v49 = vpop.f32.mrf.mxu2 }
 0xb6d   : > { %v2015_v50 = vmul.f32 %v4245_v58, %v1997_v49 }
 0xb6f   : > { %3793 = vmatmul.msk.f32.gmra.mxu3 %vm456_vm1, %v2015_v50 }
 0xb7a   : > { %v2101_v45 = vpop.f32.mrf.mxu3 }
 0xb7b   : > { %v2149_v41 = vmul.f32 0.35355338, %v2101_v45 }
 0xb7d   : > { %v4949_v5 = vadd.f32 %v4240_v48, %v2149_v41 }
 0xb7f   : > { %v2181_v59 = vsel %vm456_vm1, %v4949_v5, -inf }
 0xb80   : > { %2182 = vmax.xlane.f32.xlu0 %v2181_v59  ;;  %v4252_v59 = vld [vmem:[#allocation2 + $0x1c8] sm:$0xff] }
 0xb82   : > { %v2104_v46 = vpop.f32.mrf.mxu3 }
 0xb83   : > { %v2150_v44 = vmul.f32 0.35355338, %v2104_v46 }
 0xb85   : > { %v4953_v4 = vadd.f32 %v4242_v33, %v2150_v44 }
 0xb87   : > { %v2184_v63 = vsel %vm456_vm1, %v4953_v4, -inf }
 0xb88   : > { %2185 = vmax.xlane.f32.xlu2 %v2184_v63  ;;  %v4253_v63 = vld [vmem:[#allocation2 + $0x1e0] sm:$0xff] }
 0xb8a   : > { %v2107_v24 = vpop.f32.mrf.mxu3 }
 0xb8b   : > { %v2151_v53 = vmul.f32 0.35355338, %v2107_v24 }
 0xb8d   : > { %v4958_v32 = vadd.f32 %v4244_v28, %v2151_v53  ;;  %v4254_v28 = vld [vmem:[#allocation2 + $0x1d0] sm:$0xff] }
 0xb8f   : > { %v2187_v43 = vsel %vm456_vm1, %v4958_v32, -inf }
 0xb90   : > { %2188 = vmax.xlane.f32.xlu1 %v2187_v43 }
 0xb92   : > { %v2110_v30 = vpop.f32.mrf.mxu3 }
 0xb93   : > { %v2152_v51 = vmul.f32 0.35355338, %v2110_v30 }
 0xb95   : > { %v4963_v6 = vadd.f32 %v4246_v0, %v2152_v51 }
 0xb97   : > { %v2190_v18 = vsel %vm456_vm1, %v4963_v6, -inf }
 0xb98   : > { %2191 = vmax.xlane.f32.xlu0 %v2190_v18 }
 0xb9a   : > { %v2113_v1 = vpop.f32.mrf.mxu3 }
 0xb9b   : > { %v2153_v22 = vmul.f32 0.35355338, %v2113_v1 }
 0xb9d   : > { %v4968_v47 = vadd.f32 %v4247_v61, %v2153_v22 }
 0xb9f   : > { %v2193_v36 = vsel %vm456_vm1, %v4968_v47, -inf }
 0xba0   : > { %2194 = vmax.xlane.f32.xlu2 %v2193_v36 }
 0xba2   : > { %v2116_v9 = vpop.f32.mrf.mxu3 }
 0xba3   : > { %v2154_v38 = vmul.f32 0.35355338, %v2116_v9 }
 0xba5   : > { %v4972_v13 = vadd.f32 %v4248_v12, %v2154_v38 }
 0xba7   : > { %v2196_v8 = vsel %vm456_vm1, %v4972_v13, -inf }
 0xba8   : > { %2197 = vmax.xlane.f32.xlu1 %v2196_v8 }
 0xbaa   : > { %v2119_v17 = vpop.f32.mrf.mxu3 }
 0xbab   : > { %v2155_v2 = vmul.f32 0.35355338, %v2119_v17 }
 0xbad   : > { %v4976_v15 = vadd.f32 %v4249_v21, %v2155_v2 }
 0xbaf   : > { %v2199_v29 = vsel %vm456_vm1, %v4976_v15, -inf }
 0xbb0   : > { %2200 = vmax.xlane.f32.xlu0 %v2199_v29 }
 0xbb2   : > { %v2122_v10 = vpop.f32.mrf.mxu3 }
 0xbb3   : > { %v2156_v34 = vmul.f32 0.35355338, %v2122_v10 }
 0xbb5   : > { %v4980_v37 = vadd.f32 %v4250_v62, %v2156_v34 }
 0xbb7   : > { %v2202_v7 = vsel %vm456_vm1, %v4980_v37, -inf }
 0xbb8   : > { %2203 = vmax.xlane.f32.xlu1 %v2202_v7 }
 0xbba   : > { %v2125_v3 = vpop.f32.mrf.mxu3 }
 0xbbb   : > { %v2157_v39 = vmul.f32 0.35355338, %v2125_v3 }
 0xbbd   : > { %v4984_v42 = vadd.f32 %v4251_v40, %v2157_v39 }
 0xbbf   : > { %v2205_v45 = vsel %vm456_vm1, %v4984_v42, -inf }
 0xbc0   : > { %2206 = vmax.xlane.f32.xlu2 %v2205_v45 }
 0xbc2   : > { %v2128_v41 = vpop.f32.mrf.mxu3 }
 0xbc3   : > { %v2158_v48 = vmul.f32 0.35355338, %v2128_v41 }
 0xbc5   : > { %v4988_v46 = vadd.f32 %v4252_v59, %v2158_v48 }
 0xbc7   : > { %v2208_v44 = vsel %vm456_vm1, %v4988_v46, -inf }
 0xbc8   : > { %2209 = vmax.xlane.f32.xlu0 %v2208_v44 }
 0xbca   : > { %v2131_v14 = vpop.f32.mrf.mxu3 }
 0xbcb   : > { %v2159_v19 = vmul.f32 0.35355338, %v2131_v14 }
 0xbcd   : > { %v5003_v43 = vadd.f32 %v4254_v28, %v2159_v19 }
 0xbd1   : > { %3944 = vrot.lane.b32.xlu1 %v3943_v26, %s4389_s8  ;;  %v2211_v26 = vsel %vm456_vm1, %v5003_v43, -inf }
 0xbd2   : > { %v4996_v52 = vpop.f32.mrf.mxu3 }
 0xbda   : > { %v2137_v23 = vpop.f32.mrf.mxu3 }
 0xbdb   : > { %v2161_v33 = vmul.f32 0.35355338, %v2137_v23 }
 0xbdd   : > { %v4998_v24 = vadd.f32 %v4253_v63, %v2161_v33 }
 0xbdf   : > { %v2217_v53 = vsel %vm456_vm1, %v4998_v24, -inf }
 0xbe0   : > { %2218 = vmax.xlane.f32.xlu0 %v2217_v53 }
 0xbf3   : > { %v2183_v57 = vpop.xlane.xlu0 %2182 }
 0xbf4   : > { %v2229_v60 = vsub.f32 %v4949_v5, %v2183_v57 }
 0xbf6   : > { %v2245_v30 = vmul.f32 1.442695, %v2229_v60 }
 0xbf8   : > { %4093 = vpow2.f32 %v2245_v30  ;;  %v2160_v30 = vmul.f32 0.35355338, %v4996_v52 }
 0xbfb   : > { %v2186_v51 = vpop.xlane.xlu2 %2185  ;;  %2212 = vmax.xlane.f32.xlu1 %v2211_v26  ;;  %v4256_v26 = vld [vmem:[#allocation2 + $0x1f0] sm:$0xff] }
 0xbfc   : > { %v2230_v49 = vsub.f32 %v4953_v4, %v2186_v51 }
 0xbfe   : > { %v5008_v58 = vpop.eup %4093  ;;  %v2247_v50 = vmul.f32 1.442695, %v2230_v49  ;;  %v4257_v49 = vld [vmem:[#allocation2 + $0x1f8] sm:$0xff] }
 0xbff   : > { %v2277_v0 = vsel %vm456_vm1, %v5008_v58, 0.0 }
 0xc00   : > { %4095 = vpow2.f32 %v2247_v50  ;;  %2278 = vadd.xlane.f32.xlu2 %v2277_v0 }
 0xc03   : > { %v2189_v5 = vpop.xlane.xlu1 %2188 }
 0xc04   : > { %v2231_v18 = vsub.f32 %v4958_v32, %v2189_v5 }
 0xc06   : > { %v5013_v1 = vpop.eup %4095  ;;  %v2249_v22 = vmul.f32 1.442695, %v2231_v18 }
 0xc07   : > { %v2280_v61 = vsel %vm456_vm1, %v5013_v1, 0.0 }
 0xc08   : > { %4097 = vpow2.f32 %v2249_v22  ;;  %2281 = vadd.xlane.f32.xlu0 %v2280_v61  ;;  %v4258_v22 = vld [vmem:[#allocation2 + $0x1d8] sm:$0xff] }
 0xc09   : > { %v5061_v61 = vadd.f32 %v4258_v22, %v2160_v30 }
 0xc0b   : > { %v2192_v4 = vpop.xlane.xlu0 %2191 }
 0xc0c   : > { %v2232_v36 = vsub.f32 %v4963_v6, %v2192_v4 }
 0xc0e   : > { %v5018_v9 = vpop.eup %4097  ;;  %v2251_v38 = vmul.f32 1.442695, %v2232_v36  ;;  %v2214_v36 = vsel %vm456_vm1, %v5061_v61, -inf }
 0xc0f   : > { %v2283_v12 = vsel %vm456_vm1, %v5018_v9, 0.0 }
 0xc10   : > { %4099 = vpow2.f32 %v2251_v38  ;;  %2284 = vadd.xlane.f32.xlu0 %v2283_v12 }
 0xc13   : > { %v2195_v32 = vpop.xlane.xlu2 %2194 }
 0xc14   : > { %v2233_v8 = vsub.f32 %v4968_v47, %v2195_v32  ;;  %v2140_v47 = vpop.f32.mrf.mxu3 }
 0xc15   : > { %v2162_v48 = vmul.f32 0.35355338, %v2140_v47 }
 0xc16   : > { %v5023_v17 = vpop.eup %4099  ;;  %v2253_v2 = vmul.f32 1.442695, %v2233_v8 }
 0xc17   : > { %v2286_v21 = vsel %vm456_vm1, %v5023_v17, 0.0 }
 0xc18   : > { %4101 = vpow2.f32 %v2253_v2  ;;  %3949 = vrot.lane.b32.xlu2 %v3948_v25, %s4389_s8  ;;  %2287 = vadd.xlane.f32.xlu0 %v2286_v21 }
 0xc1b   : > { %v2198_v6 = vpop.xlane.xlu1 %2197 }
 0xc1c   : > { %v2234_v29 = vsub.f32 %v4972_v13, %v2198_v6  ;;  %v2143_v13 = vpop.f32.mrf.mxu3 }
 0xc1d   : > { %v2163_v53 = vmul.f32 0.35355338, %v2143_v13 }
 0xc1e   : > { %v5032_v10 = vpop.eup %4101  ;;  %v2255_v34 = vmul.f32 1.442695, %v2234_v29 }
 0xc1f   : > { %v2289_v62 = vsel %vm456_vm1, %v5032_v10, 0.0  ;;  %v5056_v51 = vadd.f32 %v4256_v26, %v2163_v53 }
 0xc20   : > { %4103 = vpow2.f32 %v2255_v34  ;;  %2290 = vadd.xlane.f32.xlu0 %v2289_v62 }
 0xc23   : > { %v2201_v7 = vpop.xlane.xlu0 %2200 }
 0xc24   : > { %v2235_v3 = vsub.f32 %v4976_v15, %v2201_v7  ;;  %v4255_v15 = vld [vmem:[#allocation2 + $0x1e8] sm:$0xff]  ;;  %v2146_v33 = vpop.f32.mrf.mxu3 }
 0xc25   : > { %v5046_v23 = vadd.f32 %v4255_v15, %v2162_v48  ;;  %v2164_v57 = vmul.f32 0.35355338, %v2146_v33 }
 0xc26   : > { %v5037_v39 = vpop.eup %4103  ;;  %v2257_v40 = vmul.f32 1.442695, %v2235_v3 }
 0xc27   : > { %v2292_v25 = vsel %vm456_vm1, %v5037_v39, 0.0  ;;  %v2220_v19 = vsel %vm456_vm1, %v5046_v23, -inf  ;;  %v5058_v50 = vadd.f32 %v4257_v49, %v2164_v57 }
 0xc28   : > { %4105 = vpow2.f32 %v2257_v40  ;;  %2293 = vadd.xlane.f32.xlu0 %v2292_v25 }
 0xc29   : > { %v2226_v52 = vsel %vm456_vm1, %v5058_v50, -inf }
 0xc2b   : > { %v2204_v45 = vpop.xlane.xlu1 %2203 }
 0xc2c   : > { %v2236_v41 = vsub.f32 %v4980_v37, %v2204_v45 }
 0xc2e   : > { %v5042_v59 = vpop.eup %4105  ;;  %v2259_v44 = vmul.f32 1.442695, %v2236_v41 }
 0xc2f   : > { %v2295_v14 = vsel %vm456_vm1, %v5042_v59, 0.0 }
 0xc30   : > { %4107 = vpow2.f32 %v2259_v44  ;;  %2296 = vadd.xlane.f32.xlu0 %v2295_v14 }
 0xc33   : > { %v2207_v63 = vpop.xlane.xlu2 %2206 }
 0xc34   : > { %v2237_v28 = vsub.f32 %v4984_v42, %v2207_v63  ;;  %v2223_v42 = vsel %vm456_vm1, %v5056_v51, -inf }
 0xc36   : > { %v5050_v37 = vpop.eup %4107  ;;  %v2261_v5 = vmul.f32 1.442695, %v2237_v28 }
 0xc37   : > { %v2298_v60 = vsel %vm456_vm1, %v5050_v37, 0.0 }
 0xc38   : > { %2299 = vadd.xlane.f32.xlu1 %v2298_v60  ;;  %2221 = vmax.xlane.f32.xlu0 %v2220_v19  ;;  %4109 = vpow2.f32 %v2261_v5 }
 0xc3b   : > { %v2210_v0 = vpop.xlane.xlu0 %2209 }
 0xc3c   : > { %v2238_v18 = vsub.f32 %v4988_v46, %v2210_v0 }
 0xc3e   : > { %v2263_v4 = vmul.f32 1.442695, %v2238_v18  ;;  %v5069_v12 = vpop.eup %4109 }
 0xc3f   : > { %v2301_v21 = vsel %vm456_vm1, %v5069_v12, 0.0 }
 0xc40   : > { %4111 = vpow2.f32 %v2263_v4  ;;  %2224 = vmax.xlane.f32.xlu0 %v2223_v42  ;;  %2227 = vmax.xlane.f32.xlu1 %v2226_v52 }
 0xc41   : > { %2215 = vmax.xlane.f32.xlu2 %v2214_v36 }
 0xc43   : > { %v3945_v38 = vpop.permute.xlu1 %3944 }
 0xc44   : > { %v3946_v46 = vunpack.i.l.bf16 %v3945_v38  ;;  %v3947_v8 = vunpack.i.h.bf16 %v3945_v38 }
 0xc46   : > { %v5071_v32 = vpop.eup %4111  ;;  %2637 = vmatpush.msra.mxu0 %v3946_v46 }
 0xc47   : > { %v2304_v2 = vsel %vm456_vm1, %v5071_v32, 0.0 }
 0xc48   : > { %2638 = vmatpush.msra.mxu0 %v3947_v8  ;;  %2305 = vadd.xlane.f32.xlu0 %v2304_v2 }
 0xc49   : > { %2302 = vadd.xlane.f32.xlu2 %v2301_v21 }
 0xc53   : > { %v2219_v6 = vpop.xlane.xlu0 %2218 }
 0xc54   : > { %v2241_v29 = vsub.f32 %v4998_v24, %v2219_v6 }
 0xc56   : > { %v2269_v34 = vmul.f32 1.442695, %v2241_v29 }
 0xc58   : > { %4113 = vpow2.f32 %v2269_v34 }
 0xc5e   : > { %v5078_v47 = vpop.eup %4113 }
 0xc5f   : > { %v2313_v62 = vsel %vm456_vm1, %v5078_v47, 0.0 }
 0xc60   : > { %2314 = vadd.xlane.f32.xlu0 %v2313_v62 }
 0xc6e   : > { %v2213_v7 = vpop.xlane.xlu1 %2212 }
 0xc6f   : > { %v2239_v3 = vsub.f32 %v5003_v43, %v2213_v7 }
 0xc71   : > { %v2265_v40 = vmul.f32 1.442695, %v2239_v3 }
 0xc73   : > { %4115 = vpow2.f32 %v2265_v40  ;;  %v2279_v25 = vpop.xlane.xlu2 %2278 }
 0xc74   : > { %4117 = vrcp.f32 %v2279_v25  ;;  %v2336_v33 = vand.u32 2147483648, %v2279_v25  ;;  %v2334_v53 = vand.u32 2147483647, %v2279_v25  ;;  %vm2330_vm14 = vweird.f32 %v2279_v25 }
 0xc76   : > { %v2337_v60 = vor.u32 1.1754944e-38, %v2336_v33  ;;  %vm2335_vm2 = vcmp.eq.f32.partialorder %v2334_v53, 8.507059e+37 }
 0xc79   : > { %v5083_v13 = vpop.eup %4115 }
 0xc7a   : > { %v4118_v45 = vpop.eup %4117  ;;  %v2307_v24 = vsel %vm456_vm1, %v5083_v13, 0.0 }
 0xc7b   : > { %v2326_v41 = vmul.f32 %v4118_v45, %v2279_v25  ;;  %v3950_v48 = vpop.permute.xlu2 %3949  ;;  %2308 = vadd.xlane.f32.xlu2 %v2307_v24  ;;  %v2282_v44 = vpop.xlane.xlu0 %2281  ;;  %vm2331_vm12 = vweird.f32 %v4118_v45 }
 0xc7c   : > { %v3951_v14 = vunpack.i.l.bf16 %v3950_v48  ;;  %4119 = vrcp.f32 %v2282_v44  ;;  %v3952_v63 = vunpack.i.h.bf16 %v3950_v48  ;;  %vm2332_vm15 = vmor %vm2330_vm14, %vm2331_vm12  ;;  %v2350_v18 = vand.u32 2147483648, %v2282_v44 }
 0xc7d   : > { %v2327_v15 = vsub.f32 1.0, %v2326_v41  ;;  %v2348_v42 = vand.u32 2147483647, %v2282_v44  ;;  %vm2344_vm4 = vweird.f32 %v2282_v44 }
 0xc7e   : > { %2639 = vmatpush.msra.mxu0 %v3951_v14  ;;  %v2351_v36 = vor.u32 1.1754944e-38, %v2350_v18 }
 0xc7f   : > { %v2328_v43 = vmul.f32 %v4118_v45, %v2327_v15  ;;  %vm2349_vm6 = vcmp.eq.f32.partialorder %v2348_v42, 8.507059e+37 }
 0xc80   : > { %2640 = vmatpush.msra.mxu0 %v3952_v63 }
 0xc81   : > { %v2329_v19 = vadd.f32 %v4118_v45, %v2328_v43 }
 0xc82   : > { %v4120_v57 = vpop.eup %4119 }
 0xc83   : > { %v2333_v28 = vsel %vm2332_vm15, %v4118_v45, %v2329_v19  ;;  %v2340_v30 = vmul.f32 %v4120_v57, %v2282_v44  ;;  %v2285_v26 = vpop.xlane.xlu0 %2284  ;;  %vm2345_vm3 = vweird.f32 %v4120_v57 }
 0xc84   : > { %v2338_v49 = vsel %vm2335_vm2, %v2337_v60, %v2333_v28  ;;  %4121 = vrcp.f32 %v2285_v26  ;;  %vm2346_vm5 = vmor %vm2344_vm4, %vm2345_vm3  ;;  %v2364_v29 = vand.u32 2147483648, %v2285_v26  ;;  %v2362_v34 = vand.u32 2147483647, %v2285_v26 }
 0xc85   : > { %v2341_v0 = vsub.f32 1.0, %v2340_v30  ;;  %v2549_v5 = vmul.f32 %v5008_v58, %v2338_v49  ;;  %vm2358_vm8 = vweird.f32 %v2285_v26 }
 0xc86   : > { %v2365_v3 = vor.u32 1.1754944e-38, %v2364_v29  ;;  %vm2363_vm10 = vcmp.eq.f32.partialorder %v2362_v34, 8.507059e+37 }
 0xc87   : > { %v2342_v22 = vmul.f32 %v4120_v57, %v2341_v0  ;;  %3794 = vmatmul.msk.f32.vlgmr.msra.gmra.mxu0 %vm456_vm1, %v2549_v5 }
 0xc89   : > { %v2343_v52 = vadd.f32 %v4120_v57, %v2342_v22 }
 0xc8a   : > { %v4122_v4 = vpop.eup %4121 }
 0xc8b   : > { %v2354_v38 = vmul.f32 %v4122_v4, %v2285_v26  ;;  %v2288_v46 = vpop.xlane.xlu0 %2287  ;;  %v2347_v8 = vsel %vm2346_vm5, %v4120_v57, %v2343_v52  ;;  %vm2359_vm7 = vweird.f32 %v4122_v4 }
 0xc8c   : > { %4123 = vrcp.f32 %v2288_v46  ;;  %v2352_v2 = vsel %vm2349_vm6, %v2351_v36, %v2347_v8  ;;  %vm2360_vm9 = vmor %vm2358_vm8, %vm2359_vm7  ;;  %v2378_v44 = vand.u32 2147483648, %v2288_v46  ;;  %v2376_v14 = vand.u32 2147483647, %v2288_v46 }
 0xc8d   : > { %v2355_v21 = vsub.f32 1.0, %v2354_v38  ;;  %v2550_v58 = vmul.f32 %v5013_v1, %v2352_v2  ;;  %vm2372_vm12 = vweird.f32 %v2288_v46 }
 0xc8e   : > { %v2379_v63 = vor.u32 1.1754944e-38, %v2378_v44  ;;  %vm2377_vm15 = vcmp.eq.f32.partialorder %v2376_v14, 8.507059e+37 }
 0xc8f   : > { %v2356_v6 = vmul.f32 %v4122_v4, %v2355_v21  ;;  %3795 = vmatmul.msk.f32.gmra.mxu0 %vm456_vm1, %v2550_v58 }
 0xc91   : > { %v2357_v62 = vadd.f32 %v4122_v4, %v2356_v6 }
 0xc92   : > { %v4124_v7 = vpop.eup %4123 }
 0xc93   : > { %v2368_v40 = vmul.f32 %v4124_v7, %v2288_v46  ;;  %v2291_v25 = vpop.xlane.xlu0 %2290  ;;  %v2361_v45 = vsel %vm2360_vm9, %v4122_v4, %v2357_v62  ;;  %vm2373_vm11 = vweird.f32 %v4124_v7 }
 0xc94   : > { %4125 = vrcp.f32 %v2291_v25  ;;  %v2366_v41 = vsel %vm2363_vm10, %v2365_v3, %v2361_v45  ;;  %vm2374_vm14 = vmor %vm2372_vm12, %vm2373_vm11  ;;  %v2392_v30 = vand.u32 2147483648, %v2291_v25  ;;  %v2390_v26 = vand.u32 2147483647, %v2291_v25 }
 0xc95   : > { %v2369_v24 = vsub.f32 1.0, %v2368_v40  ;;  %v2551_v1 = vmul.f32 %v5018_v9, %v2366_v41  ;;  %vm2386_vm3 = vweird.f32 %v2291_v25 }
 0xc96   : > { %v2393_v5 = vor.u32 1.1754944e-38, %v2392_v30  ;;  %vm2391_vm5 = vcmp.eq.f32.partialorder %v2390_v26, 8.507059e+37 }
 0xc97   : > { %v2370_v48 = vmul.f32 %v4124_v7, %v2369_v24  ;;  %3796 = vmatmul.msk.f32.gmra.mxu0 %vm456_vm1, %v2551_v1 }
 0xc99   : > { %v2371_v15 = vadd.f32 %v4124_v7, %v2370_v48 }
 0xc9a   : > { %v4126_v33 = vpop.eup %4125 }
 0xc9b   : > { %v2382_v43 = vmul.f32 %v4126_v33, %v2291_v25  ;;  %v2294_v53 = vpop.xlane.xlu0 %2293  ;;  %v2375_v19 = vsel %vm2374_vm14, %v4124_v7, %v2371_v15  ;;  %vm2387_vm2 = vweird.f32 %v4126_v33 }
 0xc9c   : > { %4127 = vrcp.f32 %v2294_v53  ;;  %v2380_v60 = vsel %vm2377_vm15, %v2379_v63, %v2375_v19  ;;  %vm2388_vm4 = vmor %vm2386_vm3, %vm2387_vm2  ;;  %v2406_v38 = vand.u32 2147483648, %v2294_v53  ;;  %v2404_v46 = vand.u32 2147483647, %v2294_v53 }
 0xc9d   : > { %v2383_v57 = vsub.f32 1.0, %v2382_v43  ;;  %v2552_v9 = vmul.f32 %v5023_v17, %v2380_v60  ;;  %vm2400_vm7 = vweird.f32 %v2294_v53 }
 0xc9e   : > { %v2407_v21 = vor.u32 1.1754944e-38, %v2406_v38  ;;  %vm2405_vm9 = vcmp.eq.f32.partialorder %v2404_v46, 8.507059e+37 }
 0xc9f   : > { %v2384_v28 = vmul.f32 %v4126_v33, %v2383_v57  ;;  %3797 = vmatmul.msk.f32.gmra.mxu0 %vm456_vm1, %v2552_v9 }
 0xca1   : > { %v2385_v49 = vadd.f32 %v4126_v33, %v2384_v28 }
 0xca2   : > { %v4128_v0 = vpop.eup %4127 }
 0xca3   : > { %v2396_v18 = vmul.f32 %v4128_v0, %v2294_v53  ;;  %v2297_v22 = vpop.xlane.xlu0 %2296  ;;  %v2389_v42 = vsel %vm2388_vm4, %v4126_v33, %v2385_v49  ;;  %vm2401_vm6 = vweird.f32 %v4128_v0 }
 0xca4   : > { %4129 = vrcp.f32 %v2297_v22  ;;  %v2394_v4 = vsel %vm2391_vm5, %v2393_v5, %v2389_v42  ;;  %vm2402_vm8 = vmor %vm2400_vm7, %vm2401_vm6  ;;  %v2420_v3 = vand.u32 2147483648, %v2297_v22  ;;  %v2418_v45 = vand.u32 2147483647, %v2297_v22 }
 0xca5   : > { %v2397_v52 = vsub.f32 1.0, %v2396_v18  ;;  %v2553_v17 = vmul.f32 %v5032_v10, %v2394_v4  ;;  %vm2414_vm11 = vweird.f32 %v2297_v22 }
 0xca6   : > { %v2421_v48 = vor.u32 1.1754944e-38, %v2420_v3  ;;  %vm2419_vm14 = vcmp.eq.f32.partialorder %v2418_v45, 8.507059e+37 }
 0xca7   : > { %v2398_v36 = vmul.f32 %v4128_v0, %v2397_v52  ;;  %3798 = vmatmul.msk.f32.gmra.mxu0 %vm456_vm1, %v2553_v17 }
 0xca9   : > { %v2399_v8 = vadd.f32 %v4128_v0, %v2398_v36 }
 0xcaa   : > { %v4130_v2 = vpop.eup %4129 }
 0xcab   : > { %v2410_v58 = vmul.f32 %v4130_v2, %v2297_v22  ;;  %v2300_v6 = vpop.xlane.xlu1 %2299  ;;  %v2222_v29 = vpop.xlane.xlu0 %2221  ;;  %v2403_v34 = vsel %vm2402_vm8, %v4128_v0, %v2399_v8  ;;  %vm2415_vm10 = vweird.f32 %v4130_v2 }
 0xcac   : > { %4131 = vrcp.f32 %v2300_v6  ;;  %v2242_v10 = vsub.f32 %v5046_v23, %v2222_v29  ;;  %v2408_v7 = vsel %vm2405_vm9, %v2407_v21, %v2403_v34  ;;  %vm2416_vm12 = vmor %vm2414_vm11, %vm2415_vm10  ;;  %v2434_v30 = vand.u32 2147483648, %v2300_v6 }
 0xcad   : > { %v2411_v62 = vsub.f32 1.0, %v2410_v58  ;;  %v2554_v40 = vmul.f32 %v5037_v39, %v2408_v7  ;;  %vm2428_vm2 = vweird.f32 %v2300_v6  ;;  %v2432_v0 = vand.u32 2147483647, %v2300_v6 }
 0xcae   : > { %v2271_v24 = vmul.f32 1.442695, %v2242_v10  ;;  %v2435_v5 = vor.u32 1.1754944e-38, %v2434_v30 }
 0xcaf   : > { %v2412_v25 = vmul.f32 %v4130_v2, %v2411_v62  ;;  %3799 = vmatmul.msk.f32.gmra.mxu0 %vm456_vm1, %v2554_v40  ;;  %vm2433_vm4 = vcmp.eq.f32.partialorder %v2432_v0, 8.507059e+37 }
 0xcb0   : > { %4133 = vpow2.f32 %v2271_v24 }
 0xcb1   : > { %v2413_v41 = vadd.f32 %v4130_v2, %v2412_v25 }
 0xcb2   : > { %v4132_v1 = vpop.eup %4131 }
 0xcb3   : > { %v2424_v44 = vmul.f32 %v4132_v1, %v2300_v6  ;;  %v2225_v14 = vpop.xlane.xlu0 %2224  ;;  %v2228_v23 = vpop.xlane.xlu1 %2227  ;;  %v2417_v15 = vsel %vm2416_vm12, %v4130_v2, %v2413_v41  ;;  %vm2429_vm15 = vweird.f32 %v4132_v1 }
 0xcb4   : > { %v2244_v33 = vsub.f32 %v5058_v50, %v2228_v23  ;;  %v2216_v39 = vpop.xlane.xlu2 %2215  ;;  %v2422_v63 = vsel %vm2419_vm14, %v2421_v48, %v2417_v15  ;;  %v2243_v26 = vsub.f32 %v5056_v51, %v2225_v14  ;;  %vm2430_vm3 = vmor %vm2428_vm2, %vm2429_vm15 }
 0xcb5   : > { %v2425_v43 = vsub.f32 1.0, %v2424_v44  ;;  %v2240_v53 = vsub.f32 %v5061_v61, %v2216_v39  ;;  %v2555_v19 = vmul.f32 %v5042_v59, %v2422_v63 }
 0xcb6   : > { %v2275_v57 = vmul.f32 1.442695, %v2244_v33  ;;  %v5103_v60 = vpop.eup %4133  ;;  %v2273_v18 = vmul.f32 1.442695, %v2243_v26 }
 0xcb7   : > { %v2426_v9 = vmul.f32 %v4132_v1, %v2425_v43  ;;  %v2267_v28 = vmul.f32 1.442695, %v2240_v53  ;;  %3800 = vmatmul.msk.f32.gmra.mxu0 %vm456_vm1, %v2555_v19  ;;  %v2316_v50 = vsel %vm456_vm1, %v5103_v60, 0.0 }
 0xcb8   : > { %4135 = vpow2.f32 %v2275_v57  ;;  %2317 = vadd.xlane.f32.xlu2 %v2316_v50 }
 0xcb9   : > { %v2427_v49 = vadd.f32 %v4132_v1, %v2426_v9  ;;  %4137 = vpow2.f32 %v2267_v28 }
 0xcbb   : > { %v2306_v59 = vpop.xlane.xlu0 %2305  ;;  %v2431_v61 = vsel %vm2430_vm3, %v4132_v1, %v2427_v49 }
 0xcbc   : > { %4139 = vrcp.f32 %v2306_v59  ;;  %v2303_v22 = vpop.xlane.xlu2 %2302  ;;  %v2436_v51 = vsel %vm2433_vm4, %v2435_v5, %v2431_v61  ;;  %v2462_v45 = vand.u32 2147483648, %v2306_v59  ;;  %vm2456_vm10 = vweird.f32 %v2306_v59  ;;  %v4260_v5 = vld [vmem:[#allocation2 + $0x120] sm:$0xff] }
 0xcbd   : > { %4141 = vrcp.f32 %v2303_v22  ;;  %v2556_v52 = vmul.f32 %v5050_v37, %v2436_v51  ;;  %v2448_v6 = vand.u32 2147483648, %v2303_v22  ;;  %v2446_v62 = vand.u32 2147483647, %v2303_v22 }
 0xcbe   : > { %v5109_v42 = vpop.eup %4135  ;;  %4143 = vpow2.f32 %v2273_v18  ;;  %vm2442_vm6 = vweird.f32 %v2303_v22  ;;  %v2460_v41 = vand.u32 2147483647, %v2306_v59  ;;  %v2463_v44 = vor.u32 1.1754944e-38, %v2462_v45 }
 0xcbf   : > { %v5112_v4 = vpop.eup %4137  ;;  %v2322_v17 = vsel %vm456_vm1, %v5109_v42, 0.0  ;;  %3801 = vmatmul.msk.f32.gmra.mxu0 %vm456_vm1, %v2556_v52  ;;  %v2449_v3 = vor.u32 1.1754944e-38, %v2448_v6  ;;  %vm2447_vm9 = vcmp.eq.f32.partialorder %v2446_v62, 8.507059e+37 }
 0xcc0   : > { %2323 = vadd.xlane.f32.xlu0 %v2322_v17  ;;  %v2310_v36 = vsel %vm456_vm1, %v5112_v4, 0.0  ;;  %vm2461_vm12 = vcmp.eq.f32.partialorder %v2460_v41, 8.507059e+37 }
 0xcc1   : > { %2311 = vadd.xlane.f32.xlu1 %v2310_v36 }
 0xcc2   : > { %v4140_v38 = vpop.eup %4139 }
 0xcc3   : > { %v4142_v46 = vpop.eup %4141  ;;  %v2452_v8 = vmul.f32 %v4140_v38, %v2306_v59  ;;  %vm2457_vm8 = vweird.f32 %v4140_v38  ;;  %v4259_v59 = vld [vmem:[#allocation2 + $0x100] sm:$0xff] }
 0xcc4   : > { %v2438_v2 = vmul.f32 %v4142_v46, %v2303_v22  ;;  %v5119_v58 = vpop.eup %4143  ;;  %vm2443_vm5 = vweird.f32 %v4142_v46  ;;  %vm2458_vm11 = vmor %vm2456_vm10, %vm2457_vm8 }
 0xcc5   : > { %v2453_v21 = vsub.f32 1.0, %v2452_v8  ;;  %v2319_v10 = vsel %vm456_vm1, %v5119_v58, 0.0  ;;  %vm2444_vm7 = vmor %vm2442_vm6, %vm2443_vm5 }
 0xcc6   : > { %v2439_v37 = vsub.f32 1.0, %v2438_v2  ;;  %v4262_v2 = vld [vmem:[#allocation2 + $0x130] sm:$0xff] }
 0xcc7   : > { %v2454_v29 = vmul.f32 %v4140_v38, %v2453_v21 }
 0xcc8   : > { %v2440_v34 = vmul.f32 %v4142_v46, %v2439_v37 }
 0xcc9   : > { %2320 = vadd.xlane.f32.xlu1 %v2319_v10  ;;  %v2455_v40 = vadd.f32 %v4140_v38, %v2454_v29 }
 0xcca   : > { %v2441_v7 = vadd.f32 %v4142_v46, %v2440_v34 }
 0xccb   : > { %v2459_v48 = vsel %vm2458_vm11, %v4140_v38, %v2455_v40 }
 0xccc   : > { %v2445_v25 = vsel %vm2444_vm7, %v4142_v46, %v2441_v7  ;;  %v2464_v14 = vsel %vm2461_vm12, %v2463_v44, %v2459_v48  ;;  %v4261_v46 = vld [vmem:[#allocation2 + $0x110] sm:$0xff] }
 0xccd   : > { %v2450_v24 = vsel %vm2447_vm9, %v2449_v3, %v2445_v25  ;;  %v2558_v23 = vmul.f32 %v5071_v32, %v2464_v14 }
 0xcce   : > { %v2557_v1 = vmul.f32 %v5069_v12, %v2450_v24 }
 0xcd0   : > { %3802 = vmatmul.msk.f32.gmra.mxu0 %vm456_vm1, %v2557_v1 }
 0xcd3   : > { %v2315_v51 = vpop.xlane.xlu0 %2314 }
 0xcd4   : > { %vm2498_vm9 = vweird.f32 %v2315_v51 }
 0xcd8   : > { %3803 = vmatmul.msk.f32.gmra.mxu0 %vm456_vm1, %v2558_v23 }
 0xcee   : > { %v2309_v15 = vpop.xlane.xlu2 %2308 }
 0xcef   : > { %4145 = vrcp.f32 %v2309_v15  ;;  %v2476_v43 = vand.u32 2147483648, %v2309_v15  ;;  %v2474_v12 = vand.u32 2147483647, %v2309_v15  ;;  %vm2470_vm15 = vweird.f32 %v2309_v15 }
 0xcf0   : > { %4147 = vrcp.f32 %v2315_v51 }
 0xcf1   : > { %v2477_v57 = vor.u32 1.1754944e-38, %v2476_v43  ;;  %vm2475_vm3 = vcmp.eq.f32.partialorder %v2474_v12, 8.507059e+37  ;;  %v2502_v43 = vand.u32 2147483647, %v2315_v51 }
 0xcf3   : > { %vm2503_vm11 = vcmp.eq.f32.partialorder %v2502_v43, 8.507059e+37 }
 0xcf5   : > { %v4146_v33 = vpop.eup %4145 }
 0xcf6   : > { %v2466_v39 = vmul.f32 %v4146_v33, %v2309_v15  ;;  %vm2471_vm14 = vweird.f32 %v4146_v33  ;;  %v4148_v17 = vpop.eup %4147 }
 0xcf7   : > { %vm2472_vm2 = vmor %vm2470_vm15, %vm2471_vm14  ;;  %v2494_v37 = vmul.f32 %v4148_v17, %v2315_v51  ;;  %vm2499_vm6 = vweird.f32 %v4148_v17 }
 0xcf8   : > { %v2467_v63 = vsub.f32 1.0, %v2466_v39  ;;  %v2504_v39 = vand.u32 2147483648, %v2315_v51  ;;  %vm2500_vm10 = vmor %vm2498_vm9, %vm2499_vm6 }
 0xcf9   : > { %v2495_v34 = vsub.f32 1.0, %v2494_v37 }
 0xcfa   : > { %v2468_v53 = vmul.f32 %v4146_v33, %v2467_v63 }
 0xcfb   : > { %v2496_v40 = vmul.f32 %v4148_v17, %v2495_v34 }
 0xcfc   : > { %v2469_v19 = vadd.f32 %v4146_v33, %v2468_v53 }
 0xcfd   : > { %v2497_v44 = vadd.f32 %v4148_v17, %v2496_v40 }
 0xcfe   : > { %v2473_v9 = vsel %vm2472_vm2, %v4146_v33, %v2469_v19 }
 0xcff   : > { %v2478_v28 = vsel %vm2475_vm3, %v2477_v57, %v2473_v9  ;;  %v2501_v57 = vsel %vm2500_vm10, %v4148_v17, %v2497_v44  ;;  %v2505_v9 = vor.u32 1.1754944e-38, %v2504_v39  ;;  %v4265_v39 = vld [vmem:[#allocation2 + $0x140] sm:$0xff] }
 0xd00   : > { %v2559_v32 = vmul.f32 %v5083_v13, %v2478_v28 }
 0xd01   : > { %v2506_v28 = vsel %vm2503_vm11, %v2505_v9, %v2501_v57 }
 0xd02   : > { %3804 = vmatmul.msk.f32.gmra.mxu0 %vm456_vm1, %v2559_v32 }
 0xd04   : > { %v2642_v30 = vpop.f32.mrf.mxu0 }
 0xd05   : > { %v2690_v61 = vmul.f32 %v4259_v59, %v2642_v30  ;;  %v2561_v59 = vmul.f32 %v5078_v47, %v2506_v28 }
 0xd0c   : > { %v5129_v26 = vpop.f32.mrf.mxu0 }
 0xd14   : > { %v2648_v50 = vpop.f32.mrf.mxu0 }
 0xd15   : > { %v2692_v8 = vmul.f32 %v4261_v46, %v2648_v50 }
 0xd1c   : > { %v5131_v49 = vpop.f32.mrf.mxu0 }
 0xd24   : > { %v2654_v0 = vpop.f32.mrf.mxu0 }
 0xd25   : > { %v2694_v18 = vmul.f32 %v4260_v5, %v2654_v0 }
 0xd27   : > { %v5133_v22 = vadd.f32 %v2694_v18, %v2690_v61 }
 0xd2b   : > { %v5137_v13 = vpop.xlane.xlu2 %2317 }
 0xd2c   : > { %v5135_v52 = vpop.f32.mrf.mxu0  ;;  %v2518_v0 = vand.u32 2147483648, %v5137_v13  ;;  %vm2512_vm14 = vweird.f32 %v5137_v13 }
 0xd2e   : > { %v2519_v51 = vor.u32 1.1754944e-38, %v2518_v0 }
 0xd33   : > { %v2324_v23 = vpop.xlane.xlu0 %2323 }
 0xd34   : > { %v2660_v36 = vpop.f32.mrf.mxu0  ;;  %v2312_v38 = vpop.xlane.xlu1 %2311  ;;  %v2546_v34 = vand.u32 2147483648, %v2324_v23 }
 0xd35   : > { %v2696_v21 = vmul.f32 %v4262_v2, %v2660_v36  ;;  %4149 = vrcp.f32 %v2312_v38  ;;  %v2490_v25 = vand.u32 2147483648, %v2312_v38  ;;  %v2488_v41 = vand.u32 2147483647, %v2312_v38 }
 0xd36   : > { %4151 = vrcp.f32 %v5137_v13  ;;  %vm2484_vm5 = vweird.f32 %v2312_v38 }
 0xd37   : > { %v5140_v6 = vadd.f32 %v2696_v21, %v2692_v8  ;;  %v2491_v48 = vor.u32 1.1754944e-38, %v2490_v25  ;;  %vm2489_vm8 = vcmp.eq.f32.partialorder %v2488_v41, 8.507059e+37  ;;  %v3877_v41 = vld [vmem:[#allocation4 + $0x78] sm:$0xff] }
 0xd38   : > { %2750 = vmatpush.bf16.msrb.mxu1 %v3877_v41 }
 0xd3b   : > { %v4150_v29 = vpop.eup %4149 }
 0xd3c   : > { %v2480_v62 = vmul.f32 %v4150_v29, %v2312_v38  ;;  %v5142_v10 = vpop.xlane.xlu1 %2320  ;;  %v4152_v7 = vpop.eup %4151  ;;  %vm2485_vm4 = vweird.f32 %v4150_v29 }
 0xd3d   : > { %4153 = vrcp.f32 %v5142_v10  ;;  %v2508_v45 = vmul.f32 %v4152_v7, %v5137_v13  ;;  %vm2486_vm7 = vmor %vm2484_vm5, %vm2485_vm4  ;;  %vm2513_vm12 = vweird.f32 %v4152_v7  ;;  %v2532_v46 = vand.u32 2147483648, %v5142_v10  ;;  %v2663_v25 = vpop.f32.mrf.mxu0 }
 0xd3e   : > { %v2481_v3 = vsub.f32 1.0, %v2480_v62  ;;  %4155 = vrcp.f32 %v2324_v23  ;;  %vm2514_vm15 = vmor %vm2512_vm14, %vm2513_vm12  ;;  %vm2526_vm4 = vweird.f32 %v5142_v10  ;;  %v2544_v62 = vand.u32 2147483647, %v2324_v23 }
 0xd3f   : > { %v2509_v14 = vsub.f32 1.0, %v2508_v45  ;;  %v2533_v21 = vor.u32 1.1754944e-38, %v2532_v46 }
 0xd40   : > { %v2482_v24 = vmul.f32 %v4150_v29, %v2481_v3  ;;  %vm2545_vm10 = vcmp.eq.f32.partialorder %v2544_v62, 8.507059e+37  ;;  %v3964_v62 = vld [vmem:[#allocation6 + $0x50] ss:$0 sm:$0xff] }
 0xd41   : > { %v2510_v12 = vmul.f32 %v4152_v7, %v2509_v14  ;;  %v4263_v14 = vld [vmem:[#allocation2 + $0x128] sm:$0xff] }
 0xd42   : > { %v2483_v1 = vadd.f32 %v4150_v29, %v2482_v24 }
 0xd43   : > { %v4154_v33 = vpop.eup %4153  ;;  %v2511_v32 = vadd.f32 %v4152_v7, %v2510_v12  ;;  %v4267_v12 = vld [vmem:[#allocation2 + $0x160] sm:$0xff] }
 0xd44   : > { %v2487_v15 = vsel %vm2486_vm7, %v4150_v29, %v2483_v1  ;;  %v2522_v19 = vmul.f32 %v4154_v33, %v5142_v10  ;;  %v4156_v50 = vpop.eup %4155  ;;  %vm2527_vm3 = vweird.f32 %v4154_v33  ;;  %v3876_v1 = vld [vmem:[#allocation4 + $0x70] sm:$0xff] }
 0xd45   : > { %v2492_v63 = vsel %vm2489_vm8, %v2491_v48, %v2487_v15  ;;  %v2536_v61 = vmul.f32 %v4156_v50, %v2324_v23  ;;  %v2515_v18 = vsel %vm2514_vm15, %v4152_v7, %v2511_v32  ;;  %vm2528_vm5 = vmor %vm2526_vm4, %vm2527_vm3  ;;  %vm2541_vm7 = vweird.f32 %v4156_v50  ;;  %2751 = vmatpush.bf16.msrb.mxu1 %v3876_v1  ;;  %v4264_v15 = vld [vmem:[#allocation2 + $0x108] sm:$0xff] }
 0xd46   : > { %v2560_v53 = vmul.f32 %v5112_v4, %v2492_v63  ;;  %v2523_v30 = vsub.f32 1.0, %v2522_v19  ;;  %v2516_v4 = vand.u32 2147483647, %v5137_v13  ;;  %v2530_v13 = vand.u32 2147483647, %v5142_v10  ;;  %v4266_v63 = vld [vmem:[#allocation2 + $0x148] sm:$0xff] }
 0xd47   : > { %v2537_v36 = vsub.f32 1.0, %v2536_v61  ;;  %vm2540_vm8 = vweird.f32 %v2324_v23  ;;  %v2695_v23 = vmul.f32 %v4263_v14, %v5135_v52  ;;  %v4268_v32 = vld [vmem:[#allocation2 + $0x168] sm:$0xff]  ;;  %v4270_v61 = vld [vmem:[#allocation2 + $0x118] sm:$0xff]  ;;  %v3821_v14 = vmul.f32 -1.442695, %v4894_v54 }
 0xd48   : > { %3805 = vmatmul.msk.f32.gmra.mxu0 %vm456_vm1, %v2560_v53  ;;  %v2524_v5 = vmul.f32 %v4154_v33, %v2523_v30  ;;  %vm2517_vm2 = vcmp.eq.f32.partialorder %v2516_v4, 8.507059e+37  ;;  %vm2531_vm6 = vcmp.eq.f32.partialorder %v2530_v13, 8.507059e+37  ;;  %vm2542_vm9 = vmor %vm2540_vm8, %vm2541_vm7 }
 0xd49   : > { %v2520_v17 = vsel %vm2517_vm2, %v2519_v51, %v2515_v18  ;;  %v2538_v8 = vmul.f32 %v4156_v50, %v2537_v36  ;;  %v4271_v18 = vld [vmem:[#allocation2 + $0x150] sm:$0xff] }
 0xd4a   : > { %v2525_v38 = vadd.f32 %v4154_v33, %v2524_v5  ;;  %v2562_v47 = vmul.f32 %v5103_v60, %v2520_v17  ;;  %v2547_v60 = vor.u32 1.1754944e-38, %v2546_v34  ;;  %v2693_v5 = vmul.f32 %v4270_v61, %v5131_v49  ;;  %v4272_v17 = vld [vmem:[#allocation2 + $0x158] sm:$0xff] }
 0xd4b   : > { %v2539_v29 = vadd.f32 %v4156_v50, %v2538_v8 }
 0xd4c   : > { %v2529_v2 = vsel %vm2528_vm5, %v4154_v33, %v2525_v38  ;;  %v2691_v33 = vmul.f32 %v4264_v15, %v5129_v26  ;;  %v4269_v26 = vld [vmem:[#allocation2 + $0x138] sm:$0xff] }
 0xd4d   : > { %v2534_v37 = vsel %vm2531_vm6, %v2533_v21, %v2529_v2  ;;  %v2543_v10 = vsel %vm2542_vm9, %v4156_v50, %v2539_v29  ;;  %v2666_v45 = vpop.f32.mrf.mxu0  ;;  %v4274_v2 = vld [vmem:[#allocation2 + $0x178] sm:$0xff] }
 0xd4e   : > { %v2563_v7 = vmul.f32 %v5119_v58, %v2534_v37  ;;  %v2548_v3 = vsel %vm2545_vm10, %v2547_v60, %v2543_v10  ;;  %v2707_v53 = vadd.f32 %v2695_v23, %v2691_v33 }
 0xd4f   : > { %v2564_v40 = vmul.f32 %v5109_v42, %v2548_v3  ;;  %v2698_v42 = vmul.f32 %v4265_v39, %v2666_v45  ;;  %v3820_v45 = vmul.f32 -1.442695, %v4892_v16  ;;  %v3822_v16 = vmul.f32 -1.442695, %v4900_v31 }
 0xd50   : > { %3806 = vmatmul.msk.f32.gmra.mxu0 %vm456_vm1, %v2561_v59  ;;  %v2697_v59 = vmul.f32 %v4269_v26, %v2663_v25 }
 0xd51   : > { %v2710_v9 = vadd.f32 %v5133_v22, %v2698_v42  ;;  %v4273_v22 = vld [vmem:[#allocation2 + $0x170] sm:$0xff]  ;;  %4157 = vpow2.f32 %v3820_v45 }
 0xd52   : > { %v2709_v38 = vadd.f32 %v2697_v59, %v2693_v5 }
 0xd55   : > { %v2669_v24 = vpop.f32.mrf.mxu0 }
 0xd56   : > { %v2699_v43 = vmul.f32 %v4266_v63, %v2669_v24 }
 0xd57   : > { %v4158_v24 = vpop.eup %4157 }
 0xd58   : > { %3807 = vmatmul.msk.f32.gmra.mxu0 %vm456_vm1, %v2562_v47  ;;  %v2711_v28 = vadd.f32 %v2707_v53, %v2699_v43  ;;  %v2775_v41 = vadd.f32 1.0, %v4158_v24 }
 0xd5a   : > { %4159 = vrcp.f32 %v2775_v41  ;;  %v2790_v42 = vand.u32 2147483648, %v2775_v41  ;;  %vm2784_vm12 = vweird.f32 %v2775_v41  ;;  %v2788_v63 = vand.u32 2147483647, %v2775_v41 }
 0xd5c   : > { %v2791_v53 = vor.u32 1.1754944e-38, %v2790_v42  ;;  %vm2789_vm15 = vcmp.eq.f32.partialorder %v2788_v63, 8.507059e+37 }
 0xd60   : > { %3808 = vmatmul.msk.f32.gmra.mxu0 %vm456_vm1, %v2563_v7  ;;  %v4160_v1 = vpop.eup %4159 }
 0xd61   : > { %vm2785_vm11 = vweird.f32 %v4160_v1 }
 0xd62   : > { %vm2786_vm14 = vmor %vm2784_vm12, %vm2785_vm11 }
 0xd68   : > { %3809 = vmatmul.msk.f32.gmra.mxu0 %vm456_vm1, %v2564_v40 }
 0xd7f   : > { %v2672_v48 = vpop.f32.mrf.mxu0 }
 0xd80   : > { %v2700_v51 = vmul.f32 %v4271_v18, %v2672_v48  ;;  %v3823_v48 = vmul.f32 -1.442695, %v4904_v35 }
 0xd82   : > { %v2712_v47 = vadd.f32 %v5140_v6, %v2700_v51  ;;  %4161 = vpow2.f32 %v3823_v48 }
 0xd83   : > { %4163 = vpow2.f32 %v3821_v14 }
 0xd88   : > { %v4162_v23 = vpop.eup %4161 }
 0xd89   : > { %v2778_v33 = vadd.f32 1.0, %v4162_v23  ;;  %v4164_v43 = vpop.eup %4163 }
 0xd8b   : > { %4165 = vrcp.f32 %v2778_v33  ;;  %v2835_v61 = vand.u32 2147483648, %v2778_v33  ;;  %vm2829_vm3 = vweird.f32 %v2778_v33  ;;  %v2833_v5 = vand.u32 2147483647, %v2778_v33 }
 0xd8c   : > { %4167 = vpow2.f32 %v3822_v16 }
 0xd8d   : > { %vm2834_vm5 = vcmp.eq.f32.partialorder %v2833_v5, 8.507059e+37  ;;  %v3879_v5 = vld [vmem:[#allocation4 + $0x68] sm:$0xff] }
 0xd8e   : > { %3011 = vmatpush.bf16.msra.mxu1 %v3879_v5 }
 0xdc5   : > { %v2675_v58 = vpop.f32.mrf.mxu0 }
 0xdc6   : > { %v2701_v36 = vmul.f32 %v4272_v17, %v2675_v58  ;;  %v2780_v58 = vmul.f32 %v4160_v1, %v2775_v41 }
 0xdc8   : > { %v2713_v8 = vadd.f32 %v2709_v38, %v2701_v36  ;;  %v2836_v36 = vor.u32 1.1754944e-38, %v2835_v61 }
 0xdcd   : > { %v2678_v44 = vpop.f32.mrf.mxu0 }
 0xdce   : > { %v2702_v19 = vmul.f32 %v4267_v12, %v2678_v44  ;;  %v2781_v44 = vsub.f32 1.0, %v2780_v58  ;;  %v2776_v12 = vadd.f32 1.0, %v4164_v43 }
 0xdd0   : > { %v2714_v50 = vadd.f32 %v2710_v9, %v2702_v19  ;;  %v2782_v15 = vmul.f32 %v4160_v1, %v2781_v44  ;;  %v4166_v9 = vpop.eup %4165  ;;  %4169 = vrcp.f32 %v2776_v12  ;;  %vm2799_vm7 = vweird.f32 %v2776_v12 }
 0xdd1   : > { %vm2830_vm2 = vweird.f32 %v4166_v9 }
 0xdd2   : > { %v2783_v39 = vadd.f32 %v4160_v1, %v2782_v15  ;;  %vm2831_vm4 = vmor %vm2829_vm3, %vm2830_vm2 }
 0xdd4   : > { %v2787_v35 = vsel %vm2786_vm14, %v4160_v1, %v2783_v39 }
 0xdd5   : > { %v2681_v57 = vpop.f32.mrf.mxu0  ;;  %v2792_v54 = vsel %vm2789_vm15, %v2791_v53, %v2787_v35 }
 0xdd6   : > { %v2703_v30 = vmul.f32 %v4268_v32, %v2681_v57  ;;  %v2825_v32 = vmul.f32 %v4166_v9, %v2778_v33 }
 0xdd8   : > { %v2715_v0 = vadd.f32 %v2711_v28, %v2703_v30  ;;  %v4168_v28 = vpop.eup %4167  ;;  %v2826_v30 = vsub.f32 1.0, %v2825_v32 }
 0xdd9   : > { %v2777_v31 = vadd.f32 1.0, %v4168_v28 }
 0xdda   : > { %v2723_v4 = vpack.c.bf16 %v2715_v0, %v2714_v50  ;;  %v4170_v50 = vpop.eup %4169  ;;  %v2827_v0 = vmul.f32 %v4166_v9, %v2826_v30 }
 0xddb   : > { %4171 = vrcp.f32 %v2777_v31  ;;  %vm2800_vm6 = vweird.f32 %v4170_v50  ;;  %vm2814_vm11 = vweird.f32 %v2777_v31 }
 0xddc   : > { %3818 = vmatmul.msk.bf16.vlgmr.msrb.gmra.mxu1 %vm456_vm1, %v2723_v4  ;;  %v2795_v4 = vmul.f32 %v4170_v50, %v2776_v12  ;;  %vm2801_vm8 = vmor %vm2799_vm7, %vm2800_vm6 }
 0xddd   : > { %v2684_v52 = vpop.f32.mrf.mxu0 }
 0xdde   : > { %v2704_v46 = vmul.f32 %v4273_v22, %v2684_v52  ;;  %v2828_v52 = vadd.f32 %v4166_v9, %v2827_v0  ;;  %v2796_v26 = vsub.f32 1.0, %v2795_v4 }
 0xde0   : > { %v2716_v37 = vadd.f32 %v2712_v47, %v2704_v46  ;;  %v2832_v18 = vsel %vm2831_vm4, %v4166_v9, %v2828_v52  ;;  %v2797_v51 = vmul.f32 %v4170_v50, %v2796_v26 }
 0xde1   : > { %v4172_v59 = vpop.eup %4171  ;;  %v2837_v38 = vsel %vm2834_vm5, %v2836_v36, %v2832_v18 }
 0xde2   : > { %v2810_v17 = vmul.f32 %v4172_v59, %v2777_v31  ;;  %vm2815_vm10 = vweird.f32 %v4172_v59 }
 0xde3   : > { %vm2816_vm12 = vmor %vm2814_vm11, %vm2815_vm10 }
 0xde4   : > { %v2811_v47 = vsub.f32 1.0, %v2810_v17 }
 0xde5   : > { %v2687_v13 = vpop.f32.mrf.mxu0 }
 0xde6   : > { %v2705_v21 = vmul.f32 %v4274_v2, %v2687_v13  ;;  %v2798_v13 = vadd.f32 %v4170_v50, %v2797_v51  ;;  %v2803_v2 = vand.u32 2147483647, %v2776_v12 }
 0xde8   : > { %v2717_v29 = vadd.f32 %v2713_v8, %v2705_v21  ;;  %v2805_v8 = vand.u32 2147483648, %v2776_v12  ;;  %v2802_v21 = vsel %vm2801_vm8, %v4170_v50, %v2798_v13  ;;  %vm2804_vm9 = vcmp.eq.f32.partialorder %v2803_v2, 8.507059e+37 }
 0xdea   : > { %v2724_v34 = vpack.c.bf16 %v2717_v29, %v2716_v37  ;;  %v2812_v37 = vmul.f32 %v4172_v59, %v2811_v47  ;;  %v2806_v29 = vor.u32 1.1754944e-38, %v2805_v8 }
 0xdec   : > { %3819 = vmatmul.msk.bf16.gmra.mxu1 %vm456_vm1, %v2724_v34  ;;  %v2807_v34 = vsel %vm2804_vm9, %v2806_v29, %v2802_v21 }
 0xe59   : > { %v2753_v49 = vpop.f32.mrf.mxu1 }
 0xe5a   : > { %v2754_v7 = vadd.f32 %v3964_v62, %v2753_v49 }
 0xe5c   : > { %2843 = vrot.lane.b32.xlu2 %v2754_v7, %s4388_s7  ;;  %v2813_v7 = vadd.f32 %v4172_v59, %v2812_v37 }
 0xe61   : > { %v2755_v10 = vpop.f32.mrf.mxu1 }
 0xe62   : > { %v2756_v60 = vadd.f32 %v3964_v62, %v2755_v10  ;;  %v2820_v10 = vand.u32 2147483648, %v2777_v31 }
 0xe64   : > { %2845 = vrot.lane.b32.xlu1 %v2756_v60, %s4388_s7  ;;  %v2818_v60 = vand.u32 2147483647, %v2777_v31 }
 0xe66   : > { %vm2819_vm14 = vcmp.eq.f32.partialorder %v2818_v60, 8.507059e+37 }
 0xe69   : > { %v2758_v3 = vpop.f32.mrf.mxu1 }
 0xe6a   : > { %v2759_v40 = vadd.f32 %v3964_v62, %v2758_v3  ;;  %v2817_v3 = vsel %vm2816_vm12, %v4172_v59, %v2813_v7 }
 0xe6c   : > { %2847 = vrot.lane.b32.xlu0 %v2759_v40, %s4388_s7  ;;  %v2821_v40 = vor.u32 1.1754944e-38, %v2820_v10 }
 0xe71   : > { %v2760_v6 = vpop.f32.mrf.mxu1 }
 0xe72   : > { %v2761_v25 = vadd.f32 %v3964_v62, %v2760_v6  ;;  %v2822_v6 = vsel %vm2819_vm14, %v2821_v40, %v2817_v3 }
 0xe74   : > { %2849 = vrot.lane.b32.xlu2 %v2761_v25, %s4388_s7 }
 0xeb6   : > { %v2844_v19 = vpop.permute.xlu2 %2843 }
 0xeb7   : > { %v2855_v57 = vmul.f32 %v2844_v19, %v2792_v54 }
 0xeb9   : > { %2863 = vrot.lane.b32.xlu0 %v2855_v57, %s4390_s9 }
 0xece   : > { %v2850_v22 = vpop.permute.xlu2 %2849 }
 0xecf   : > { %v2858_v46 = vmul.f32 %v2850_v22, %v2837_v38  ;;  %v3878_v38 = vld [vmem:[#allocation4 + $0x60] sm:$0xff] }
 0xed0   : > { %3012 = vmatpush.bf16.msra.mxu1 %v3878_v38 }
 0xed1   : > { %2869 = vrot.lane.b32.xlu0 %v2858_v46, %s4390_s9 }
 0xed6   : > { %v2846_v62 = vpop.permute.xlu1 %2845 }
 0xed7   : > { %v2856_v49 = vmul.f32 %v2846_v62, %v2807_v34 }
 0xed9   : > { %2865 = vrot.lane.b32.xlu1 %v2856_v49, %s4390_s9 }
 0xede   : > { %v2848_v25 = vpop.permute.xlu0 %2847 }
 0xedf   : > { %v2857_v45 = vmul.f32 %v2848_v25, %v2822_v6 }
 0xee1   : > { %2867 = vrot.lane.b32.xlu2 %v2857_v45, %s4390_s9 }
 0xf2b   : > { %v2864_v24 = vpop.permute.xlu0 %2863 }
 0xf2c   : > { %v2875_v41 = vadd.f32 %v2864_v24, %v4876_v55 }
 0xf2e   : > { %v2881_v1 = vsel %vm456_vm1, %v2875_v41, 0.0 }
 0xf2f   : > { %2882 = vadd.xlane.f32.xlu1 %v2881_v1  ;;  %v3965_v1 = vld [vmem:[#allocation6 + $0x60] ss:$0 sm:$0xff] }
 0xf3b   : > { %v2868_v48 = vpop.permute.xlu2 %2867 }
 0xf3c   : > { %v2877_v58 = vadd.f32 %v2868_v48, %v4885_v56 }
 0xf3e   : > { %v2887_v44 = vsel %vm456_vm1, %v2877_v58, 0.0 }
 0xf3f   : > { %2888 = vadd.xlane.f32.xlu0 %v2887_v44 }
 0xf43   : > { %v2870_v14 = vpop.permute.xlu0 %2869 }
 0xf44   : > { %v2878_v23 = vadd.f32 %v2870_v14, %v4887_v20 }
 0xf46   : > { %v2890_v15 = vsel %vm456_vm1, %v2878_v23, 0.0 }
 0xf47   : > { %2891 = vadd.xlane.f32.xlu1 %v2890_v15  ;;  %v3966_v15 = vld [vmem:[#allocation6 + $0x68] ss:$0 sm:$0xff] }
 0xf4b   : > { %v2866_v33 = vpop.permute.xlu1 %2865 }
 0xf4c   : > { %v2876_v39 = vadd.f32 %v2866_v33, %v4878_v11 }
 0xf4e   : > { %v2884_v55 = vsel %vm456_vm1, %v2876_v39, 0.0 }
 0xf4f   : > { %2885 = vadd.xlane.f32.xlu2 %v2884_v55 }
 0xfa2   : > { %v2883_v42 = vpop.xlane.xlu1 %2882 }
 0xfa3   : > { %v2893_v16 = vmul.f32 %v2883_v42, %v4778_v27 }
 0xfa5   : > { %v5191_v63 = vsub.f32 %v2875_v41, %v2893_v16 }
 0xfa7   : > { %v2901_v56 = vmul.f32 %v5191_v63, %v5191_v63 }
 0xfa9   : > { %v2905_v43 = vsel %vm456_vm1, %v2901_v56, 0.0 }
 0xfaa   : > { %2906 = vadd.xlane.f32.xlu2 %v2905_v43 }
 0xfb2   : > { %v2889_v20 = vpop.xlane.xlu0 %2888 }
 0xfb3   : > { %v2895_v35 = vmul.f32 %v2889_v20, %v4778_v27 }
 0xfb5   : > { %v5197_v53 = vsub.f32 %v2877_v58, %v2895_v35 }
 0xfb7   : > { %v2903_v11 = vmul.f32 %v5197_v53, %v5197_v53 }
 0xfb9   : > { %v2911_v12 = vsel %vm456_vm1, %v2903_v11, 0.0 }
 0xfba   : > { %2912 = vadd.xlane.f32.xlu1 %v2911_v12  ;;  %v2892_v54 = vpop.xlane.xlu1 %2891 }
 0xfbb   : > { %v2896_v19 = vmul.f32 %v2892_v54, %v4778_v27 }
 0xfbd   : > { %v5203_v57 = vsub.f32 %v2878_v23, %v2896_v19 }
 0xfbf   : > { %v2904_v9 = vmul.f32 %v5203_v57, %v5203_v57 }
 0xfc1   : > { %v2914_v28 = vsel %vm456_vm1, %v2904_v9, 0.0 }
 0xfc2   : > { %v2886_v32 = vpop.xlane.xlu2 %2885  ;;  %2915 = vadd.xlane.f32.xlu2 %v2914_v28 }
 0xfc3   : > { %v2894_v31 = vmul.f32 %v2886_v32, %v4778_v27 }
 0xfc5   : > { %v2898_v30 = vsub.f32 %v2876_v39, %v2894_v31 }
 0xfc7   : > { %v2902_v50 = vmul.f32 %v2898_v30, %v2898_v30 }
 0xfc9   : > { %v2908_v0 = vsel %vm456_vm1, %v2902_v50, 0.0 }
 0xfca   : > { %2909 = vadd.xlane.f32.xlu0 %v2908_v0 }
0x101d   : > { %v2907_v4 = vpop.xlane.xlu2 %2906 }
0x101e   : > { %v2917_v52 = vmul.f32 %v2907_v4, %v4778_v27 }
0x1020   : > { %v2921_v26 = vadd.f32 1e-06, %v2917_v52 }
0x1022   : > { %4173 = vrsqrt.f32 %v2921_v26  ;;  %vm2931_vm2 = vweird.f32 %v2921_v26 }
0x1028   : > { %v4174_v18 = vpop.eup %4173 }
0x1029   : > { %v2926_v36 = vmul.f32 %v4174_v18, %v2921_v26  ;;  %vm2932_vm15 = vweird.f32 %v4174_v18 }
0x102a   : > { %vm2933_vm3 = vmor %vm2931_vm2, %vm2932_vm15 }
0x102b   : > { %v2927_v13 = vmul.f32 %v4174_v18, %v2926_v36 }
0x102d   : > { %v2913_v59 = vpop.xlane.xlu1 %2912  ;;  %v2928_v21 = vmul.f32 0.5, %v2927_v13 }
0x102e   : > { %v2919_v17 = vmul.f32 %v2913_v59, %v4778_v27 }
0x102f   : > { %v2929_v29 = vsub.f32 1.5, %v2928_v21 }
0x1030   : > { %v2923_v46 = vadd.f32 1e-06, %v2919_v17 }
0x1031   : > { %v2930_v7 = vmul.f32 %v4174_v18, %v2929_v29 }
0x1032   : > { %vm2951_vm11 = vweird.f32 %v2923_v46 }
0x1033   : > { %v2934_v6 = vsel %vm2933_vm3, %v4174_v18, %v2930_v7 }
0x1034   : > { %v2965_v48 = vmul.f32 %v2934_v6, %v5191_v63 }
0x1035   : > { %v2916_v61 = vpop.xlane.xlu2 %2915 }
0x1036   : > { %v2920_v51 = vmul.f32 %v2916_v61, %v4778_v27  ;;  %v2970_v33 = vmul.f32 %v3965_v1, %v2965_v48 }
0x1038   : > { %v2924_v22 = vadd.f32 1e-06, %v2920_v51  ;;  %v5215_v56 = vadd.f32 %v3966_v15, %v2970_v33 }
0x103a   : > { %4175 = vrsqrt.f32 %v2924_v22  ;;  %vm2961_vm9 = vweird.f32 %v2924_v22 }
0x103b   : > { %4177 = vrsqrt.f32 %v2923_v46 }
0x103d   : > { %v2910_v47 = vpop.xlane.xlu0 %2909 }
0x103e   : > { %v2918_v8 = vmul.f32 %v2910_v47, %v4778_v27 }
0x1040   : > { %v2922_v2 = vadd.f32 1e-06, %v2918_v8  ;;  %v4176_v37 = vpop.eup %4175 }
0x1041   : > { %v4178_v34 = vpop.eup %4177  ;;  %v2956_v62 = vmul.f32 %v4176_v37, %v2924_v22  ;;  %vm2962_vm7 = vweird.f32 %v4176_v37 }
0x1042   : > { %4179 = vrsqrt.f32 %v2922_v2  ;;  %v2946_v10 = vmul.f32 %v4178_v34, %v2923_v46  ;;  %vm2941_vm5 = vweird.f32 %v2922_v2  ;;  %vm2952_vm8 = vweird.f32 %v4178_v34  ;;  %vm2963_vm10 = vmor %vm2961_vm9, %vm2962_vm7 }
0x1043   : > { %v2957_v3 = vmul.f32 %v4176_v37, %v2956_v62  ;;  %vm2953_vm12 = vmor %vm2951_vm11, %vm2952_vm8 }
0x1044   : > { %v2947_v25 = vmul.f32 %v4178_v34, %v2946_v10 }
0x1045   : > { %v2958_v24 = vmul.f32 0.5, %v2957_v3 }
0x1046   : > { %v2948_v58 = vmul.f32 0.5, %v2947_v25 }
0x1047   : > { %v2959_v14 = vsub.f32 1.5, %v2958_v24 }
0x1048   : > { %v4180_v49 = vpop.eup %4179  ;;  %v2949_v55 = vsub.f32 1.5, %v2948_v58 }
0x1049   : > { %v2936_v60 = vmul.f32 %v4180_v49, %v2922_v2  ;;  %vm2942_vm4 = vweird.f32 %v4180_v49  ;;  %v2960_v16 = vmul.f32 %v4176_v37, %v2959_v14 }
0x104a   : > { %vm2943_vm6 = vmor %vm2941_vm5, %vm2942_vm4  ;;  %v2950_v20 = vmul.f32 %v4178_v34, %v2949_v55 }
0x104b   : > { %v2937_v40 = vmul.f32 %v4180_v49, %v2936_v60  ;;  %v2964_v35 = vsel %vm2963_vm10, %v4176_v37, %v2960_v16 }
0x104c   : > { %v2954_v11 = vsel %vm2953_vm12, %v4178_v34, %v2950_v20  ;;  %v2968_v12 = vmul.f32 %v2964_v35, %v5203_v57 }
0x104d   : > { %v2938_v45 = vmul.f32 0.5, %v2937_v40  ;;  %v2967_v54 = vmul.f32 %v2954_v11, %v5197_v53 }
0x104e   : > { %v2973_v19 = vmul.f32 %v3965_v1, %v2968_v12 }
0x104f   : > { %v2939_v41 = vsub.f32 1.5, %v2938_v45  ;;  %v2972_v9 = vmul.f32 %v3965_v1, %v2967_v54 }
0x1050   : > { %v5224_v28 = vadd.f32 %v3966_v15, %v2973_v19 }
0x1051   : > { %v2940_v44 = vmul.f32 %v4180_v49, %v2939_v41  ;;  %v5226_v32 = vadd.f32 %v3966_v15, %v2972_v9 }
0x1053   : > { %v2944_v23 = vsel %vm2943_vm6, %v4180_v49, %v2940_v44  ;;  %v2984_v31 = vpack.c.bf16 %v5224_v28, %v5226_v32 }
0x1054   : > { %v2966_v39 = vmul.f32 %v2944_v23, %v2898_v30  ;;  %v3967_v30 = vld [vmem:[#allocation6 + $0x48] ss:$0 sm:$0xff] }
0x1056   : > { %v2971_v42 = vmul.f32 %v3965_v1, %v2966_v39 }
0x1058   : > { %v5217_v43 = vadd.f32 %v3966_v15, %v2971_v42 }
0x105a   : > { %v2983_v63 = vpack.c.bf16 %v5217_v43, %v5215_v56 }
0x105c   : > { %3832 = vmatmul.msk.bf16.vlgmr.msra.gmra.mxu1 %vm456_vm1, %v2983_v63 }
0x106c   : > { %3833 = vmatmul.msk.bf16.gmra.mxu1 %vm456_vm1, %v2984_v31 }
0x10d9   : > { %v3014_v50 = vpop.f32.mrf.mxu1 }
0x10da   : > { %v5231_v0 = vadd.f32 %v3967_v30, %v3014_v50 }
0x10dc   : > { %v3834_v4 = vmul.f32 -1.442695, %v5231_v0 }
0x10de   : > { %4181 = vpow2.f32 %v3834_v4  ;;  %v3883_v4 = vld [vmem:[#allocation4 + $0x98] sm:$0xff] }
0x10df   : > { %3166 = vmatpush.bf16.msrb.mxu1 %v3883_v4 }
0x10e1   : > { %v3016_v57 = vpop.f32.mrf.mxu1 }
0x10e2   : > { %v5234_v53 = vadd.f32 %v3967_v30, %v3016_v57  ;;  %v3882_v57 = vld [vmem:[#allocation4 + $0x90] sm:$0xff] }
0x10e3   : > { %3167 = vmatpush.bf16.msrb.mxu1 %v3882_v57 }
0x10e4   : > { %v4182_v52 = vpop.eup %4181  ;;  %v3835_v26 = vmul.f32 -1.442695, %v5234_v53 }
0x10e5   : > { %v3036_v59 = vadd.f32 1.0, %v4182_v52  ;;  %v3881_v52 = vld [vmem:[#allocation4 + $0x88] sm:$0xff] }
0x10e6   : > { %4183 = vpow2.f32 %v3835_v26  ;;  %v3880_v26 = vld [vmem:[#allocation4 + $0x80] sm:$0xff] }
0x10e7   : > { %4185 = vrcp.f32 %v3036_v59  ;;  %v3051_v13 = vand.u32 2147483648, %v3036_v59  ;;  %v3049_v2 = vand.u32 2147483647, %v3036_v59  ;;  %vm3045_vm15 = vweird.f32 %v3036_v59  ;;  %3168 = vmatpush.bf16.msrb.mxu1 %v3881_v52 }
0x10e9   : > { %v3019_v61 = vpop.f32.mrf.mxu1  ;;  %v3052_v49 = vor.u32 1.1754944e-38, %v3051_v13  ;;  %vm3050_vm3 = vcmp.eq.f32.partialorder %v3049_v2, 8.507059e+37  ;;  %v3968_v2 = vld [vmem:[#allocation6 + $0x58] ss:$0 sm:$0xff] }
0x10ea   : > { %v5237_v5 = vadd.f32 %v3967_v30, %v3019_v61 }
0x10eb   : > { %3169 = vmatpush.bf16.msrb.mxu1 %v3880_v26 }
0x10ec   : > { %v4184_v18 = vpop.eup %4183  ;;  %v3836_v51 = vmul.f32 -1.442695, %v5237_v5 }
0x10ed   : > { %v4186_v17 = vpop.eup %4185  ;;  %v3037_v36 = vadd.f32 1.0, %v4184_v18 }
0x10ee   : > { %4187 = vpow2.f32 %v3836_v51  ;;  %v3041_v38 = vmul.f32 %v4186_v17, %v3036_v59  ;;  %vm3046_vm14 = vweird.f32 %v4186_v17 }
0x10ef   : > { %4189 = vrcp.f32 %v3037_v36  ;;  %vm3047_vm2 = vmor %vm3045_vm15, %vm3046_vm14  ;;  %v3066_v40 = vand.u32 2147483648, %v3037_v36  ;;  %v3064_v25 = vand.u32 2147483647, %v3037_v36  ;;  %vm3060_vm5 = vweird.f32 %v3037_v36 }
0x10f0   : > { %v3042_v22 = vsub.f32 1.0, %v3041_v38 }
0x10f1   : > { %v3021_v46 = vpop.f32.mrf.mxu1  ;;  %v3067_v48 = vor.u32 1.1754944e-38, %v3066_v40  ;;  %vm3065_vm7 = vcmp.eq.f32.partialorder %v3064_v25, 8.507059e+37 }
0x10f2   : > { %v5240_v47 = vadd.f32 %v3967_v30, %v3021_v46  ;;  %v3043_v8 = vmul.f32 %v4186_v17, %v3042_v22 }
0x10f4   : > { %v4188_v21 = vpop.eup %4187  ;;  %v3837_v37 = vmul.f32 -1.442695, %v5240_v47  ;;  %v3044_v29 = vadd.f32 %v4186_v17, %v3043_v8 }
0x10f5   : > { %v4190_v34 = vpop.eup %4189  ;;  %v3038_v62 = vadd.f32 1.0, %v4188_v21 }
0x10f6   : > { %4191 = vpow2.f32 %v3837_v37  ;;  %v3048_v7 = vsel %vm3047_vm2, %v4186_v17, %v3044_v29  ;;  %v3056_v10 = vmul.f32 %v4190_v34, %v3037_v36  ;;  %vm3061_vm4 = vweird.f32 %v4190_v34 }
0x10f7   : > { %4193 = vrcp.f32 %v3038_v62  ;;  %v3053_v60 = vsel %vm3050_vm3, %v3052_v49, %v3048_v7  ;;  %vm3062_vm6 = vmor %vm3060_vm5, %vm3061_vm4  ;;  %v3081_v15 = vand.u32 2147483648, %v3038_v62  ;;  %v3079_v39 = vand.u32 2147483647, %v3038_v62 }
0x10f8   : > { %3104 = vrot.lane.b32.xlu0 %v3053_v60, %s4389_s8  ;;  %v3057_v3 = vsub.f32 1.0, %v3056_v10  ;;  %vm3075_vm9 = vweird.f32 %v3038_v62 }
0x10f9   : > { %v3082_v16 = vor.u32 1.1754944e-38, %v3081_v15  ;;  %vm3080_vm11 = vcmp.eq.f32.partialorder %v3079_v39, 8.507059e+37 }
0x10fa   : > { %v3058_v6 = vmul.f32 %v4190_v34, %v3057_v3 }
0x10fc   : > { %v4192_v45 = vpop.eup %4191  ;;  %v3059_v24 = vadd.f32 %v4190_v34, %v3058_v6 }
0x10fd   : > { %v4194_v41 = vpop.eup %4193  ;;  %v3039_v1 = vadd.f32 1.0, %v4192_v45 }
0x10fe   : > { %v3063_v58 = vsel %vm3062_vm6, %v4190_v34, %v3059_v24  ;;  %v3071_v44 = vmul.f32 %v4194_v41, %v3038_v62  ;;  %vm3076_vm8 = vweird.f32 %v4194_v41 }
0x10ff   : > { %4195 = vrcp.f32 %v3039_v1  ;;  %v3068_v14 = vsel %vm3065_vm7, %v3067_v48, %v3063_v58  ;;  %vm3077_vm10 = vmor %vm3075_vm9, %vm3076_vm8  ;;  %v3096_v12 = vand.u32 2147483648, %v3039_v1  ;;  %v3094_v19 = vand.u32 2147483647, %v3039_v1 }
0x1100   : > { %3106 = vrot.lane.b32.xlu1 %v3068_v14, %s4389_s8  ;;  %v3072_v23 = vsub.f32 1.0, %v3071_v44  ;;  %vm3090_vm14 = vweird.f32 %v3039_v1 }
0x1101   : > { %v3097_v31 = vor.u32 1.1754944e-38, %v3096_v12  ;;  %vm3095_vm2 = vcmp.eq.f32.partialorder %v3094_v19, 8.507059e+37  ;;  %v3310_v19 = vld [vmem:[%s315_s13] sm:$0x1] }
0x1102   : > { %v3073_v33 = vmul.f32 %v4194_v41, %v3072_v23  ;;  %3315 = vst [vmem:[#allocation1] ss:$9 sm:$0xff] %v3310_v19 }
0x1104   : > { %v3074_v55 = vadd.f32 %v4194_v41, %v3073_v33 }
0x1105   : > { %v4196_v42 = vpop.eup %4195 }
0x1106   : > { %v3078_v20 = vsel %vm3077_vm10, %v4194_v41, %v3074_v55  ;;  %v3086_v63 = vmul.f32 %v4196_v42, %v3039_v1  ;;  %vm3091_vm12 = vweird.f32 %v4196_v42 }
0x1107   : > { %v3083_v35 = vsel %vm3080_vm11, %v3082_v16, %v3078_v20  ;;  %vm3092_vm15 = vmor %vm3090_vm14, %vm3091_vm12  ;;  %vm3400_vm14 = vcmask 254976  }
0x1108   : > { %3108 = vrot.lane.b32.xlu2 %v3083_v35, %s4389_s8  ;;  %v3087_v11 = vsub.f32 1.0, %v3086_v63 }
0x110a   : > { %v3088_v54 = vmul.f32 %v4196_v42, %v3087_v11 }
0x110c   : > { %v3089_v9 = vadd.f32 %v4196_v42, %v3088_v54 }
0x110e   : > { %v3093_v30 = vsel %vm3092_vm15, %v4196_v42, %v3089_v9  ;;  %v3311_v9 = vld [vmem:[%s315_s13 + $0x1] sm:$0x1] }
0x110f   : > { %v3098_v50 = vsel %vm3095_vm2, %v3097_v31, %v3093_v30  ;;  %v3308_v31 = vld [vmem:[%s5388_s5 + $0x8] sm:$0xff]  ;;  %3317 = vst [vmem:[#allocation1 + $0x1] ss:$9 sm:$0xff] %v3311_v9 }
0x1110   : > { %3110 = vrot.lane.b32.xlu0 %v3098_v50, %s4389_s8  ;;  %3336 = vmatpush.msra.mxu2 %v3308_v31  ;;  %v3972_v31 = vld [vmem:[%s5388_s5 + $0x90] ss:$0 sm:$0xff] }
0x1162   : > { %v3109_v36 = vpop.permute.xlu2 %3108 }
0x1163   : > { %v3118_v22 = vmul.f32 %v3109_v36, %v5237_v5 }
0x116a   : > { %v3105_v59 = vpop.permute.xlu0 %3104 }
0x116b   : > { %v3116_v18 = vmul.f32 %v3105_v59, %v5231_v0 }
0x1172   : > { %v3107_v61 = vpop.permute.xlu1 %3106 }
0x1173   : > { %v3117_v51 = vmul.f32 %v3107_v61, %v5234_v53 }
0x1175   : > { %v3129_v17 = vpack.c.bf16 %v3117_v51, %v3116_v18  ;;  %v3318_v18 = vld [vmem:[#allocation1] sm:$0xff]  ;;  %v3344_v51 = vld [vmem:[%s5388_s5 + $0x28] sm:$0xff] }
0x1176   : > { %3857 = vmatmul.msk.f32.vlgmr.msra.gmra.mxu2 %vm394_vm0, %v3318_v18 }
0x1177   : > { %3854 = vmatmul.msk.bf16.vlgmr.msrb.gmra.mxu1 %vm1758_vm13, %v3129_v17  ;;  %v3343_v17 = vld [vmem:[%s5388_s5 + $0x20] sm:$0xff]  ;;  %3387 = vmatpush.msrb.mxu2 %v3344_v51  ;;  %v3431_v51 = vld [vmem:[%s5388_s5 + $0x68] sm:$0xff] }
0x1178   : > { %3449 = vmatpush.msra.mxu3 %v3431_v51 }
0x1179   : > { %3388 = vmatpush.msrb.mxu2 %v3343_v17  ;;  %v3430_v17 = vld [vmem:[%s5388_s5 + $0x60] sm:$0xff] }
0x117a   : > { %3450 = vmatpush.msra.mxu3 %v3430_v17 }
0x1182   : > { %v3111_v38 = vpop.permute.xlu0 %3110 }
0x1183   : > { %v3119_v46 = vmul.f32 %v3111_v38, %v5240_v47 }
0x1185   : > { %v3130_v13 = vpack.c.bf16 %v3119_v46, %v3118_v22 }
0x1187   : > { %3855 = vmatmul.msk.bf16.gmra.mxu1 %vm1758_vm13, %v3130_v13  ;;  %v3342_v13 = vld [vmem:[%s5388_s5 + $0x18] sm:$0xff] }
0x1188   : > { %3389 = vmatpush.msrb.mxu2 %v3342_v13 }
0x11f4   : > { %v3171_v8 = vpop.f32.mrf.mxu1 }
0x11f5   : > { %v3172_v10 = vadd.f32 %v3968_v2, %v3171_v8 }
0x11fc   : > { %v3173_v21 = vpop.f32.mrf.mxu1 }
0x11fd   : > { %v3174_v37 = vadd.f32 %v3968_v2, %v3173_v21 }
0x11ff   : > { %v3182_v0 = vadd.f32 %v3174_v37, %v5217_v43  ;;  %v3181_v43 = vadd.f32 %v3172_v10, %v5215_v56 }
0x1201   : > { %v3190_v53 = vsel %vm456_vm1, %v3182_v0, 0.0  ;;  %v3187_v3 = vsel %vm456_vm1, %v3181_v43, 0.0 }
0x1202   : > { %3191 = vadd.xlane.f32.xlu2 %v3190_v53 }
0x1204   : > { %v3176_v29 = vpop.f32.mrf.mxu1 }
0x1205   : > { %v3177_v34 = vadd.f32 %v3968_v2, %v3176_v29 }
0x1207   : > { %v3183_v62 = vadd.f32 %v3177_v34, %v5226_v32 }
0x1209   : > { %v3193_v5 = vsel %vm456_vm1, %v3183_v62, 0.0 }
0x120a   : > { %3194 = vadd.xlane.f32.xlu1 %v3193_v5 }
0x120c   : > { %v3178_v47 = vpop.f32.mrf.mxu1 }
0x120d   : > { %v3179_v49 = vadd.f32 %v3968_v2, %v3178_v47 }
0x120f   : > { %v3184_v7 = vadd.f32 %v3179_v49, %v5224_v28 }
0x1211   : > { %v3196_v60 = vsel %vm456_vm1, %v3184_v7, 0.0 }
0x1212   : > { %3197 = vadd.xlane.f32.xlu0 %v3196_v60 }
0x121a   : > { %3188 = vadd.xlane.f32.xlu0 %v3187_v3 }
0x1275   : > { %v3192_v40 = vpop.xlane.xlu2 %3191 }
0x1276   : > { %v3200_v6 = vmul.f32 %v3192_v40, %v4778_v27 }
0x1278   : > { %v5262_v32 = vsub.f32 %v3182_v0, %v3200_v6 }
0x127a   : > { %v3208_v25 = vmul.f32 %v5262_v32, %v5262_v32 }
0x127c   : > { %v3214_v45 = vsel %vm456_vm1, %v3208_v25, 0.0  ;;  %v3969_v25 = vld [vmem:[#allocation6 + $0x70] ss:$0 sm:$0xff] }
0x127d   : > { %v3195_v28 = vpop.xlane.xlu1 %3194  ;;  %3215 = vadd.xlane.f32.xlu0 %v3214_v45 }
0x127e   : > { %v3201_v24 = vmul.f32 %v3195_v28, %v4778_v27 }
0x1280   : > { %v5268_v41 = vsub.f32 %v3183_v62, %v3201_v24 }
0x1282   : > { %v3209_v56 = vmul.f32 %v5268_v41, %v5268_v41 }
0x1284   : > { %v3217_v1 = vsel %vm456_vm1, %v3209_v56, 0.0  ;;  %v3970_v56 = vld [vmem:[#allocation6 + $0x78] ss:$0 sm:$0xff] }
0x1285   : > { %v3198_v48 = vpop.xlane.xlu0 %3197  ;;  %3218 = vadd.xlane.f32.xlu1 %v3217_v1 }
0x1286   : > { %v3202_v58 = vmul.f32 %v3198_v48, %v4778_v27 }
0x1288   : > { %v5274_v44 = vsub.f32 %v3184_v7, %v3202_v58 }
0x128a   : > { %v3210_v14 = vmul.f32 %v5274_v44, %v5274_v44 }
0x128c   : > { %v3220_v23 = vsel %vm456_vm1, %v3210_v14, 0.0 }
0x128d   : > { %3221 = vadd.xlane.f32.xlu2 %v3220_v23  ;;  %v3189_v15 = vpop.xlane.xlu0 %3188 }
0x128e   : > { %v3199_v33 = vmul.f32 %v3189_v15, %v4778_v27 }
0x1290   : > { %v5280_v39 = vsub.f32 %v3181_v43, %v3199_v33 }
0x1292   : > { %v3207_v55 = vmul.f32 %v5280_v39, %v5280_v39 }
0x1294   : > { %v3211_v42 = vsel %vm456_vm1, %v3207_v55, 0.0 }
0x1295   : > { %3212 = vadd.xlane.f32.xlu2 %v3211_v42  ;;  %v386_v42 = vld [vmem:[#allocation2 + $0x200] sm:$0x3] }
0x12f0   : > { %v3216_v16 = vpop.xlane.xlu0 %3215 }
0x12f1   : > { %v3224_v20 = vmul.f32 %v3216_v16, %v4778_v27  ;;  %v3348_v16 = vld [vmem:[%s5388_s5 + $0x48] sm:$0xff] }
0x12f3   : > { %v3228_v63 = vadd.f32 1e-06, %v3224_v20  ;;  %v3341_v20 = vld [vmem:[%s5388_s5 + $0x10] sm:$0xff] }
0x12f4   : > { %3390 = vmatpush.msrb.mxu2 %v3341_v20 }
0x12f5   : > { %4197 = vrsqrt.f32 %v3228_v63  ;;  %vm3247_vm5 = vweird.f32 %v3228_v63 }
0x12f8   : > { %v3219_v35 = vpop.xlane.xlu1 %3218 }
0x12f9   : > { %v3225_v11 = vmul.f32 %v3219_v35, %v4778_v27  ;;  %v3971_v35 = vld [vmem:[%s5388_s5 + $0x88] ss:$0 sm:$0xff] }
0x12fb   : > { %v3229_v12 = vadd.f32 1e-06, %v3225_v11  ;;  %v4198_v54 = vpop.eup %4197  ;;  %v3345_v11 = vld [vmem:[%s5388_s5 + $0x30] sm:$0xff] }
0x12fc   : > { %v3242_v30 = vmul.f32 %v4198_v54, %v3228_v63  ;;  %vm3248_vm13 = vweird.f32 %v4198_v54  ;;  %v3346_v63 = vld [vmem:[%s5388_s5 + $0x38] sm:$0xff] }
0x12fd   : > { %4199 = vrsqrt.f32 %v3229_v12  ;;  %vm3257_vm3 = vweird.f32 %v3229_v12  ;;  %vm3249_vm7 = vmor %vm3247_vm5, %vm3248_vm13  ;;  %vm3459_vm13 = vcmask 123904  }
0x12fe   : > { %v3243_v26 = vmul.f32 %v4198_v54, %v3242_v30 }
0x1300   : > { %v3222_v50 = vpop.xlane.xlu2 %3221  ;;  %v3244_v36 = vmul.f32 0.5, %v3243_v26 }
0x1301   : > { %v3226_v4 = vmul.f32 %v3222_v50, %v4778_v27 }
0x1302   : > { %v3245_v37 = vsub.f32 1.5, %v3244_v36  ;;  %v3429_v36 = vld [vmem:[%s5388_s5 + $0x58] sm:$0xff] }
0x1303   : > { %v4200_v57 = vpop.eup %4199  ;;  %v3230_v52 = vadd.f32 1e-06, %v3226_v4  ;;  %3451 = vmatpush.msra.mxu3 %v3429_v36 }
0x1304   : > { %v3252_v59 = vmul.f32 %v4200_v57, %v3229_v12  ;;  %vm3258_vm0 = vweird.f32 %v4200_v57  ;;  %v3246_v34 = vmul.f32 %v4198_v54, %v3245_v37  ;;  %v3338_v12 = vpop.f32.mrf.mxu2 }
0x1305   : > { %4201 = vrsqrt.f32 %v3230_v52  ;;  %vm3259_vm4 = vmor %vm3257_vm3, %vm3258_vm0  ;;  %vm3267_vm8 = vweird.f32 %v3230_v52 }
0x1306   : > { %v3253_v61 = vmul.f32 %v4200_v57, %v3252_v59  ;;  %v3250_v7 = vsel %vm3249_vm7, %v4198_v54, %v3246_v34  ;;  %v3339_v54 = vadd.f32 %v3971_v35, %v3338_v12 }
0x1307   : > { %v3272_v45 = vmul.f32 %v3250_v7, %v5262_v32  ;;  %v3975_v7 = vld [vmem:[%s5388_s5 + $0xa8] ss:$0 sm:$0xff] }
0x1308   : > { %v3254_v38 = vmul.f32 0.5, %v3253_v61  ;;  %v3213_v22 = vpop.xlane.xlu2 %3212 }
0x1309   : > { %v3223_v46 = vmul.f32 %v3213_v22, %v4778_v27  ;;  %v3277_v14 = vmul.f32 %v3969_v25, %v3272_v45 }
0x130a   : > { %v3255_v8 = vsub.f32 1.5, %v3254_v38  ;;  %v3428_v38 = vld [vmem:[%s5388_s5 + $0x50] sm:$0xff] }
0x130b   : > { %v4202_v2 = vpop.eup %4201  ;;  %v3227_v21 = vadd.f32 1e-06, %v3223_v46  ;;  %v3282_v33 = vadd.f32 %v3970_v56, %v3277_v14  ;;  %3452 = vmatpush.msra.mxu3 %v3428_v38 }
0x130c   : > { %v3262_v0 = vmul.f32 %v4202_v2, %v3230_v52  ;;  %v3256_v53 = vmul.f32 %v4200_v57, %v3255_v8  ;;  %vm3268_vm6 = vweird.f32 %v4202_v2 }
0x130d   : > { %4203 = vrsqrt.f32 %v3227_v21  ;;  %vm3269_vm9 = vmor %vm3267_vm8, %vm3268_vm6  ;;  %vm3237_vm11 = vweird.f32 %v3227_v21  ;;  %vm3498_vm6 = vcmask 130048  }
0x130e   : > { %v3263_v29 = vmul.f32 %v4202_v2, %v3262_v0  ;;  %v3260_v5 = vsel %vm3259_vm4, %v4200_v57, %v3256_v53 }
0x130f   : > { %v3273_v43 = vmul.f32 %v3260_v5, %v5268_v41 }
0x1310   : > { %v3264_v62 = vmul.f32 0.5, %v3263_v29  ;;  %v3973_v29 = vld [vmem:[%s5388_s5 + $0x98] ss:$0 sm:$0xff] }
0x1311   : > { %v3278_v1 = vmul.f32 %v3969_v25, %v3273_v43 }
0x1312   : > { %v3265_v47 = vsub.f32 1.5, %v3264_v62 }
0x1313   : > { %v4204_v49 = vpop.eup %4203  ;;  %v3283_v41 = vadd.f32 %v3970_v56, %v3278_v1 }
0x1314   : > { %v3266_v10 = vmul.f32 %v4202_v2, %v3265_v47  ;;  %v3232_v60 = vmul.f32 %v4204_v49, %v3227_v21  ;;  %vm3238_vm10 = vweird.f32 %v4204_v49 }
0x1315   : > { %vm3239_vm12 = vmor %vm3237_vm11, %vm3238_vm10 }
0x1316   : > { %v3270_v3 = vsel %vm3269_vm9, %v4202_v2, %v3266_v10  ;;  %v3233_v40 = vmul.f32 %v4204_v49, %v3232_v60 }
0x1317   : > { %v3274_v6 = vmul.f32 %v3270_v3, %v5274_v44  ;;  %v4392_v3 = vmov 16.0  }
0x1318   : > { %v3234_v28 = vmul.f32 0.5, %v3233_v40 }
0x1319   : > { %v3279_v24 = vmul.f32 %v3969_v25, %v3274_v6 }
0x131a   : > { %v3235_v48 = vsub.f32 1.5, %v3234_v28 }
0x131b   : > { %v3284_v58 = vadd.f32 %v3970_v56, %v3279_v24 }
0x131c   : > { %v3236_v23 = vmul.f32 %v4204_v49, %v3235_v48 }
0x131d   : > { %3300 = vmatpush.msra.mxu1 %v3284_v58 }
0x131e   : > { %v3240_v15 = vsel %vm3239_vm12, %v4204_v49, %v3236_v23  ;;  %v3495_v23 = vld [vmem:[%s5388_s5 + $0x78] sm:$0xff] }
0x131f   : > { %3301 = vmatpush.msra.mxu1 %v3283_v41  ;;  %v3271_v44 = vmul.f32 %v3240_v15, %v5280_v39  ;;  %v3347_v39 = vld [vmem:[%s5388_s5 + $0x40] sm:$0xff]  ;;  %v3494_v41 = vld [vmem:[%s5388_s5 + $0x70] sm:$0xff] }
0x1321   : > { %3302 = vmatpush.msra.mxu1 %v3282_v33  ;;  %v3276_v32 = vmul.f32 %v3969_v25, %v3271_v44 }
0x1323   : > { %v3281_v55 = vadd.f32 %v3970_v56, %v3276_v32 }
0x1325   : > { %3303 = vmatpush.msra.mxu1 %v3281_v55 }
0x1326   : > { %3856 = vmatmul.msk.f32.vlgmr.msra.gmra.mxu1 %vm456_vm1, %v386_v42 }
0x1327   : > { %3364 = vmatpush.msrb.mxu1 %v3348_v16 }
0x1329   : > { %3365 = vmatpush.msrb.mxu1 %v3347_v39 }
0x132b   : > { %3366 = vmatpush.msrb.mxu1 %v3346_v63  ;;  %v3976_v63 = vld [vmem:[%s5388_s5 + $0xb0] ss:$0 sm:$0xff] }
0x132d   : > { %3367 = vmatpush.msrb.mxu1 %v3345_v11  ;;  %v3977_v11 = vld [vmem:[%s5388_s5 + $0xb8] ss:$0 sm:$0xff] }
0x132e   : > { %3858 = vmatmul.msk.f32.vlgmr.msrb.gmra.mxu1 %vm456_vm1, %v3339_v54 }
0x132f   : > { %3516 = vmatpush.msra.mxu1 %v3495_v23 }
0x1331   : > { %3517 = vmatpush.msra.mxu1 %v3494_v41 }
0x13a3   : > { %v3305_v19 = vpop.f32.mrf.mxu1 }
0x13a4   : > { %3859 = vmatmul.msk.f32.vlgmr.msrb.gmra.mxu2 %vm456_vm1, %v3305_v19 }
0x13ab   : > { %v3369_v9 = vpop.f32.mrf.mxu1 }
0x1427   : > { %v3392_v30 = vpop.f32.mrf.mxu2 }
0x1428   : > { %v3393_v50 = vadd.f32 %v3392_v30, %v3369_v9  ;;  %v3978_v30 = vld [vmem:[%s5388_s5 + $0xc0] ss:$0 sm:$0xff] }
0x142a   : > { %v3397_v4 = vadd.f32 %v3972_v31, %v3393_v50  ;;  %v4393_v31 = vmov 0  }
0x142b   : > { %3953 = vset.pattern.permute.xlu0 %v4393_v31 }
0x142c   : > { %v3401_v57 = vsel %vm3400_vm14, %v3397_v4, 0.0 }
0x142d   : > { %3402 = vadd.xlane.f32.xlu1 %v3401_v57 }
0x14a0   : > { %v3403_v52 = vpop.xlane.xlu1 %3402 }
0x14a1   : > { %v3404_v26 = vmul.f32 %v3403_v52, %v4778_v27 }
0x14a3   : > { %v3405_v59 = vsub.f32 %v3397_v4, %v3404_v26 }
0x14a5   : > { %v3406_v61 = vmul.f32 %v3405_v59, %v3405_v59 }
0x14a7   : > { %v3407_v18 = vsel %vm3400_vm14, %v3406_v61, 0.0 }
0x14a8   : > { %3408 = vadd.xlane.f32.xlu0 %v3407_v18 }
0x151b   : > { %v3409_v22 = vpop.xlane.xlu0 %3408 }
0x151c   : > { %v3410_v46 = vmul.f32 %v3409_v22, %v4778_v27  ;;  %v3974_v27 = vld [vmem:[%s5388_s5 + $0xa0] ss:$0 sm:$0xff] }
0x151e   : > { %v3411_v13 = vadd.f32 1e-06, %v3410_v46 }
0x1520   : > { %4205 = vrsqrt.f32 %v3411_v13  ;;  %vm3418_vm2 = vweird.f32 %v3411_v13 }
0x1521   : > { %4207 = vrcp.f32 %v4392_v3 }
0x1526   : > { %v4206_v8 = vpop.eup %4205 }
0x1527   : > { %v3413_v2 = vmul.f32 %v4206_v8, %v3411_v13  ;;  %vm3419_vm15 = vweird.f32 %v4206_v8  ;;  %v4208_v40 = vpop.eup %4207 }
0x1528   : > { %vm3420_vm0 = vmor %vm3418_vm2, %vm3419_vm15  ;;  %v3464_v6 = vmul.f32 16.0, %v4208_v40  ;;  %vm3468_vm3 = vweird.f32 %v4208_v40 }
0x1529   : > { %v3414_v21 = vmul.f32 %v4206_v8, %v3413_v2 }
0x152a   : > { %v3465_v25 = vsub.f32 1.0, %v3464_v6 }
0x152b   : > { %v3415_v37 = vmul.f32 0.5, %v3414_v21 }
0x152c   : > { %v3466_v45 = vmul.f32 %v4208_v40, %v3465_v25 }
0x152d   : > { %v3416_v0 = vsub.f32 1.5, %v3415_v37 }
0x152e   : > { %v3467_v28 = vadd.f32 %v4208_v40, %v3466_v45 }
0x152f   : > { %v3417_v53 = vmul.f32 %v4206_v8, %v3416_v0 }
0x1530   : > { %v3469_v24 = vsel %vm3468_vm3, %v4208_v40, %v3467_v28 }
0x1531   : > { %v3421_v34 = vsel %vm3420_vm0, %v4206_v8, %v3417_v53 }
0x1532   : > { %v3422_v62 = vmul.f32 %v3421_v34, %v3405_v59 }
0x1534   : > { %v3424_v5 = vmul.f32 %v3973_v29, %v3422_v62 }
0x1536   : > { %v3426_v47 = vadd.f32 %v3974_v27, %v3424_v5 }
0x1538   : > { %v3427_v49 = vmax.f32 %v3426_v47, 0.0 }
0x153a   : > { %3860 = vmatmul.msk.f32.vlgmr.msra.gmra.mxu3 %vm456_vm1, %v3427_v49 }
0x15bd   : > { %v3454_v10 = vpop.f32.mrf.mxu3 }
0x15be   : > { %v3455_v60 = vadd.f32 %v3975_v7, %v3454_v10 }
0x15c0   : > { %v3460_v43 = vsel %vm3459_vm13, %v3455_v60, 0.0 }
0x15c1   : > { %3461 = vadd.xlane.f32.xlu2 %v3460_v43 }
0x1634   : > { %v3462_v56 = vpop.xlane.xlu2 %3461 }
0x1635   : > { %v3470_v1 = vmul.f32 %v3469_v24, %v3462_v56 }
0x1637   : > { %v3471_v48 = vsub.f32 %v3455_v60, %v3470_v1 }
0x1639   : > { %v3472_v58 = vmul.f32 %v3471_v48, %v3471_v48 }
0x163b   : > { %v3473_v14 = vsel %vm3459_vm13, %v3472_v58, 0.0 }
0x163c   : > { %3474 = vadd.xlane.f32.xlu1 %v3473_v14 }
0x16af   : > { %v3475_v15 = vpop.xlane.xlu1 %3474 }
0x16b0   : > { %v3476_v33 = vmul.f32 %v3475_v15, %v3469_v24 }
0x16b2   : > { %v3477_v44 = vadd.f32 1e-06, %v3476_v33 }
0x16b4   : > { %4209 = vrsqrt.f32 %v3477_v44  ;;  %vm3484_vm4 = vweird.f32 %v3477_v44 }
0x16ba   : > { %v4210_v32 = vpop.eup %4209 }
0x16bb   : > { %v3479_v55 = vmul.f32 %v4210_v32, %v3477_v44  ;;  %vm3485_vm1 = vweird.f32 %v4210_v32 }
0x16bc   : > { %vm3486_vm5 = vmor %vm3484_vm4, %vm3485_vm1 }
0x16bd   : > { %v3480_v42 = vmul.f32 %v4210_v32, %v3479_v55 }
0x16bf   : > { %v3481_v16 = vmul.f32 0.5, %v3480_v42 }
0x16c1   : > { %v3482_v20 = vsub.f32 1.5, %v3481_v16 }
0x16c3   : > { %v3483_v39 = vmul.f32 %v4210_v32, %v3482_v20 }
0x16c5   : > { %v3487_v35 = vsel %vm3486_vm5, %v4210_v32, %v3483_v39 }
0x16c6   : > { %v3488_v12 = vmul.f32 %v3487_v35, %v3471_v48 }
0x16c8   : > { %v3490_v54 = vmul.f32 %v3976_v63, %v3488_v12 }
0x16ca   : > { %v3492_v19 = vadd.f32 %v3977_v11, %v3490_v54 }
0x16cc   : > { %v3493_v9 = vmax.f32 %v3492_v19, 0.0 }
0x16ce   : > { %3861 = vmatmul.msk.f32.vlgmr.msra.gmra.mxu1 %vm3498_vm6, %v3493_v9 }
0x174b   : > { %v3519_v50 = vpop.f32.mrf.mxu1 }
0x174c   : > { %v3520_v4 = vadd.f32 %v3978_v30, %v3519_v50 }
0x174e   : > { %3524 = vperm.xlu0 %3953, %v3520_v4  }
0x17c0   : > { %v3525_v57 = vpop.permute.xlu0 %3524 }
0x17c1   : > { %3527 = vst [vmem:[%s320_s19] sm:$0x3] %v3525_v57 }
0x17c2 PF: > { %s18_s21 = sadd.s32 1, %s4379_s21  }
0x17c3   : > { %p15_p9 = scmp.ge.s32.totalorder %s18_s21, 4  }
0x17c5   :  { %17 = sbr.rel (!%p15_p9) target bundleno = 2 (0x2), region = 93 }
0x17ca   :  { %3547 = vsyncpa [#allocation3], 1 }
0x17cb   :  { %3549 = vsyncpa [#allocation3 + $0x1], 1 }
0x17cc   :  { %3550 = vsyncpa [#allocation5], 1 }

</bundles_post_ra>
